<compile_context>
chip_gen: v7x
topology: tpu7x:2x2x1
jax: 0.10.0
libtpu: 0.0.40
codegen_flags: <defaults>
</compile_context>

<pallas_src>
import jax
import jax.numpy as jnp
from jax import lax
from jax.experimental import pallas as pl
from jax.experimental.pallas import tpu as pltpu

EPS_IN = 1e-5  # nn.InstanceNorm2d default eps


def _instance_norm(v, gamma, beta_):
    # v: (TB, K, N); per-(batch, channel) statistics over the N points.
    # Exact only because InstanceNorm2d here runs with per-sample stats
    # (track_running_stats=False), which is also what makes the mp1-branch
    # elimination below exact.
    mean = jnp.mean(v, axis=-1, keepdims=True)
    meansq = jnp.mean(v * v, axis=-1, keepdims=True)
    var = jnp.maximum(meansq - mean * mean, 0.0)   # guard one-pass cancellation
    return gamma * (v - mean) * lax.rsqrt(var + EPS_IN) + beta_


def fkaconv_kernel(scal_ref, kp_ref, w2bd_ref, w3abd_ref, w3bbd_ref,
                   wcv_ref, diff_ref, x_ref, out_ref):
    alpha = scal_ref[0]
    beta = scal_ref[1]

    d = diff_ref[...]                      # (TB, D, N) = points - support
    x = x_ref[...]                         # (TB, I, N)

    tb, d_dim, n_pts = d.shape
    n_in = x.shape[1]
    k_sz = kp_ref.shape[0]

    # ---- distances & distance weights (VPU / EUP) ---------------------------
    sq = d[:, 0:1, :] * d[:, 0:1, :]
    for dd in range(1, d_dim):
        sq = sq + d[:, dd:dd + 1, :] * d[:, dd:dd + 1, :]
    dist = jnp.sqrt(sq)                                        # (TB, 1, N)

    dw = jax.nn.sigmoid(beta - alpha * dist)                   # (TB, 1, N)
    dws = jnp.sum(dw, axis=-1, keepdims=True)                  # (TB, 1, 1)
    dws = dws + (dws == 0).astype(dw.dtype) + 1e-6
    dw = dw * (float(n_pts) / dws)          # exact reciprocal: tiny tensor

    # ---- fc1 (D=3 contraction) as VPU broadcast FMAs ------------------------
    # 1/norm_radius is folded into the fc1 weight in the wrapper.
    m1 = kp_ref[:, 0:1][None] * d[:, 0:1, :]
    for dd in range(1, d_dim):
        m1 = m1 + kp_ref[:, dd:dd + 1][None] * d[:, dd:dd + 1, :]
    g1 = kp_ref[:, d_dim + 0:d_dim + 1][None]
    b1 = kp_ref[:, d_dim + 1:d_dim + 2][None]
    g2 = kp_ref[:, d_dim + 2:d_dim + 3][None]
    b2 = kp_ref[:, d_dim + 3:d_dim + 4][None]
    m1 = jnp.maximum(_instance_norm(m1, g1, b1), 0.0)          # (TB, K, N)

    # ---- fc2 -> bn2 -> relu --------------------------------------------------
    # The w2[:, K:] @ mp1 branch is constant over the N points, so the
    # per-sample InstanceNorm removes it exactly -> only w2[:, :K] survives.
    # fc2/fc3 run as ONE block-diagonal matmul on the flattened (TB*K, N)
    # layout (leading-dim merge, layout-free for K % 8 == 0).
    m1f = m1.reshape(tb * k_sz, n_pts)                         # free reshape
    m2f = jnp.dot(w2bd_ref[...], m1f, preferred_element_type=jnp.float32)
    m2 = jnp.maximum(_instance_norm(m2f.reshape(tb, k_sz, n_pts), g2, b2), 0.0)

    # ---- fc3 -> relu, then distance weight ----------------------------------
    mp2 = jnp.max(m2 * dw, axis=-1, keepdims=True)             # (TB, K, 1)
    m2f = m2.reshape(tb * k_sz, n_pts)
    mp2f = mp2.reshape(tb * k_sz, 1)                           # free reshape
    # rank-1 branch: one (TB*K,TB*K) x (TB*K,1) matmul, no broadcast temporary
    t2f = jnp.dot(w3bbd_ref[...], mp2f, preferred_element_type=jnp.float32)
    m3f = jnp.maximum(
        jnp.dot(w3abd_ref[...], m2f, preferred_element_type=jnp.float32) + t2f,
        0.0)
    m3 = m3f.reshape(tb, k_sz, n_pts) * dw                     # (TB, K, N)

    # ---- feature projection: feat[b,i,k] = sum_n x[b,i,n] * m3[b,k,n] -------
    feat = lax.dot_general(x, m3, (((2,), (2,)), ((0,), (0,))),
                           preferred_element_type=jnp.float32)  # (TB, I, K)

    # ---- cv: single (TB, I*K) x (I*K, O_pad) contraction --------------------
    feat2 = feat.reshape(tb, n_in * k_sz)       # small (4 KB) relayout
    out_ref[...] = jnp.dot(feat2, wcv_ref[...],
                           preferred_element_type=jnp.float32
                           ).astype(out_ref.dtype)


def fkaconv_forward(params, x, points, support_points, tb=8):
    """Pallas-backed FKAConv forward (eval mode). Returns (features, support)."""
    B, num_in, N = x.shape
    D = points.shape[1]
    K = params["w1"].shape[0]
    out_ch = params["wcv"].shape[0]
    IK = num_in * K
    O_pad = ((out_ch + 127) // 128) * 128       # lane-dense output slab

    # NOTE: raise tb (32-64) for real batch sizes; keep >= ~4 grid steps per
    # TensorCore on v7x so the input DMA overlaps compute.
    tb = max(1, int(tb))
    B_pad = ((B + tb - 1) // tb) * tb

    # Precompute (points - support) in the wrapper: halves the per-step point
    # input bytes and removes one in-kernel subtraction.
    diff = (points - support_points).astype(jnp.float32)
    x32 = x.astype(jnp.float32)
    if B_pad != B:
        pad = ((0, B_pad - B), (0, 0), (0, 0))
        diff = jnp.pad(diff, pad)
        x32 = jnp.pad(x32, pad)

    # Scalars (SMEM): alpha, beta.
    scal = jnp.stack([jnp.asarray(params["alpha"], jnp.float32),
                      jnp.asarray(params["beta"], jnp.float32)])

    # Per-K params packed into one (K, D+4) tile: [fc1_w / r | g1 b1 g2 b2].
    inv_r = 1.0 / jnp.asarray(params["norm_radius"], jnp.float32)
    w1s = params["w1"].astype(jnp.float32) * inv_r
    kp = jnp.concatenate(
        [w1s,
         params["g1"].reshape(K, 1).astype(jnp.float32),
         params["b1"].reshape(K, 1).astype(jnp.float32),
         params["g2"].reshape(K, 1).astype(jnp.float32),
         params["b2"].reshape(K, 1).astype(jnp.float32)], axis=1)

    # Block-diagonal fc2/fc3 weights over the flattened (tb*K, *) layout.
    eye_tb = jnp.eye(tb, dtype=jnp.float32)
    w2bd = jnp.kron(eye_tb, params["w2"][:, :K].astype(jnp.float32))
    w3abd = jnp.kron(eye_tb, params["w3"][:, :K].astype(jnp.float32))
    w3bbd = jnp.kron(eye_tb, params["w3"][:, K:].astype(jnp.float32))

    # Conv2d(I, O, (1, K)) weight as one (I*K, O_pad) contraction matrix:
    #   wcv_mat[i*K + k, o] = wcv[o, i, k]
    wcv_mat = jnp.transpose(params["wcv"].astype(jnp.float32), (1, 2, 0))
    wcv_mat = wcv_mat.reshape(IK, out_ch)
    wcv_mat = jnp.pad(wcv_mat, ((0, 0), (0, O_pad - out_ch)))

    grid_spec = pltpu.PrefetchScalarGridSpec(
        num_scalar_prefetch=0,
        grid=(B_pad // tb,),
        in_specs=[
            pl.BlockSpec(memory_space=pltpu.MemorySpace.SMEM),   # alpha, beta
            pl.BlockSpec((K, D + 4), lambda b: (0, 0)),          # packed K-params
            pl.BlockSpec((tb * K, tb * K), lambda b: (0, 0)),    # fc2 block-diag
            pl.BlockSpec((tb * K, tb * K), lambda b: (0, 0)),    # fc3a block-diag
            pl.BlockSpec((tb * K, tb * K), lambda b: (0, 0)),    # fc3b block-diag
            pl.BlockSpec((IK, O_pad), lambda b: (0, 0)),         # cv weight
            pl.BlockSpec((tb, D, N), lambda b: (b, 0, 0)),       # points - support
            pl.BlockSpec((tb, num_in, N), lambda b: (b, 0, 0)),  # input features
        ],
        out_specs=pl.BlockSpec((tb, O_pad), lambda b: (b, 0)),
    )

    out = pl.pallas_call(
        fkaconv_kernel,
        out_shape=jax.ShapeDtypeStruct((B_pad, O_pad), jnp.float32),
        grid_spec=grid_spec,
        compiler_params=pltpu.CompilerParams(
            dimension_semantics=("parallel",)),   # v7x: 2 TCs split the grid
    )(scal, kp, w2bd, w3abd, w3bbd, wcv_mat, diff, x32)

    features = out[:B, :out_ch].reshape(B, out_ch, 1, 1)
    return features, support_points


def fkaconv_reference(params, x, points, support_points):
    """Pure-JAX reference mirroring the PyTorch forward (eval mode)."""
    alpha = params["alpha"]
    beta = params["beta"]
    norm_radius = params["norm_radius"]
    w1, w2, w3 = params["w1"], params["w2"], params["w3"]
    g1, b1, g2, b2 = params["g1"], params["b1"], params["g2"], params["b2"]
    wcv = params["wcv"]                                         # (O, I, K)

    pts = points - support_points                               # (B, D, N)
    dist = jnp.sqrt(jnp.sum(pts ** 2, axis=1))                  # (B, N)
    pts = pts / norm_radius

    dw = jax.nn.sigmoid(-alpha * dist + beta)                   # (B, N)
    dws = jnp.sum(dw, axis=1, keepdims=True)
    dws = dws + (dws == 0).astype(dw.dtype) + 1e-6
    dw = dw / dws * dist.shape[1]
    dw = dw[:, None, :]                                         # (B, 1, N)

    def inorm(v, g, b_):
        mean = jnp.mean(v, axis=2, keepdims=True)
        var = jnp.mean((v - mean) ** 2, axis=2, keepdims=True)
        return g[None, :, None] * (v - mean) / jnp.sqrt(var + EPS_IN) + b_[None, :, None]

    m1 = jax.nn.relu(inorm(jnp.einsum("kd,bdn->bkn", w1, pts), g1, b1))
    mp1 = jnp.max(m1 * dw, axis=2, keepdims=True)
    cat1 = jnp.concatenate([m1, jnp.broadcast_to(mp1, m1.shape)], axis=1)
    m2 = jax.nn.relu(inorm(jnp.einsum("kj,bjn->bkn", w2, cat1), g2, b2))
    mp2 = jnp.max(m2 * dw, axis=2, keepdims=True)
    cat2 = jnp.concatenate([m2, jnp.broadcast_to(mp2, m2.shape)], axis=1)
    m3 = jax.nn.relu(jnp.einsum("kj,bjn->bkn", w3, cat2)) * dw  # (B, K, N)

    feat = jnp.einsum("bin,bkn->bik", x, m3)                    # (B, I, K)
    out = jnp.einsum("oik,bik->bo", wcv, feat)                  # (B, O)
    return out.reshape(x.shape[0], wcv.shape[0], 1, 1), support_points


if __name__ == "__main__":
    B, D, N = 16, 3, 256         # batch, spatial dim, number of points
    IC, O, K = 8, 16, 16         # in_channels, out_channels, kernel_size

    key = jax.random.PRNGKey(0)
    k0, k1, k2, k3, k4, k5, k6 = jax.random.split(key, 7)

    x = jax.random.normal(k0, (B, IC, N), dtype=jnp.float32)
    points = jax.random.normal(k1, (B, D, N), dtype=jnp.float32)
    support = points + 0.1 * jax.random.normal(k2, (B, D, N), dtype=jnp.float32)

    params = {
        "w1": 0.3 * jax.random.normal(k3, (K, D), dtype=jnp.float32),        # fc1
        "w2": 0.2 * jax.random.normal(k4, (K, 2 * K), dtype=jnp.float32),    # fc2
        "w3": 0.2 * jax.random.normal(k5, (K, 2 * K), dtype=jnp.float32),    # fc3
        "wcv": 0.1 * jax.random.normal(k6, (O, IC, K), dtype=jnp.float32),   # cv
        "g1": jnp.ones((K,), jnp.float32), "b1": jnp.zeros((K,), jnp.float32),
        "g2": jnp.ones((K,), jnp.float32), "b2": jnp.zeros((K,), jnp.float32),
        "alpha": jnp.float32(1.0), "beta": jnp.float32(1.0),
        "norm_radius": jnp.float32(1.0),
    }

    feats, sup_out = fkaconv_forward(params, x, points, support, tb=8)
    feats = jax.block_until_ready(feats)

    feats_ref, _ = fkaconv_reference(params, x, points, support)
    assert feats.shape == (B, O, 1, 1)
    assert jnp.allclose(feats, feats_ref, rtol=2e-2, atol=2e-2), (
        float(jnp.max(jnp.abs(feats - feats_ref))))
    assert sup_out is support

    print("KERNEL_OK")
</pallas_src>

<mosaic_0001>
module attributes {stable_mosaic.version = 11 : i64} {
  func.func @fkaconv_kernel(%arg0: i32, %arg1: memref<2xf32, #tpu.memory_space<smem>>, %arg2: memref<16x7xf32, #tpu.memory_space<vmem>>, %arg3: memref<128x128xf32, #tpu.memory_space<vmem>>, %arg4: memref<128x128xf32, #tpu.memory_space<vmem>>, %arg5: memref<128x128xf32, #tpu.memory_space<vmem>>, %arg6: memref<128x128xf32, #tpu.memory_space<vmem>>, %arg7: memref<8x3x256xf32, #tpu.memory_space<vmem>>, %arg8: memref<8x8x256xf32, #tpu.memory_space<vmem>>, %arg9: memref<8x128xf32, #tpu.memory_space<vmem>>) attributes {dimension_semantics = [#tpu.dimension_semantics<parallel>], iteration_bounds = array<i64: 2>, scalar_prefetch = 0 : i64, scratch_operands = 0 : i64, tpu.core_type = #tpu.core_type<tc>, window_params = [{transform_indices = @transform_0, window_bounds = array<i64: 2>}, {pipeline_mode = #tpu.pipeline_mode<synchronous>, transform_indices = @transform_1, window_bounds = array<i64: 16, 7>}, {pipeline_mode = #tpu.pipeline_mode<synchronous>, transform_indices = @transform_2, window_bounds = array<i64: 128, 128>}, {pipeline_mode = #tpu.pipeline_mode<synchronous>, transform_indices = @transform_3, window_bounds = array<i64: 128, 128>}, {pipeline_mode = #tpu.pipeline_mode<synchronous>, transform_indices = @transform_4, window_bounds = array<i64: 128, 128>}, {pipeline_mode = #tpu.pipeline_mode<synchronous>, transform_indices = @transform_5, window_bounds = array<i64: 128, 128>}, {transform_indices = @transform_6, window_bounds = array<i64: 8, 3, 256>}, {transform_indices = @transform_7, window_bounds = array<i64: 8, 8, 256>}, {transform_indices = @transform_8, window_bounds = array<i64: 8, 128>}]} {
    %c0 = arith.constant 0 : index
    %0 = memref.load %arg1[%c0] : memref<2xf32, #tpu.memory_space<smem>>
    %c1 = arith.constant 1 : index
    %1 = memref.load %arg1[%c1] : memref<2xf32, #tpu.memory_space<smem>>
    %c0_0 = arith.constant 0 : index
    %c0_1 = arith.constant 0 : index
    %c0_2 = arith.constant 0 : index
    %2 = vector.load %arg7[%c0_0, %c0_1, %c0_2] : memref<8x3x256xf32, #tpu.memory_space<vmem>>, vector<8x3x256xf32>
    %c0_3 = arith.constant 0 : index
    %c0_4 = arith.constant 0 : index
    %c0_5 = arith.constant 0 : index
    %3 = vector.load %arg8[%c0_3, %c0_4, %c0_5] : memref<8x8x256xf32, #tpu.memory_space<vmem>>, vector<8x8x256xf32>
    %4 = vector.extract_strided_slice %2 {offsets = [0, 0, 0], sizes = [8, 1, 256], strides = [1, 1, 1]} : vector<8x3x256xf32> to vector<8x1x256xf32>
    %5 = vector.extract_strided_slice %2 {offsets = [0, 0, 0], sizes = [8, 1, 256], strides = [1, 1, 1]} : vector<8x3x256xf32> to vector<8x1x256xf32>
    %6 = arith.mulf %4, %5 : vector<8x1x256xf32>
    %7 = vector.extract_strided_slice %2 {offsets = [0, 1, 0], sizes = [8, 1, 256], strides = [1, 1, 1]} : vector<8x3x256xf32> to vector<8x1x256xf32>
    %8 = vector.extract_strided_slice %2 {offsets = [0, 1, 0], sizes = [8, 1, 256], strides = [1, 1, 1]} : vector<8x3x256xf32> to vector<8x1x256xf32>
    %9 = arith.mulf %7, %8 : vector<8x1x256xf32>
    %10 = arith.addf %6, %9 : vector<8x1x256xf32>
    %11 = vector.extract_strided_slice %2 {offsets = [0, 2, 0], sizes = [8, 1, 256], strides = [1, 1, 1]} : vector<8x3x256xf32> to vector<8x1x256xf32>
    %12 = vector.extract_strided_slice %2 {offsets = [0, 2, 0], sizes = [8, 1, 256], strides = [1, 1, 1]} : vector<8x3x256xf32> to vector<8x1x256xf32>
    %13 = arith.mulf %11, %12 : vector<8x1x256xf32>
    %14 = arith.addf %10, %13 : vector<8x1x256xf32>
    %15 = math.sqrt %14 : vector<8x1x256xf32>
    %16 = vector.broadcast %0 : f32 to vector<8x1x256xf32>
    %17 = arith.mulf %16, %15 : vector<8x1x256xf32>
    %18 = vector.broadcast %1 : f32 to vector<8x1x256xf32>
    %19 = arith.subf %18, %17 : vector<8x1x256xf32>
    %20 = arith.negf %19 : vector<8x1x256xf32>
    %21 = math.exp %20 : vector<8x1x256xf32>
    %cst = arith.constant 1.000000e+00 : f32
    %22 = vector.broadcast %cst : f32 to vector<8x1x256xf32>
    %23 = arith.addf %22, %21 : vector<8x1x256xf32>
    %24 = arith.divf %22, %23 : vector<8x1x256xf32>
    %cst_6 = arith.constant dense<0.000000e+00> : vector<8x1xf32>
    %25 = vector.multi_reduction <add>, %24, %cst_6 [2] : vector<8x1x256xf32> to vector<8x1xf32>
    %26 = vector.shape_cast %25 : vector<8x1xf32> to vector<8x1x1xf32>
    %cst_7 = arith.constant 0.000000e+00 : f32
    %27 = vector.broadcast %cst_7 : f32 to vector<8x1x1xf32>
    %28 = arith.cmpf oeq, %26, %27 : vector<8x1x1xf32>
    %29 = arith.extui %28 : vector<8x1x1xi1> to vector<8x1x1xi32>
    %30 = arith.sitofp %29 : vector<8x1x1xi32> to vector<8x1x1xf32>
    %31 = arith.addf %26, %30 : vector<8x1x1xf32>
    %cst_8 = arith.constant 9.99999997E-7 : f32
    %32 = vector.broadcast %cst_8 : f32 to vector<8x1x1xf32>
    %33 = arith.addf %31, %32 : vector<8x1x1xf32>
    %cst_9 = arith.constant 2.560000e+02 : f32
    %34 = vector.broadcast %cst_9 : f32 to vector<8x1x1xf32>
    %35 = arith.divf %34, %33 : vector<8x1x1xf32>
    %36 = vector.broadcast %35 : vector<8x1x1xf32> to vector<8x1x256xf32>
    %37 = arith.mulf %24, %36 : vector<8x1x256xf32>
    %c0_10 = arith.constant 0 : index
    %c0_11 = arith.constant 0 : index
    %38 = vector.load %arg2[%c0_10, %c0_11] : memref<16x7xf32, #tpu.memory_space<vmem>>, vector<16x1xf32>
    %39 = vector.shape_cast %38 : vector<16x1xf32> to vector<1x16x1xf32>
    %40 = vector.extract_strided_slice %2 {offsets = [0, 0, 0], sizes = [8, 1, 256], strides = [1, 1, 1]} : vector<8x3x256xf32> to vector<8x1x256xf32>
    %41 = vector.broadcast %39 : vector<1x16x1xf32> to vector<8x16x256xf32>
    %42 = vector.broadcast %40 : vector<8x1x256xf32> to vector<8x16x256xf32>
    %43 = arith.mulf %41, %42 : vector<8x16x256xf32>
    %c0_12 = arith.constant 0 : index
    %c1_13 = arith.constant 1 : index
    %44 = vector.load %arg2[%c0_12, %c1_13] : memref<16x7xf32, #tpu.memory_space<vmem>>, vector<16x1xf32>
    %45 = vector.shape_cast %44 : vector<16x1xf32> to vector<1x16x1xf32>
    %46 = vector.extract_strided_slice %2 {offsets = [0, 1, 0], sizes = [8, 1, 256], strides = [1, 1, 1]} : vector<8x3x256xf32> to vector<8x1x256xf32>
    %47 = vector.broadcast %45 : vector<1x16x1xf32> to vector<8x16x256xf32>
    %48 = vector.broadcast %46 : vector<8x1x256xf32> to vector<8x16x256xf32>
    %49 = arith.mulf %47, %48 : vector<8x16x256xf32>
    %50 = arith.addf %43, %49 : vector<8x16x256xf32>
    %c0_14 = arith.constant 0 : index
    %c2 = arith.constant 2 : index
    %51 = vector.load %arg2[%c0_14, %c2] : memref<16x7xf32, #tpu.memory_space<vmem>>, vector<16x1xf32>
    %52 = vector.shape_cast %51 : vector<16x1xf32> to vector<1x16x1xf32>
    %53 = vector.extract_strided_slice %2 {offsets = [0, 2, 0], sizes = [8, 1, 256], strides = [1, 1, 1]} : vector<8x3x256xf32> to vector<8x1x256xf32>
    %54 = vector.broadcast %52 : vector<1x16x1xf32> to vector<8x16x256xf32>
    %55 = vector.broadcast %53 : vector<8x1x256xf32> to vector<8x16x256xf32>
    %56 = arith.mulf %54, %55 : vector<8x16x256xf32>
    %57 = arith.addf %50, %56 : vector<8x16x256xf32>
    %c0_15 = arith.constant 0 : index
    %c3 = arith.constant 3 : index
    %58 = vector.load %arg2[%c0_15, %c3] : memref<16x7xf32, #tpu.memory_space<vmem>>, vector<16x1xf32>
    %59 = vector.shape_cast %58 : vector<16x1xf32> to vector<1x16x1xf32>
    %c0_16 = arith.constant 0 : index
    %c4 = arith.constant 4 : index
    %60 = vector.load %arg2[%c0_16, %c4] : memref<16x7xf32, #tpu.memory_space<vmem>>, vector<16x1xf32>
    %61 = vector.shape_cast %60 : vector<16x1xf32> to vector<1x16x1xf32>
    %c0_17 = arith.constant 0 : index
    %c5 = arith.constant 5 : index
    %62 = vector.load %arg2[%c0_17, %c5] : memref<16x7xf32, #tpu.memory_space<vmem>>, vector<16x1xf32>
    %63 = vector.shape_cast %62 : vector<16x1xf32> to vector<1x16x1xf32>
    %c0_18 = arith.constant 0 : index
    %c6 = arith.constant 6 : index
    %64 = vector.load %arg2[%c0_18, %c6] : memref<16x7xf32, #tpu.memory_space<vmem>>, vector<16x1xf32>
    %65 = vector.shape_cast %64 : vector<16x1xf32> to vector<1x16x1xf32>
    %cst_19 = arith.constant dense<0.000000e+00> : vector<8x16xf32>
    %66 = vector.multi_reduction <add>, %57, %cst_19 [2] : vector<8x16x256xf32> to vector<8x16xf32>
    %67 = vector.shape_cast %66 : vector<8x16xf32> to vector<8x16x1xf32>
    %cst_20 = arith.constant 2.560000e+02 : f32
    %68 = vector.broadcast %cst_20 : f32 to vector<8x16x1xf32>
    %69 = arith.divf %67, %68 : vector<8x16x1xf32>
    %70 = arith.mulf %57, %57 : vector<8x16x256xf32>
    %cst_21 = arith.constant dense<0.000000e+00> : vector<8x16xf32>
    %71 = vector.multi_reduction <add>, %70, %cst_21 [2] : vector<8x16x256xf32> to vector<8x16xf32>
    %72 = vector.shape_cast %71 : vector<8x16xf32> to vector<8x16x1xf32>
    %cst_22 = arith.constant 2.560000e+02 : f32
    %73 = vector.broadcast %cst_22 : f32 to vector<8x16x1xf32>
    %74 = arith.divf %72, %73 : vector<8x16x1xf32>
    %75 = arith.mulf %69, %69 : vector<8x16x1xf32>
    %76 = arith.subf %74, %75 : vector<8x16x1xf32>
    %cst_23 = arith.constant 0.000000e+00 : f32
    %77 = vector.broadcast %cst_23 : f32 to vector<8x16x1xf32>
    %78 = arith.maximumf %76, %77 : vector<8x16x1xf32>
    %79 = vector.broadcast %69 : vector<8x16x1xf32> to vector<8x16x256xf32>
    %80 = arith.subf %57, %79 : vector<8x16x256xf32>
    %81 = vector.broadcast %59 : vector<1x16x1xf32> to vector<8x16x256xf32>
    %82 = arith.mulf %81, %80 : vector<8x16x256xf32>
    %cst_24 = arith.constant 9.99999974E-6 : f32
    %83 = vector.broadcast %cst_24 : f32 to vector<8x16x1xf32>
    %84 = arith.addf %78, %83 : vector<8x16x1xf32>
    %85 = math.rsqrt %84 : vector<8x16x1xf32>
    %86 = vector.broadcast %85 : vector<8x16x1xf32> to vector<8x16x256xf32>
    %87 = arith.mulf %82, %86 : vector<8x16x256xf32>
    %88 = vector.broadcast %61 : vector<1x16x1xf32> to vector<8x16x256xf32>
    %89 = arith.addf %87, %88 : vector<8x16x256xf32>
    %cst_25 = arith.constant 0.000000e+00 : f32
    %90 = vector.broadcast %cst_25 : f32 to vector<8x16x256xf32>
    %91 = arith.maximumf %89, %90 : vector<8x16x256xf32>
    %92 = vector.shape_cast %91 : vector<8x16x256xf32> to vector<128x256xf32>
    %c0_26 = arith.constant 0 : index
    %c0_27 = arith.constant 0 : index
    %93 = vector.load %arg3[%c0_26, %c0_27] : memref<128x128xf32, #tpu.memory_space<vmem>>, vector<128x128xf32>
    %cst_28 = arith.constant dense<0.000000e+00> : vector<128x256xf32>
    %94 = tpu.matmul %93, %92, %cst_28 {dimension_numbers = #tpu.dot_dimension_numbers<[1], [0], [0], [1], [0, 0, 1, 1], [], []>} : vector<128x128xf32>, vector<128x256xf32>, vector<128x256xf32> -> vector<128x256xf32>
    %95 = vector.shape_cast %94 : vector<128x256xf32> to vector<8x16x256xf32>
    %cst_29 = arith.constant dense<0.000000e+00> : vector<8x16xf32>
    %96 = vector.multi_reduction <add>, %95, %cst_29 [2] : vector<8x16x256xf32> to vector<8x16xf32>
    %97 = vector.shape_cast %96 : vector<8x16xf32> to vector<8x16x1xf32>
    %cst_30 = arith.constant 2.560000e+02 : f32
    %98 = vector.broadcast %cst_30 : f32 to vector<8x16x1xf32>
    %99 = arith.divf %97, %98 : vector<8x16x1xf32>
    %100 = arith.mulf %95, %95 : vector<8x16x256xf32>
    %cst_31 = arith.constant dense<0.000000e+00> : vector<8x16xf32>
    %101 = vector.multi_reduction <add>, %100, %cst_31 [2] : vector<8x16x256xf32> to vector<8x16xf32>
    %102 = vector.shape_cast %101 : vector<8x16xf32> to vector<8x16x1xf32>
    %cst_32 = arith.constant 2.560000e+02 : f32
    %103 = vector.broadcast %cst_32 : f32 to vector<8x16x1xf32>
    %104 = arith.divf %102, %103 : vector<8x16x1xf32>
    %105 = arith.mulf %99, %99 : vector<8x16x1xf32>
    %106 = arith.subf %104, %105 : vector<8x16x1xf32>
    %cst_33 = arith.constant 0.000000e+00 : f32
    %107 = vector.broadcast %cst_33 : f32 to vector<8x16x1xf32>
    %108 = arith.maximumf %106, %107 : vector<8x16x1xf32>
    %109 = vector.broadcast %99 : vector<8x16x1xf32> to vector<8x16x256xf32>
    %110 = arith.subf %95, %109 : vector<8x16x256xf32>
    %111 = vector.broadcast %63 : vector<1x16x1xf32> to vector<8x16x256xf32>
    %112 = arith.mulf %111, %110 : vector<8x16x256xf32>
    %cst_34 = arith.constant 9.99999974E-6 : f32
    %113 = vector.broadcast %cst_34 : f32 to vector<8x16x1xf32>
    %114 = arith.addf %108, %113 : vector<8x16x1xf32>
    %115 = math.rsqrt %114 : vector<8x16x1xf32>
    %116 = vector.broadcast %115 : vector<8x16x1xf32> to vector<8x16x256xf32>
    %117 = arith.mulf %112, %116 : vector<8x16x256xf32>
    %118 = vector.broadcast %65 : vector<1x16x1xf32> to vector<8x16x256xf32>
    %119 = arith.addf %117, %118 : vector<8x16x256xf32>
    %cst_35 = arith.constant 0.000000e+00 : f32
    %120 = vector.broadcast %cst_35 : f32 to vector<8x16x256xf32>
    %121 = arith.maximumf %119, %120 : vector<8x16x256xf32>
    %122 = vector.broadcast %37 : vector<8x1x256xf32> to vector<8x16x256xf32>
    %123 = arith.mulf %121, %122 : vector<8x16x256xf32>
    %cst_36 = arith.constant dense<0xFF800000> : vector<8x16xf32>
    %124 = vector.multi_reduction <maximumf>, %123, %cst_36 [2] : vector<8x16x256xf32> to vector<8x16xf32>
    %125 = vector.shape_cast %124 : vector<8x16xf32> to vector<8x16x1xf32>
    %126 = vector.shape_cast %121 : vector<8x16x256xf32> to vector<128x256xf32>
    %127 = vector.shape_cast %125 : vector<8x16x1xf32> to vector<128x1xf32>
    %c0_37 = arith.constant 0 : index
    %c0_38 = arith.constant 0 : index
    %128 = vector.load %arg5[%c0_37, %c0_38] : memref<128x128xf32, #tpu.memory_space<vmem>>, vector<128x128xf32>
    %cst_39 = arith.constant dense<0.000000e+00> : vector<128x1xf32>
    %129 = tpu.matmul %128, %127, %cst_39 {dimension_numbers = #tpu.dot_dimension_numbers<[1], [0], [0], [1], [0, 0, 1, 1], [], []>} : vector<128x128xf32>, vector<128x1xf32>, vector<128x1xf32> -> vector<128x1xf32>
    %c0_40 = arith.constant 0 : index
    %c0_41 = arith.constant 0 : index
    %130 = vector.load %arg4[%c0_40, %c0_41] : memref<128x128xf32, #tpu.memory_space<vmem>>, vector<128x128xf32>
    %cst_42 = arith.constant dense<0.000000e+00> : vector<128x256xf32>
    %131 = tpu.matmul %130, %126, %cst_42 {dimension_numbers = #tpu.dot_dimension_numbers<[1], [0], [0], [1], [0, 0, 1, 1], [], []>} : vector<128x128xf32>, vector<128x256xf32>, vector<128x256xf32> -> vector<128x256xf32>
    %132 = vector.broadcast %129 : vector<128x1xf32> to vector<128x256xf32>
    %133 = arith.addf %131, %132 : vector<128x256xf32>
    %cst_43 = arith.constant 0.000000e+00 : f32
    %134 = vector.broadcast %cst_43 : f32 to vector<128x256xf32>
    %135 = arith.maximumf %133, %134 : vector<128x256xf32>
    %136 = vector.shape_cast %135 : vector<128x256xf32> to vector<8x16x256xf32>
    %137 = vector.broadcast %37 : vector<8x1x256xf32> to vector<8x16x256xf32>
    %138 = arith.mulf %136, %137 : vector<8x16x256xf32>
    %cst_44 = arith.constant dense<0.000000e+00> : vector<8x8x16xf32>
    %139 = tpu.matmul %3, %138, %cst_44 {dimension_numbers = #tpu.dot_dimension_numbers<[2], [2], [1], [1], [0, 0, 0, 1, 1, 1], [0], [0]>} : vector<8x8x256xf32>, vector<8x16x256xf32>, vector<8x8x16xf32> -> vector<8x8x16xf32>
    %140 = vector.shape_cast %139 : vector<8x8x16xf32> to vector<8x128xf32>
    %c0_45 = arith.constant 0 : index
    %c0_46 = arith.constant 0 : index
    %141 = vector.load %arg6[%c0_45, %c0_46] : memref<128x128xf32, #tpu.memory_space<vmem>>, vector<128x128xf32>
    %cst_47 = arith.constant dense<0.000000e+00> : vector<8x128xf32>
    %142 = tpu.matmul %140, %141, %cst_47 {dimension_numbers = #tpu.dot_dimension_numbers<[1], [0], [0], [1], [0, 0, 1, 1], [], []>} : vector<8x128xf32>, vector<128x128xf32>, vector<8x128xf32> -> vector<8x128xf32>
    %c0_48 = arith.constant 0 : index
    %c0_49 = arith.constant 0 : index
    %143 = vector.load %arg9[%c0_48, %c0_49] : memref<8x128xf32, #tpu.memory_space<vmem>>, vector<8x128xf32>
    tpu.vector_store %arg9[%c0_48, %c0_49], %142 {strides = array<i32>} : memref<8x128xf32, #tpu.memory_space<vmem>>, vector<8x128xf32>,
    return
  }
  func.func @transform_0(%arg0: i32) -> i32 {
    %c0_i32 = arith.constant 0 : i32
    %c0_i32_0 = arith.constant 0 : i32
    return %c0_i32 : i32
  }
  func.func @transform_1(%arg0: i32) -> (i32, i32) {
    %c0_i32 = arith.constant 0 : i32
    %c0_i32_0 = arith.constant 0 : i32
    %c0_i32_1 = arith.constant 0 : i32
    return %c0_i32, %c0_i32_0 : i32, i32
  }
  func.func @transform_2(%arg0: i32) -> (i32, i32) {
    %c0_i32 = arith.constant 0 : i32
    %c0_i32_0 = arith.constant 0 : i32
    %c0_i32_1 = arith.constant 0 : i32
    return %c0_i32, %c0_i32_0 : i32, i32
  }
  func.func @transform_3(%arg0: i32) -> (i32, i32) {
    %c0_i32 = arith.constant 0 : i32
    %c0_i32_0 = arith.constant 0 : i32
    %c0_i32_1 = arith.constant 0 : i32
    return %c0_i32, %c0_i32_0 : i32, i32
  }
  func.func @transform_4(%arg0: i32) -> (i32, i32) {
    %c0_i32 = arith.constant 0 : i32
    %c0_i32_0 = arith.constant 0 : i32
    %c0_i32_1 = arith.constant 0 : i32
    return %c0_i32, %c0_i32_0 : i32, i32
  }
  func.func @transform_5(%arg0: i32) -> (i32, i32) {
    %c0_i32 = arith.constant 0 : i32
    %c0_i32_0 = arith.constant 0 : i32
    %c0_i32_1 = arith.constant 0 : i32
    return %c0_i32, %c0_i32_0 : i32, i32
  }
  func.func @transform_6(%arg0: i32) -> (i32, i32, i32) {
    %c0_i32 = arith.constant 0 : i32
    %c0_i32_0 = arith.constant 0 : i32
    %c0_i32_1 = arith.constant 0 : i32
    return %arg0, %c0_i32, %c0_i32_0 : i32, i32, i32
  }
  func.func @transform_7(%arg0: i32) -> (i32, i32, i32) {
    %c0_i32 = arith.constant 0 : i32
    %c0_i32_0 = arith.constant 0 : i32
    %c0_i32_1 = arith.constant 0 : i32
    return %arg0, %c0_i32, %c0_i32_0 : i32, i32, i32
  }
  func.func @transform_8(%arg0: i32) -> (i32, i32) {
    %c0_i32 = arith.constant 0 : i32
    %c0_i32_0 = arith.constant 0 : i32
    return %arg0, %c0_i32 : i32, i32
  }
}

</mosaic_0001>

<bundles_post_ra>
// kernel: tpu_custom_call.1
= control target key start
LH: loop header
LB: loop body
LE: loop exit
PB: predicated region body
PF: predicated region fallthrough
CT: control target
= control target key end

     0   :  { %s7448_s0 = inlined_call_operand.vmem [shape: f32[2], index: 0, kind: input, shape index: {}]   ;;  %s7449_s1 = inlined_call_operand.vmem [shape: f32[16,7], index: 1, kind: input, shape index: {}]   ;;  %s7450_s2 = inlined_call_operand.hbm [shape: f32[128,128], index: 2, kind: input, shape index: {}]   ;;  %s7451_s3 = inlined_call_operand.hbm [shape: f32[128,128], index: 3, kind: input, shape index: {}]   ;;  %s7452_s4 = inlined_call_operand.hbm [shape: f32[128,128], index: 4, kind: input, shape index: {}]   ;;  %s7453_s5 = inlined_call_operand.hbm [shape: f32[128,128], index: 5, kind: input, shape index: {}]   ;;  %s7454_s6 = inlined_call_operand.vmem [shape: f32[16,3,256], index: 6, kind: input, shape index: {}]   ;;  %s7455_s7 = inlined_call_operand.vmem [shape: f32[16,8,256], index: 7, kind: input, shape index: {}]   ;;  %s7456_s8 = inlined_call_operand.hbm [shape: f32[16,128], index: 8, kind: output, shape index: {}]  }
   0x1   :  { %7560 = sst [smem:[#allocation46_spill]] %s7448_s0 }
   0x2   :  { %7561 = sst [smem:[#allocation47_spill]] %s7451_s3 }
   0x3   :  { %13 = vsyncpa [#allocation5], 0 }
   0x4   :  { %14 = vsyncpa [#allocation3], 0 }
   0x5   :  { %15 = vsyncpa [#allocation8], 0 }
   0x6   :  { %16 = vsyncpa [#allocation11], 0 }
   0x7   :  { %17 = vsyncpa [#allocation4], 0 }
   0x8   :  { %19 = vsyncpa [#allocation4 + $0x1], 0  ;;  %s5103_s27 = smov 0   ;;  %s5105_s28 = smov 0  }
   0x9   :  { %s5107_s29 = smov 0   ;;  %s5109_s30 = smov 0  }
   0xa LB: > { %7562 = sst [smem:[#allocation18_spill]] %s5024_s29  ;;  %s5124_s9 = sadd.s32 4294967295, %s5028_s30   ;;  %s5028_s30 = sphi %s5109_s30, %s7734_s30   ;;  %s5024_s29 = sphi %s5107_s29, %s7736_s29   ;;  %s5020_s28 = sphi %s5105_s28, %s7738_s28   ;;  %s5016_s27 = sphi %s5103_s27, %s7737_s27  }
   0xb   : > { %s4215_s10 = sadd.s32 4294967294, %s5028_s30   ;;  %s5128_s11 = sadd.s32 1, %s5028_s30  }
   0xc   : > { %7563 = sst [smem:[#allocation19_spill]] %s5128_s11  ;;  %s210_s12 = sadd.s32 1, %s5024_s29 }
   0xd   : > { %s207_s13 = ssub.s32 %s5028_s30, %s5128_s11  ;;  %p220_p0 = scmp.ne.s32.totalorder %s5024_s29, %s5020_s28 }
   0xe   : > { %p208_p1 = scmp.eq.s32.totalorder %s207_s13, 0  ;;  %p221_p2 = scmp.eq.s32.totalorder %s5124_s9, 1 }
   0xf   : > { %p226_p3 = scmp.ne.s32.totalorder %s5020_s28, %s5016_s27  ;;  %p227_p4 = scmp.eq.s32.totalorder %s4215_s10, 1 }
  0x10   : > { %s5139_s14 = scalar_select %p208_p1, %s5024_s29, %s210_s12  }
  0x11   : > { %p5141_p5 = por %p221_p2, %p220_p0  ;;  %p5145_p6 = por %p227_p4, %p226_p3 }
  0x12   : > { %7564 = sst [smem:[#allocation20_spill]] %s5139_s14  ;;  %p4216_p7 = scmp.ge.s32.totalorder %s5028_s30, 1 }
  0x13   : > { %s7565_s15 = scalar_select %p5141_p5, 1, 0 }
  0x14   : > { %s7566_s16 = scalar_select %p5145_p6, 1, 0 }
  0x15   : > { %p234_p8 = scmp.lt.s32.totalorder %s5028_s30, 3  ;;  %p7457_p9 = scmp.eq.s32.totalorder %s5124_s9, 0 }
  0x16   : > { %s5030_s18 = smov [#allocation7]   ;;  %s7568_s0 = sld [smem:[#allocation46_spill]] }
  0x17   : > { %p5152_p10 = pnand %p4216_p7, %p234_p8  ;;  %s273_s19 = sshll.u32 %s5030_s18, 4  ;;  %s274_s19 = int_to_ptr.vmem [resolvable:$true] %s273_s19 }
  0x18   : > { %s5031_s24 = smov [#allocation6]   ;;  %s7570_s3 = sld [smem:[#allocation47_spill]] }
  0x19   : > { %s7567_s17 = scalar_select %p5152_p10, 1, 0 }
  0x1a   : > { %p4589_p11 = pneg %p5152_p10  ;;  %s5169_s25 = sshll.u32 %s5031_s24, 4  ;;  %s261_s25 = int_to_ptr.vmem [resolvable:$true] %s5169_s25 }
  0x1c   : > { %s247_s22 = sshll.u32 %s7568_s0, 4  ;;  %p5163_p12 = pnand %p7457_p9, %p4589_p11  ;;  %s5167_s22 = int_to_ptr.vmem [resolvable:$true] %s247_s22 }
  0x1e   : > { %s4823_s12 = scalar_lea.hbm %s7570_s3, 2048  ;;  %p5179_p0 = pneg %p5163_p12 }
  0x1f   : > { %p4824_p13 = scmp.ne.s32.totalorder %s7570_s3, %s4823_s12  ;;  %p4830_p3 = scmp.lt.u32.totalorder %s4823_s12, %s7570_s3 }
  0x21   : > { %p4826_p1 = pnand %p5179_p0, %p4824_p13 }
  0x23   : > { %p4827_p2 = pneg %p4826_p1 }
  0x25   : > { %p4832_p4 = pnand %p4830_p3, %p4827_p2 }
  0x27   : > { %4835 = shalt.err (!%p4832_p4)
}
  0x28   : > { %s4836_s26 = scalar_lea.vmem %s274_s19, 2048  ;;  %p4844_p9 = scmp.lt.s32.totalorder %s274_s19, %s274_s19 }
  0x29   : > { %p4837_p7 = scmp.ne.s32.totalorder %s274_s19, %s4836_s26  ;;  %p4845_p6 = scmp.lt.s32.totalorder %s4836_s26, %s4836_s26 }
  0x2b   : > { %p4839_p8 = pnand %p4837_p7, %p5179_p0  ;;  %p4846_p5 = por %p4845_p6, %p4844_p9 }
  0x2d   : > { %p4840_p11 = pneg %p4839_p8 }
  0x2f   : > { %p4847_p10 = pnand %p4846_p5, %p4840_p11 }
  0x31   : > { %4850 = shalt.err (!%p4847_p10)
}
  0x32   : > { %s7460_s10 = smov 128   ;;  %s7462_s12 = smov 8  }
  0x33   : > { %4598 = dma.hbm_to_vmem [thread:$0]  (!%p5163_p12), %s7570_s3, 2048, %s274_s19, [#allocation8], %s7460_s10, %s7460_s10, %s7462_s12  }
  0x34   : > { %s4851_s21 = scalar_lea.vmem %s5167_s22, 16  ;;  %p4859_p9 = scmp.lt.s32.totalorder %s5167_s22, %s5167_s22 }
  0x35   : > { %p4852_p13 = scmp.ne.s32.totalorder %s5167_s22, %s4851_s21  ;;  %p4860_p10 = scmp.lt.s32.totalorder %s4851_s21, %s4851_s21 }
  0x37   : > { %p4854_p5 = pnand %p4852_p13, %p5179_p0  ;;  %p4861_p1 = por %p4860_p10, %p4859_p9 }
  0x39   : > { %p4855_p6 = pneg %p4854_p5 }
  0x3b   : > { %p4862_p2 = pnand %p4861_p1, %p4855_p6 }
  0x3d   : > { %4865 = shalt.err (!%p4862_p2)
}
  0x3e   : > { %s5034_s24 = smov [#allocation2]   ;;  %s4866_s13 = scalar_lea.hbm %s7450_s2, 2048 }
  0x3f   : > { %4592 = dma.vmem_to_smem (!%p5163_p12), %s5167_s22, 16, %s5034_s24, [#allocation5]  }
  0x40   : > { %p4867_p3 = scmp.ne.s32.totalorder %s7450_s2, %s4866_s13  ;;  %p4873_p8 = scmp.lt.u32.totalorder %s4866_s13, %s7450_s2 }
  0x42   : > { %p4869_p4 = pnand %p4867_p3, %p5179_p0 }
  0x44   : > { %p4870_p7 = pneg %p4869_p4 }
  0x46   : > { %p4875_p11 = pnand %p4873_p8, %p4870_p7 }
  0x48   : > { %4878 = shalt.err (!%p4875_p11)
}
  0x49   : > { %s4879_s0 = scalar_lea.vmem %s261_s25, 2048  ;;  %p4887_p9 = scmp.lt.s32.totalorder %s261_s25, %s261_s25 }
  0x4a   : > { %p4880_p13 = scmp.ne.s32.totalorder %s261_s25, %s4879_s0  ;;  %p4888_p10 = scmp.lt.s32.totalorder %s4879_s0, %s4879_s0 }
  0x4c   : > { %p4882_p5 = pnand %p4880_p13, %p5179_p0  ;;  %p4889_p1 = por %p4888_p10, %p4887_p9 }
  0x4e   : > { %p4883_p6 = pneg %p4882_p5 }
  0x50   : > { %p4890_p2 = pnand %p4889_p1, %p4883_p6 }
  0x52   : > { %4893 = shalt.err (!%p4890_p2)
}
  0x53   : > { %s7572_s22 = smov 8   ;;  %s7573_s10 = smov 128  }
  0x54   : > { %4595 = dma.hbm_to_vmem [thread:$0]  (!%p5163_p12), %s7450_s2, 2048, %s261_s25, [#allocation3], %s7573_s10, %s7573_s10, %s7572_s22  }
  0x55   : > { %s5035_s19 = smov [#allocation9]   ;;  %s5036_s13 = smov [#allocation10]  }
  0x56   : > { %s286_s26 = sshll.u32 %s5035_s19, 4  ;;  %s299_s18 = sshll.u32 %s5036_s13, 4  ;;  %s287_s26 = int_to_ptr.vmem [resolvable:$true] %s286_s26  ;;  %s300_s18 = int_to_ptr.vmem [resolvable:$true] %s299_s18 }
  0x57   : > { %s4894_s3 = scalar_lea.hbm %s7452_s4, 2048 }
  0x58   : > { %p4895_p3 = scmp.ne.s32.totalorder %s7452_s4, %s4894_s3  ;;  %p4901_p8 = scmp.lt.u32.totalorder %s4894_s3, %s7452_s4 }
  0x5a   : > { %p4897_p4 = pnand %p4895_p3, %p5179_p0 }
  0x5c   : > { %p4898_p7 = pneg %p4897_p4 }
  0x5e   : > { %p4903_p11 = pnand %p4901_p8, %p4898_p7 }
  0x60   : > { %4906 = shalt.err (!%p4903_p11)
}
  0x61   : > { %s4907_s25 = scalar_lea.vmem %s287_s26, 2048  ;;  %p4915_p9 = scmp.lt.s32.totalorder %s287_s26, %s287_s26 }
  0x62   : > { %p4908_p13 = scmp.ne.s32.totalorder %s287_s26, %s4907_s25  ;;  %p4916_p10 = scmp.lt.s32.totalorder %s4907_s25, %s4907_s25 }
  0x64   : > { %p4910_p5 = pnand %p4908_p13, %p5179_p0  ;;  %p4917_p1 = por %p4916_p10, %p4915_p9 }
  0x66   : > { %p4911_p6 = pneg %p4910_p5 }
  0x68   : > { %p4918_p2 = pnand %p4917_p1, %p4911_p6 }
  0x6a   : > { %4921 = shalt.err (!%p4918_p2)
}
  0x6b   : > { %4601 = dma.hbm_to_vmem [thread:$0]  (!%p5163_p12), %s7452_s4, 2048, %s287_s26, [#allocation8], %s7573_s10, %s7573_s10, %s7572_s22  }
  0x6c   : > { %s4922_s24 = scalar_lea.hbm %s7453_s5, 2048 }
  0x6d   : > { %p4923_p3 = scmp.ne.s32.totalorder %s7453_s5, %s4922_s24  ;;  %p4929_p8 = scmp.lt.u32.totalorder %s4922_s24, %s7453_s5 }
  0x6f   : > { %p4925_p4 = pnand %p4923_p3, %p5179_p0 }
  0x71   : > { %p4926_p7 = pneg %p4925_p4 }
  0x73   : > { %p4931_p11 = pnand %p4929_p8, %p4926_p7 }
  0x75   : > { %4934 = shalt.err (!%p4931_p11)
}
  0x76   : > { %s4935_s12 = scalar_lea.vmem %s300_s18, 2048  ;;  %p4943_p9 = scmp.lt.s32.totalorder %s300_s18, %s300_s18 }
  0x77   : > { %p4936_p13 = scmp.ne.s32.totalorder %s300_s18, %s4935_s12  ;;  %p4944_p10 = scmp.lt.s32.totalorder %s4935_s12, %s4935_s12 }
  0x79   : > { %p4938_p5 = pnand %p4936_p13, %p5179_p0  ;;  %p4945_p1 = por %p4944_p10, %p4943_p9 }
  0x7b   : > { %p4939_p6 = pneg %p4938_p5 }
  0x7d   : > { %p4946_p2 = pnand %p4945_p1, %p4939_p6 }
  0x7f   : > { %4949 = shalt.err (!%p4946_p2)
}
  0x80   : > { %4604 = dma.hbm_to_vmem [thread:$0]  (!%p5163_p12), %s7453_s5, 2048, %s300_s18, [#allocation11], %s7573_s10, %s7573_s10, %s7572_s22  }
  0x81   : > { %p7574_p3 = scmp.ne.s32.totalorder %s7567_s17, 0 }
  0x83   : > { %335 = sbr.rel (%p7574_p3) target bundleno = 2168 (0x878), region = 52 }
  0x8a   : > { %p7575_p0 = scmp.eq.s32.totalorder %s5124_s9, 0 }
  0x8c   : > { %4995 = dma.done.wait (%p7575_p0), [#allocation5], 16   ;;  %p7576_p4 = pmov %p7575_p0 }
  0x8d   : > { %p7577_p7 = pmov %p7575_p0 }
  0x8e   : > { %4997 = vsyncadd (%p7576_p4), [#allocation5], 4294967280 }
  0x8f   : > { %4999 = dma.done.wait (%p7577_p7), [#allocation3], 2048   ;;  %p7578_p8 = pmov %p7575_p0 }
  0x90   : > { %p7579_p11 = pmov %p7575_p0 }
  0x91   : > { %5001 = vsyncadd (%p7578_p8), [#allocation3], 4294965248 }
  0x92   : > { %5003 = dma.done.wait (%p7579_p11), [#allocation8], 4096   ;;  %p7580_p12 = pmov %p7575_p0 }
  0x93   : > { %p7581_p13 = pmov %p7575_p0 }
  0x94   : > { %5005 = vsyncadd (%p7580_p12), [#allocation8], 4294963200 }
  0x95   : > { %5007 = dma.done.wait (%p7581_p13), [#allocation11], 2048   ;;  %p7582_p5 = pmov %p7575_p0 }
  0x97   : > { %5009 = vsyncadd (%p7582_p5), [#allocation11], 4294965248 }
  0x98   : > { %357 = sfence }
  0x99   : > { %v5292_v0 = vld [vmem:[%s7449_s1] sm:$0xff]  ;;  %v5037_v1 = vmov 1   ;;  %v7467_v2 = vmov 0   ;;  %v5300_v3 = vld [vmem:[%s7449_s1 + $0x8] sm:$0xff]  ;;  %v5039_v4 = vmov 2   ;;  %v5040_v5 = vmov 3  }
  0x9a   : > { %7583 = vst [vmem:[#allocation21_spill] sm:$0xff] %v5292_v0  ;;  %4680 = vset.pattern.permute.xlu1 %v5037_v1  ;;  %4679 = vset.pattern.permute.xlu0 %v7467_v2  ;;  %7584 = vst [vmem:[#allocation22_spill] sm:$0xff] %v5300_v3  ;;  %s4230_s10 = sshll.u32 %s5124_s9, 3  ;;  %v5041_v6 = vmov 4   ;;  %v643_v7 = vlaneseq  ;;  %s6120_s14 = sld [smem:[#allocation2]] }
  0x9b   : > { %1097 = vperm.xlu1 %4680, %v5292_v0   ;;  %904 = vperm.xlu0 %4679, %v5292_v0   ;;  %p394_p6 = scmp.lt.s32.totalorder %s4230_s10, 15  ;;  %s6126_s24 = sld [smem:[#allocation2 + $0x1]] }
  0x9c   : > { %v5312_v8 = vshrl.u32 %v643_v7, 7  ;;  %s5049_s23 = smov 16   ;;  %s5050_s20 = smov 32  }
  0x9d   : > { %s7740_s10 = smov (!%p394_p6, %s4230_s10), 15  ;;  %s5052_s22 = smov 48  }
  0x9e   : > { %s4273_s18 = sshll.u32 %s7740_s10, 3  ;;  %7585 = vst [vmem:[#allocation23_spill] sm:$0xff] %v5312_v8  ;;  %v5320_v9 = vsub.s32 0, %v5312_v8  ;;  %v5323_v10 = vsub.s32 4, %v5312_v8  ;;  %v5329_v12 = vsub.s32 1, %v5312_v8  ;;  %v5332_v13 = vsub.s32 5, %v5312_v8 }
  0x9f   : > { %1101 = vperm.xlu1 %4680, %v5300_v3   ;;  %909 = vperm.xlu0 %4679, %v5300_v3   ;;  %s5317_s11 = scalar_lea.vmem %s7454_s6, %s4273_s18  ;;  %v5335_v14 = vsub.s32 2, %v5312_v8  ;;  %v5338_v15 = vsub.s32 6, %v5312_v8  ;;  %s4274_s12 = sshll.u32 %s7740_s10, 4 }
  0xa0   : > { %7586 = vst [vmem:[#allocation24_spill] sm:$0xff] %v5320_v9  ;;  %7587 = vst [vmem:[#allocation25_spill] sm:$0xff] %v5323_v10  ;;  %v5326_v11 = vld [vmem:[%s5317_s11] sm:$0x77]  ;;  %v5341_v16 = vld [vmem:[%s5317_s11 + $0x8] sm:$0x77]  ;;  %s7274_s17 = scalar_lea.vmem %s7455_s7, %s4274_s12 }
  0xa1   : > { %7588 = vst [vmem:[#allocation26_spill] sm:$0xff] %v5326_v11  ;;  %7589 = vst [vmem:[#allocation27_spill] sm:$0xff] %v5329_v12  ;;  %v923_v17 = vrot.slane %v5326_v11, %v5320_v9  ;;  %v927_v18 = vrot.slane %v5326_v11, %v5323_v10  ;;  %v1107_v19 = vrot.slane %v5326_v11, %v5329_v12  ;;  %v5370_v29 = vld [vmem:[%s5317_s11 + $0x10] sm:$0x77]  ;;  %v5395_v38 = vld [vmem:[%s5317_s11 + $0x18] sm:$0x77] }
  0xa2   : > { %7590 = vst [vmem:[#allocation28_spill] sm:$0xff] %v5332_v13  ;;  %7591 = vst [vmem:[#allocation29_spill] sm:$0xff] %v5335_v14  ;;  %v1111_v20 = vrot.slane %v5326_v11, %v5332_v13  ;;  %v1323_v21 = vrot.slane %v5326_v11, %v5335_v14  ;;  %v1327_v22 = vrot.slane %v5326_v11, %v5338_v15  ;;  %v5408_v43 = vld [vmem:[%s5317_s11 + $0x20] sm:$0x77]  ;;  %v5459_v1 = vld [vmem:[%s5317_s11 + $0x28] sm:$0x77] }
  0xa3   : > { %4682 = vset.pattern.permute.xlu1 %v5039_v4  ;;  %4681 = vset.pattern.permute.xlu0 %v5039_v4  ;;  %7592 = vst [vmem:[#allocation30_spill] sm:$0xff] %v5338_v15  ;;  %7593 = vst [vmem:[#allocation31_spill] sm:$0xff] %v5341_v16  ;;  %v931_v23 = vrot.slane %v5341_v16, %v5320_v9  ;;  %v935_v24 = vrot.slane %v5341_v16, %v5323_v10  ;;  %s5053_s10 = smov 64   ;;  %s5054_s18 = smov 80  }
  0xa4   : > { %1317 = vperm.xlu1 %4682, %v5300_v3   ;;  %1313 = vperm.xlu0 %4681, %v5292_v0   ;;  %v1115_v25 = vrot.slane %v5341_v16, %v5329_v12  ;;  %v1119_v26 = vrot.slane %v5341_v16, %v5332_v13  ;;  %v5364_v27 = vrot.slane %v923_v17, %v5320_v9  ;;  %s5055_s29 = smov 96   ;;  %s5056_s3 = smov 112  }
  0xa5   : > { %v5367_v28 = vrot.slane %v927_v18, %v5320_v9  ;;  %7594 = vst [vmem:[#allocation32_spill] sm:$0xff] %v5370_v29  ;;  %v5373_v30 = vrot.slane %v1107_v19, %v5329_v12  ;;  %v5376_v31 = vrot.slane %v1111_v20, %v5329_v12  ;;  %v5379_v32 = vrot.slane %v1323_v21, %v5335_v14  ;;  %v5485_v21 = vld [vmem:[%s5317_s11 + $0x30] sm:$0x77]  ;;  %s4270_s13 = sshll.u32 %s5124_s9, 7  ;;  %p7732_p10 = scmp.ne.s32.totalorder %s7565_s15, 0 }
  0xa6   : > { %v5382_v33 = vrot.slane %v1327_v22, %v5335_v14  ;;  %v5385_v34 = vrot.slane %v931_v23, %v5320_v9  ;;  %v5388_v35 = vrot.slane %v935_v24, %v5320_v9  ;;  %v1331_v36 = vrot.slane %v5341_v16, %v5335_v14  ;;  %7595 = vst [vmem:[#allocation33_spill] sm:$0xff] %v5395_v38  ;;  %s7408_s12 = scalar_lea.hbm %s7456_s8, %s4270_s13  ;;  %s5057_s9 = smov [#allocation12]  }
  0xa7   : > { %v1335_v37 = vrot.slane %v5341_v16, %v5338_v15  ;;  %v5398_v39 = vrot.slane %v1115_v25, %v5329_v12  ;;  %v5401_v40 = vrot.slane %v1119_v26, %v5329_v12  ;;  %v939_v41 = vrot.slane %v5370_v29, %v5320_v9  ;;  %7596 = vst [vmem:[#allocation34_spill] sm:$0xff] %v5408_v43 }
  0xa8   : > { %4684 = vset.pattern.permute.xlu1 %v5040_v5  ;;  %4683 = vset.pattern.permute.xlu0 %v5040_v5  ;;  %v943_v42 = vrot.slane %v5370_v29, %v5323_v10  ;;  %v1123_v44 = vrot.slane %v5370_v29, %v5329_v12  ;;  %v1127_v45 = vrot.slane %v5370_v29, %v5332_v13 }
  0xa9   : > { %1774 = vperm.xlu1 %4684, %v5300_v3   ;;  %1770 = vperm.xlu0 %4683, %v5292_v0   ;;  %v1339_v46 = vrot.slane %v5370_v29, %v5335_v14  ;;  %v1343_v47 = vrot.slane %v5370_v29, %v5338_v15  ;;  %v947_v48 = vrot.slane %v5395_v38, %v5320_v9 }
  0xaa   : > { %v951_v49 = vrot.slane %v5395_v38, %v5323_v10  ;;  %v1131_v50 = vrot.slane %v5395_v38, %v5329_v12  ;;  %v1135_v51 = vrot.slane %v5395_v38, %v5332_v13  ;;  %v5427_v52 = vrot.slane %v1331_v36, %v5335_v14  ;;  %7597 = vst [vmem:[#allocation35_spill] sm:$0xff] %v5459_v1 }
  0xab   : > { %v1347_v53 = vrot.slane %v5395_v38, %v5335_v14  ;;  %v1351_v54 = vrot.slane %v5395_v38, %v5338_v15  ;;  %v955_v55 = vrot.slane %v5408_v43, %v5320_v9  ;;  %v5436_v56 = vrot.slane %v1335_v37, %v5335_v14  ;;  %7598 = vst [vmem:[#allocation36_spill] sm:$0xff] %v5485_v21 }
  0xac   : > { %v5439_v57 = vrot.slane %v939_v41, %v5320_v9  ;;  %v5442_v58 = vrot.slane %v943_v42, %v5320_v9  ;;  %v959_v59 = vrot.slane %v5408_v43, %v5323_v10  ;;  %v5447_v60 = vrot.slane %v1123_v44, %v5329_v12 }
  0xad   : > { %4686 = vset.pattern.permute.xlu0 %v5041_v6  ;;  %4685 = vset.pattern.permute.xlu1 %v5041_v6  ;;  %v5450_v61 = vrot.slane %v1127_v45, %v5329_v12  ;;  %v5453_v62 = vrot.slane %v1339_v46, %v5335_v14  ;;  %v5456_v63 = vrot.slane %v1343_v47, %v5335_v14 }
  0xae   : > { %v5462_v4 = vrot.slane %v947_v48, %v5320_v9  ;;  %v5465_v5 = vrot.slane %v951_v49, %v5320_v9  ;;  %v5468_v6 = vrot.slane %v1131_v50, %v5329_v12  ;;  %v5471_v7 = vrot.slane %v1135_v51, %v5329_v12 }
  0xaf   : > { %v5474_v17 = vrot.slane %v1347_v53, %v5335_v14  ;;  %v5477_v18 = vrot.slane %v1351_v54, %v5335_v14  ;;  %v5480_v19 = vrot.slane %v955_v55, %v5320_v9  ;;  %v1139_v20 = vrot.slane %v5408_v43, %v5329_v12 }
  0xb0   : > { %v5488_v22 = vrot.slane %v959_v59, %v5320_v9  ;;  %v1143_v23 = vrot.slane %v5408_v43, %v5332_v13  ;;  %v963_v24 = vrot.slane %v5459_v1, %v5320_v9  ;;  %v967_v25 = vrot.slane %v5459_v1, %v5323_v10 }
  0xb1   : > { %v1355_v26 = vrot.slane %v5408_v43, %v5335_v14  ;;  %v1359_v36 = vrot.slane %v5408_v43, %v5338_v15  ;;  %v1147_v37 = vrot.slane %v5459_v1, %v5329_v12  ;;  %v1151_v41 = vrot.slane %v5459_v1, %v5332_v13 }
  0xb2   : > { %v971_v42 = vrot.slane %v5485_v21, %v5320_v9  ;;  %v975_v44 = vrot.slane %v5485_v21, %v5323_v10  ;;  %v1155_v45 = vrot.slane %v5485_v21, %v5329_v12  ;;  %v1159_v46 = vrot.slane %v5485_v21, %v5332_v13 }
  0xb3   : > { %v1363_v47 = vrot.slane %v5459_v1, %v5335_v14  ;;  %v1367_v48 = vrot.slane %v5459_v1, %v5338_v15  ;;  %v1371_v49 = vrot.slane %v5485_v21, %v5335_v14  ;;  %v1375_v50 = vrot.slane %v5485_v21, %v5338_v15 }
  0xb4   : > { %v5521_v51 = vrot.slane %v1139_v20, %v5329_v12  ;;  %v5524_v53 = vrot.slane %v1143_v23, %v5329_v12  ;;  %v5527_v54 = vrot.slane %v963_v24, %v5320_v9  ;;  %v5530_v55 = vrot.slane %v967_v25, %v5320_v9 }
  0xb5   : > { %v5533_v59 = vrot.slane %v1355_v26, %v5335_v14  ;;  %v5536_v2 = vrot.slane %v1359_v36, %v5335_v14  ;;  %v5539_v8 = vrot.slane %v1147_v37, %v5329_v12  ;;  %v5542_v20 = vrot.slane %v1151_v41, %v5329_v12 }
  0xb6   : > { %v5545_v23 = vrot.slane %v971_v42, %v5320_v9  ;;  %v5548_v24 = vrot.slane %v975_v44, %v5320_v9  ;;  %v5551_v25 = vrot.slane %v1155_v45, %v5329_v12  ;;  %v5554_v26 = vrot.slane %v1159_v46, %v5329_v12 }
  0xb7   : > { %v5561_v37 = vrot.slane %v1363_v47, %v5335_v14  ;;  %v5564_v41 = vrot.slane %v1367_v48, %v5335_v14  ;;  %v5567_v42 = vrot.slane %v1371_v49, %v5335_v14  ;;  %v5570_v44 = vrot.slane %v1375_v50, %v5335_v14 }
  0xb9   : > { %7599 = vst [vmem:[#allocation37_spill] sm:$0xff] %v5567_v42  ;;  %7600 = vst [vmem:[#allocation38_spill] sm:$0xff] %v5570_v44 }
 0x11a   : > { %v5556_v36 = vpop.permute.xlu1 %1097  ;;  %v5558_v21 = vpop.permute.xlu0 %904 }
 0x11b   : > { %v1064_v45 = vmul.f32 %v5364_v27, %v5558_v21  ;;  %v1065_v46 = vmul.f32 %v5367_v28, %v5558_v21  ;;  %v1248_v1 = vmul.f32 %v5373_v30, %v5556_v36  ;;  %v1249_v47 = vmul.f32 %v5376_v31, %v5556_v36 }
 0x11c   : > { %v1068_v48 = vmul.f32 %v5385_v34, %v5558_v21  ;;  %v1069_v49 = vmul.f32 %v5388_v35, %v5558_v21  ;;  %v1252_v50 = vmul.f32 %v5398_v39, %v5556_v36  ;;  %v1253_v43 = vmul.f32 %v5401_v40, %v5556_v36 }
 0x11d   : > { %v1280_v38 = vadd.f32 %v1248_v1, %v1064_v45  ;;  %v1281_v29 = vadd.f32 %v1249_v47, %v1065_v46  ;;  %v1072_v16 = vmul.f32 %v5439_v57, %v5558_v21  ;;  %v1073_v11 = vmul.f32 %v5442_v58, %v5558_v21 }
 0x11e   : > { %v5592_v0 = vpop.permute.xlu1 %1101  ;;  %v5594_v3 = vpop.permute.xlu0 %909  ;;  %v1284_v15 = vadd.f32 %v1252_v50, %v1068_v48  ;;  %v1285_v14 = vadd.f32 %v1253_v43, %v1069_v49  ;;  %v1256_v13 = vmul.f32 %v5447_v60, %v5556_v36  ;;  %v1257_v12 = vmul.f32 %v5450_v61, %v5556_v36 }
 0x11f   : > { %v1066_v1 = vmul.f32 %v5364_v27, %v5594_v3  ;;  %v1067_v45 = vmul.f32 %v5367_v28, %v5594_v3  ;;  %v1250_v46 = vmul.f32 %v5373_v30, %v5592_v0  ;;  %v1251_v47 = vmul.f32 %v5376_v31, %v5592_v0 }
 0x120   : > { %v1070_v43 = vmul.f32 %v5385_v34, %v5594_v3  ;;  %v1071_v48 = vmul.f32 %v5388_v35, %v5594_v3  ;;  %v1254_v49 = vmul.f32 %v5398_v39, %v5592_v0  ;;  %v1255_v27 = vmul.f32 %v5401_v40, %v5592_v0 }
 0x121   : > { %v1282_v50 = vadd.f32 %v1250_v46, %v1066_v1  ;;  %v1283_v28 = vadd.f32 %v1251_v47, %v1067_v45  ;;  %v1288_v10 = vadd.f32 %v1256_v13, %v1072_v16  ;;  %v1289_v9 = vadd.f32 %v1257_v12, %v1073_v11 }
 0x122   : > { %v1286_v30 = vadd.f32 %v1254_v49, %v1070_v43  ;;  %v1287_v44 = vadd.f32 %v1255_v27, %v1071_v48  ;;  %v1074_v31 = vmul.f32 %v5439_v57, %v5594_v3  ;;  %v1075_v34 = vmul.f32 %v5442_v58, %v5594_v3 }
 0x123   : > { %v5620_v42 = vpop.permute.xlu1 %1317  ;;  %v5622_v35 = vpop.permute.xlu0 %1313  ;;  %v1258_v39 = vmul.f32 %v5447_v60, %v5592_v0  ;;  %v1259_v40 = vmul.f32 %v5450_v61, %v5592_v0  ;;  %v1076_v11 = vmul.f32 %v5462_v4, %v5558_v21  ;;  %v1077_v12 = vmul.f32 %v5465_v5, %v5558_v21 }
 0x124   : > { %v1466_v13 = vmul.f32 %v5379_v32, %v5620_v42  ;;  %v1467_v16 = vmul.f32 %v5382_v33, %v5620_v42  ;;  %v1464_v57 = vmul.f32 %v5379_v32, %v5622_v35  ;;  %v1465_v58 = vmul.f32 %v5382_v33, %v5622_v35 }
 0x125   : > { %v1468_v60 = vmul.f32 %v5427_v52, %v5622_v35  ;;  %v1469_v61 = vmul.f32 %v5436_v56, %v5622_v35  ;;  %v1470_v1 = vmul.f32 %v5427_v52, %v5620_v42  ;;  %v1471_v45 = vmul.f32 %v5436_v56, %v5620_v42 }
 0x126   : > { %v5648_v46 = vadd.f32 %v1466_v13, %v1282_v50  ;;  %v5650_v47 = vadd.f32 %v1467_v16, %v1283_v28  ;;  %v5652_v32 = vadd.f32 %v1464_v57, %v1280_v38  ;;  %v5654_v43 = vadd.f32 %v1465_v58, %v1281_v29 }
 0x127   : > { %v5656_v33 = vadd.f32 %v1468_v60, %v1284_v15  ;;  %v5658_v48 = vadd.f32 %v1469_v61, %v1285_v14  ;;  %v5660_v49 = vadd.f32 %v1470_v1, %v1286_v30  ;;  %v5662_v27 = vadd.f32 %v1471_v45, %v1287_v44 }
 0x128   : > { %v1531_v52 = vadd.f32 %v5650_v47, %v5648_v46  ;;  %v1528_v56 = vadd.f32 %v5654_v43, %v5652_v32  ;;  %v1472_v38 = vmul.f32 %v5453_v62, %v5622_v35  ;;  %v1473_v29 = vmul.f32 %v5456_v63, %v5622_v35 }
 0x129   : > { %v1534_v14 = vadd.f32 %v5658_v48, %v5656_v33  ;;  %v1537_v15 = vadd.f32 %v5662_v27, %v5660_v49  ;;  %v1290_v44 = vadd.f32 %v1258_v39, %v1074_v31  ;;  %v1291_v50 = vadd.f32 %v1259_v40, %v1075_v34 }
 0x12a   : > { %1532 = vadd.xlane.f32.xlu0 %v1531_v52  ;;  %1529 = vadd.xlane.f32.xlu1 %v1528_v56  ;;  %v5676_v28 = vadd.f32 %v1472_v38, %v1288_v10  ;;  %v5678_v30 = vadd.f32 %v1473_v29, %v1289_v9  ;;  %v1474_v13 = vmul.f32 %v5453_v62, %v5620_v42 }
 0x12b   : > { %v1475_v16 = vmul.f32 %v5456_v63, %v5620_v42  ;;  %v1260_v57 = vmul.f32 %v5468_v6, %v5556_v36  ;;  %v1261_v58 = vmul.f32 %v5471_v7, %v5556_v36  ;;  %v1476_v31 = vmul.f32 %v5474_v17, %v5622_v35 }
 0x12c   : > { %v1540_v10 = vadd.f32 %v5678_v30, %v5676_v28  ;;  %v5692_v9 = vadd.f32 %v1474_v13, %v1290_v44  ;;  %v1477_v62 = vmul.f32 %v5477_v18, %v5622_v35  ;;  %v1078_v63 = vmul.f32 %v5462_v4, %v5594_v3 }
 0x12d   : > { %v5698_v34 = vadd.f32 %v1475_v16, %v1291_v50  ;;  %v1292_v39 = vadd.f32 %v1260_v57, %v1076_v11  ;;  %v1293_v40 = vadd.f32 %v1261_v58, %v1077_v12  ;;  %v1079_v60 = vmul.f32 %v5465_v5, %v5594_v3 }
 0x12e   : > { %1535 = vadd.xlane.f32.xlu0 %v1534_v14  ;;  %1538 = vadd.xlane.f32.xlu1 %v1537_v15  ;;  %v1262_v61 = vmul.f32 %v5468_v6, %v5592_v0  ;;  %v1263_v1 = vmul.f32 %v5471_v7, %v5592_v0  ;;  %v1478_v45 = vmul.f32 %v5474_v17, %v5620_v42 }
 0x12f   : > { %v1543_v4 = vadd.f32 %v5698_v34, %v5692_v9  ;;  %v5710_v52 = vadd.f32 %v1476_v31, %v1292_v39  ;;  %v5712_v11 = vadd.f32 %v1477_v62, %v1293_v40  ;;  %v1479_v5 = vmul.f32 %v5477_v18, %v5620_v42 }
 0x130   : > { %v1294_v12 = vadd.f32 %v1262_v61, %v1078_v63  ;;  %v1295_v56 = vadd.f32 %v1263_v1, %v1079_v60  ;;  %v1080_v6 = vmul.f32 %v5480_v19, %v5558_v21  ;;  %v1081_v7 = vmul.f32 %v5488_v22, %v5558_v21 }
 0x131   : > { %v1546_v17 = vadd.f32 %v5712_v11, %v5710_v52  ;;  %v1264_v38 = vmul.f32 %v5521_v51, %v5556_v36  ;;  %v1265_v29 = vmul.f32 %v5524_v53, %v5556_v36  ;;  %v1480_v18 = vmul.f32 %v5533_v59, %v5622_v35 }
 0x132   : > { %1541 = vadd.xlane.f32.xlu0 %v1540_v10  ;;  %1544 = vadd.xlane.f32.xlu1 %v1543_v4  ;;  %v5728_v14 = vadd.f32 %v1478_v45, %v1294_v12  ;;  %v5730_v15 = vadd.f32 %v1479_v5, %v1295_v56  ;;  %v1481_v44 = vmul.f32 %v5536_v2, %v5622_v35 }
 0x133   : > { %v1296_v50 = vadd.f32 %v1264_v38, %v1080_v6  ;;  %v1297_v13 = vadd.f32 %v1265_v29, %v1081_v7  ;;  %v1082_v16 = vmul.f32 %v5480_v19, %v5594_v3  ;;  %v1083_v57 = vmul.f32 %v5488_v22, %v5594_v3 }
 0x134   : > { %v1549_v58 = vadd.f32 %v5730_v15, %v5728_v14  ;;  %v1266_v31 = vmul.f32 %v5521_v51, %v5592_v0  ;;  %v1267_v10 = vmul.f32 %v5524_v53, %v5592_v0  ;;  %v1482_v62 = vmul.f32 %v5533_v59, %v5620_v42 }
 0x135   : > { %v5746_v63 = vadd.f32 %v1480_v18, %v1296_v50  ;;  %v5748_v39 = vadd.f32 %v1481_v44, %v1297_v13  ;;  %v1483_v19 = vmul.f32 %v5536_v2, %v5620_v42  ;;  %v1084_v22 = vmul.f32 %v5527_v54, %v5558_v21 }
 0x136   : > { %1547 = vadd.xlane.f32.xlu0 %v1546_v17  ;;  %1550 = vadd.xlane.f32.xlu1 %v1549_v58  ;;  %v1298_v40 = vadd.f32 %v1266_v31, %v1082_v16  ;;  %v1299_v51 = vadd.f32 %v1267_v10, %v1083_v57  ;;  %v1085_v53 = vmul.f32 %v5530_v55, %v5558_v21  ;;  %v7605_v57 = vld [vmem:[#allocation37_spill] sm:$0xff]  ;;  %v7606_v31 = vld [vmem:[#allocation38_spill] sm:$0xff] }
 0x137   : > { %v1552_v59 = vadd.f32 %v5748_v39, %v5746_v63  ;;  %v1268_v60 = vmul.f32 %v5539_v8, %v5556_v36  ;;  %v1269_v61 = vmul.f32 %v5542_v20, %v5556_v36  ;;  %v1484_v2 = vmul.f32 %v5561_v37, %v5622_v35 }
 0x138   : > { %v5764_v1 = vadd.f32 %v1482_v62, %v1298_v40  ;;  %v5766_v45 = vadd.f32 %v1483_v19, %v1299_v51  ;;  %v1485_v4 = vmul.f32 %v5564_v41, %v5622_v35  ;;  %v1086_v5 = vmul.f32 %v5527_v54, %v5594_v3 }
 0x139   : > { %v1300_v12 = vadd.f32 %v1268_v60, %v1084_v22  ;;  %v1301_v56 = vadd.f32 %v1269_v61, %v1085_v53  ;;  %v1087_v6 = vmul.f32 %v5530_v55, %v5594_v3  ;;  %v1270_v7 = vmul.f32 %v5539_v8, %v5592_v0 }
 0x13a   : > { %7601 = vst [vmem:[#allocation39_spill] sm:$0xff] %v5766_v45  ;;  %1553 = vadd.xlane.f32.xlu0 %v1552_v59  ;;  %v1555_v17 = vadd.f32 %v5766_v45, %v5764_v1  ;;  %v1271_v38 = vmul.f32 %v5542_v20, %v5592_v0  ;;  %v1486_v29 = vmul.f32 %v5561_v37, %v5620_v42 }
 0x13b   : > { %v1487_v54 = vmul.f32 %v5564_v41, %v5620_v42  ;;  %v5784_v18 = vadd.f32 %v1484_v2, %v1300_v12  ;;  %v5786_v44 = vadd.f32 %v1485_v4, %v1301_v56  ;;  %v1302_v55 = vadd.f32 %v1270_v7, %v1086_v5 }
 0x13c   : > { %v1088_v8 = vmul.f32 %v5545_v23, %v5558_v21  ;;  %1556 = vadd.xlane.f32.xlu1 %v1555_v17  ;;  %v1303_v50 = vadd.f32 %v1271_v38, %v1087_v6  ;;  %v1089_v13 = vmul.f32 %v5548_v24, %v5558_v21  ;;  %v1272_v20 = vmul.f32 %v5551_v25, %v5556_v36 }
 0x13d   : > { %7602 = vst [vmem:[#allocation40_spill] sm:$0xff] %v5784_v18  ;;  %7603 = vst [vmem:[#allocation41_spill] sm:$0xff] %v5786_v44  ;;  %v1273_v37 = vmul.f32 %v5554_v26, %v5556_v36  ;;  %v1558_v41 = vadd.f32 %v5786_v44, %v5784_v18  ;;  %v5798_v16 = vadd.f32 %v1486_v29, %v1302_v55 }
 0x13e   : > { %v1488_v58 = vmul.f32 %v7605_v57, %v5622_v35  ;;  %v1489_v10 = vmul.f32 %v7606_v31, %v5622_v35  ;;  %v5804_v62 = vadd.f32 %v1487_v54, %v1303_v50  ;;  %v1304_v19 = vadd.f32 %v1272_v20, %v1088_v8 }
 0x13f   : > { %7604 = vst [vmem:[#allocation42_spill] sm:$0xff] %v5798_v16  ;;  %v1305_v22 = vadd.f32 %v1273_v37, %v1089_v13  ;;  %v1090_v40 = vmul.f32 %v5545_v23, %v5594_v3  ;;  %1559 = vadd.xlane.f32.xlu0 %v1558_v41  ;;  %v1091_v51 = vmul.f32 %v5548_v24, %v5594_v3 }
 0x140   : > { %7607 = vst [vmem:[#allocation37_spill] sm:$0xff] %v5804_v62  ;;  %v1274_v53 = vmul.f32 %v5551_v25, %v5592_v0  ;;  %v1275_v59 = vmul.f32 %v5554_v26, %v5592_v0  ;;  %v1490_v60 = vmul.f32 %v7605_v57, %v5620_v42  ;;  %v1561_v61 = vadd.f32 %v5804_v62, %v5798_v16 }
 0x141   : > { %v5818_v2 = vadd.f32 %v1488_v58, %v1304_v19  ;;  %v5820_v4 = vadd.f32 %v1489_v10, %v1305_v22  ;;  %v1491_v23 = vmul.f32 %v7606_v31, %v5620_v42  ;;  %v1593_v26 = vmul.f32 %v5652_v32, %v5652_v32  ;;  %v5857_v10 = vld [vmem:[%s5317_s11 + $0x38] sm:$0x77]  ;;  %s390_s11 = sand.u32 1, %s5020_s28  }
 0x142   : > { %v1306_v24 = vadd.f32 %v1274_v53, %v1090_v40  ;;  %v1307_v5 = vadd.f32 %v1275_v59, %v1091_v51  ;;  %1562 = vadd.xlane.f32.xlu1 %v1561_v61  ;;  %v1594_v12 = vmul.f32 %v5654_v43, %v5654_v43  ;;  %v1595_v17 = vmul.f32 %v5648_v46, %v5648_v46  ;;  %v7612_v51 = vld [vmem:[#allocation24_spill] sm:$0xff]  ;;  %v7613_v59 = vld [vmem:[#allocation25_spill] sm:$0xff]  ;;  %v7614_v61 = vld [vmem:[#allocation27_spill] sm:$0xff]  ;;  %s4078_s26 = scalar_lea.sflag [#allocation4], %s390_s11 }
 0x143   : > { %7608 = vst [vmem:[#allocation38_spill] sm:$0xff] %v5818_v2  ;;  %7609 = vst [vmem:[#allocation43_spill] sm:$0xff] %v5820_v4  ;;  %v1564_v25 = vadd.f32 %v5820_v4, %v5818_v2  ;;  %v1596_v38 = vmul.f32 %v5650_v47, %v5650_v47  ;;  %v1597_v54 = vmul.f32 %v5656_v33, %v5656_v33 }
 0x144   : > { %v5830_v56 = vadd.f32 %v1490_v60, %v1306_v24  ;;  %v5832_v6 = vadd.f32 %v1491_v23, %v1307_v5  ;;  %v1625_v29 = vadd.f32 %v1594_v12, %v1593_v26  ;;  %v1598_v55 = vmul.f32 %v5658_v48, %v5658_v48  ;;  %v7615_v24 = vld [vmem:[#allocation28_spill] sm:$0xff] }
 0x145   : > { %1565 = vadd.xlane.f32.xlu0 %v1564_v25  ;;  %v1628_v8 = vadd.f32 %v1596_v38, %v1595_v17  ;;  %v1599_v50 = vmul.f32 %v5660_v49, %v5660_v49  ;;  %v1600_v13 = vmul.f32 %v5662_v27, %v5662_v27  ;;  %v1601_v37 = vmul.f32 %v5676_v28, %v5676_v28 }
 0x146   : > { %7610 = vst [vmem:[#allocation44_spill] sm:$0xff] %v5830_v56  ;;  %7611 = vst [vmem:[#allocation45_spill] sm:$0xff] %v5832_v6  ;;  %v1567_v7 = vadd.f32 %v5832_v6, %v5830_v56  ;;  %v1631_v20 = vadd.f32 %v1598_v55, %v1597_v54  ;;  %v1602_v41 = vmul.f32 %v5678_v30, %v5678_v30  ;;  %v7617_v55 = vld [vmem:[#allocation30_spill] sm:$0xff] }
 0x147   : > { %v1634_v57 = vadd.f32 %v1600_v13, %v1599_v50  ;;  %v1603_v58 = vmul.f32 %v5692_v9, %v5692_v9  ;;  %v1604_v31 = vmul.f32 %v5698_v34, %v5698_v34  ;;  %v1605_v22 = vmul.f32 %v5710_v52, %v5710_v52 }
 0x148   : > { %1568 = vadd.xlane.f32.xlu1 %v1567_v7  ;;  %v1637_v19 = vadd.f32 %v1602_v41, %v1601_v37  ;;  %v1606_v40 = vmul.f32 %v5712_v11, %v5712_v11  ;;  %v979_v53 = vrot.slane %v5857_v10, %v7612_v51  ;;  %v983_v60 = vrot.slane %v5857_v10, %v7613_v59  ;;  %v7616_v7 = vld [vmem:[#allocation29_spill] sm:$0xff] }
 0x149   : > { %1626 = vadd.xlane.f32.xlu0 %v1625_v29  ;;  %v1163_v23 = vrot.slane %v5857_v10, %v7614_v61  ;;  %v1167_v5 = vrot.slane %v5857_v10, %v7615_v24  ;;  %v1640_v25 = vadd.f32 %v1604_v31, %v1603_v58  ;;  %v1607_v26 = vmul.f32 %v5728_v14, %v5728_v14 }
 0x14a   : > { %v1608_v12 = vmul.f32 %v5730_v15, %v5730_v15  ;;  %v1379_v17 = vrot.slane %v5857_v10, %v7616_v7  ;;  %v1643_v38 = vadd.f32 %v1606_v40, %v1605_v22  ;;  %v1609_v29 = vmul.f32 %v5746_v63, %v5746_v63 }
 0x14b   : > { %v1610_v54 = vmul.f32 %v5748_v39, %v5748_v39  ;;  %v1059_v50 = vrot.slane %v979_v53, %v7612_v51  ;;  %v1063_v13 = vrot.slane %v983_v60, %v7612_v51  ;;  %v1247_v37 = vrot.slane %v1167_v5, %v7614_v61 }
 0x14c   : > { %1629 = vadd.xlane.f32.xlu1 %v1628_v8  ;;  %v1383_v8 = vrot.slane %v5857_v10, %v7617_v55  ;;  %v1646_v41 = vadd.f32 %v1608_v12, %v1607_v26  ;;  %v1612_v58 = vmul.f32 %v5766_v45, %v5766_v45  ;;  %v1459_v31 = vrot.slane %v1379_v17, %v7616_v7 }
 0x14d   : > { %1632 = vadd.xlane.f32.xlu0 %v1631_v20  ;;  %v1243_v20 = vrot.slane %v1163_v23, %v7614_v61  ;;  %v1613_v22 = vmul.f32 %v5784_v18, %v5784_v18  ;;  %v1614_v40 = vmul.f32 %v5786_v44, %v5786_v44  ;;  %v1094_v60 = vmul.f32 %v1059_v50, %v5594_v3 }
 0x14e   : > { %v1463_v53 = vrot.slane %v1383_v8, %v7616_v7  ;;  %v1095_v61 = vmul.f32 %v1063_v13, %v5594_v3  ;;  %v1279_v24 = vmul.f32 %v1247_v37, %v5592_v0  ;;  %v1616_v26 = vmul.f32 %v5804_v62, %v5804_v62 }
 0x14f   : > { %v1278_v23 = vmul.f32 %v1243_v20, %v5592_v0  ;;  %v1617_v12 = vmul.f32 %v5818_v2, %v5818_v2  ;;  %v1655_v7 = vadd.f32 %v1614_v40, %v1613_v22  ;;  %v1618_v17 = vmul.f32 %v5820_v4, %v5820_v4 }
 0x150   : > { %1635 = vadd.xlane.f32.xlu1 %v1634_v57  ;;  %v1611_v57 = vmul.f32 %v5764_v1, %v5764_v1  ;;  %v1494_v3 = vmul.f32 %v1459_v31, %v5620_v42  ;;  %v1092_v0 = vmul.f32 %v1059_v50, %v5558_v21  ;;  %v1277_v55 = vmul.f32 %v1247_v37, %v5556_v36 }
 0x151   : > { %1638 = vadd.xlane.f32.xlu0 %v1637_v19  ;;  %v1649_v19 = vadd.f32 %v1610_v54, %v1609_v29  ;;  %v1093_v29 = vmul.f32 %v1063_v13, %v5558_v21  ;;  %v1276_v54 = vmul.f32 %v1243_v20, %v5556_v36  ;;  %v1619_v8 = vmul.f32 %v5830_v56, %v5830_v56 }
 0x152   : > { %v1652_v5 = vadd.f32 %v1612_v58, %v1611_v57  ;;  %v1311_v57 = vadd.f32 %v1279_v24, %v1095_v61  ;;  %v1493_v50 = vmul.f32 %v1463_v53, %v5622_v35  ;;  %v1661_v22 = vadd.f32 %v1618_v17, %v1617_v12  ;;  %v7623_v12 = vld [vmem:[#allocation21_spill] sm:$0xff]  ;;  %v5944_v17 = vpop.permute.xlu1 %1774 }
 0x153   : > { %v1308_v36 = vadd.f32 %v1276_v54, %v1092_v0  ;;  %v1309_v20 = vadd.f32 %v1277_v55, %v1093_v29  ;;  %v7624_v55 = vld [vmem:[#allocation26_spill] sm:$0xff] }
 0x154   : > { %1641 = vadd.xlane.f32.xlu1 %v1640_v25  ;;  %v1615_v25 = vmul.f32 %v5798_v16, %v5798_v16 }
 0x155   : > { %1644 = vadd.xlane.f32.xlu0 %v1643_v38  ;;  %v1495_v38 = vmul.f32 %v1463_v53, %v5620_v42  ;;  %v1492_v42 = vmul.f32 %v1459_v31, %v5622_v35 }
 0x156   : > { %v1658_v58 = vadd.f32 %v1616_v26, %v1615_v25  ;;  %v7622_v26 = vld [vmem:[#allocation22_spill] sm:$0xff] }
 0x157   : > { %v5923_v13 = vadd.f32 %v1495_v38, %v1311_v57  ;;  %v5925_v40 = vadd.f32 %v1492_v42, %v1308_v36  ;;  %v7626_v42 = vld [vmem:[#allocation32_spill] sm:$0xff] }
 0x158   : > { %1647 = vadd.xlane.f32.xlu1 %v1646_v41  ;;  %v1310_v41 = vadd.f32 %v1278_v23, %v1094_v60  ;;  %v5927_v60 = vadd.f32 %v1493_v50, %v1309_v20  ;;  %v435_v50 = vmul.f32 %v7626_v42, %v7626_v42  ;;  %v7628_v20 = vld [vmem:[#allocation34_spill] sm:$0xff] }
 0x159   : > { %1650 = vadd.xlane.f32.xlu0 %v1649_v19  ;;  %v1620_v19 = vmul.f32 %v5832_v6, %v5832_v6  ;;  %7619 = vst [vmem:[#allocation28_spill] sm:$0xff] %v5923_v13  ;;  %7620 = vst [vmem:[#allocation29_spill] sm:$0xff] %v5925_v40  ;;  %v1621_v31 = vmul.f32 %v5925_v40, %v5925_v40 }
 0x15a   : > { %v5921_v21 = vadd.f32 %v1494_v3, %v1310_v41  ;;  %7621 = vst [vmem:[#allocation30_spill] sm:$0xff] %v5927_v60  ;;  %v1570_v35 = vadd.f32 %v5927_v60, %v5925_v40  ;;  %v1622_v53 = vmul.f32 %v5927_v60, %v5927_v60  ;;  %v5946_v3 = vpop.permute.xlu0 %1770  ;;  %v7625_v41 = vld [vmem:[#allocation31_spill] sm:$0xff]  ;;  %v4247_v40 = vrot.slane %v435_v50, 10 }
 0x15b   : > { %v1664_v37 = vadd.f32 %v1620_v19, %v1619_v8  ;;  %v433_v8 = vmul.f32 %v7624_v55, %v7624_v55  ;;  %v434_v57 = vmul.f32 %v7625_v41, %v7625_v41 }
 0x15c   : > { %1653 = vadd.xlane.f32.xlu1 %v1652_v5  ;;  %7618 = vst [vmem:[#allocation27_spill] sm:$0xff] %v5921_v21  ;;  %v1573_v61 = vadd.f32 %v5923_v13, %v5921_v21  ;;  %v1667_v23 = vadd.f32 %v1622_v53, %v1621_v31  ;;  %v1623_v24 = vmul.f32 %v5921_v21, %v5921_v21  ;;  %v7630_v31 = vld [vmem:[#allocation36_spill] sm:$0xff] }
 0x15d   : > { %1656 = vadd.xlane.f32.xlu0 %v1655_v7  ;;  %v1624_v5 = vmul.f32 %v5923_v13, %v5923_v13  ;;  %v7492_v7 = vmov 0.0   ;;  %v439_v53 = vmul.f32 %v7630_v31, %v7630_v31  ;;  %v4245_v42 = vrot.slane %v433_v8, 10 }
 0x15e   : > { %2025 = vmatprep.mubr.f32.mxu0 %v7492_v7  ;;  %v4246_v51 = vrot.slane %v434_v57, 10 }
 0x15f   : > { %v1670_v25 = vadd.f32 %v1624_v5, %v1623_v24  ;;  %v4238_v24 = vrot.slane %v434_v57, 9  ;;  %v440_v5 = vmul.f32 %v5857_v10, %v5857_v10  ;;  %v4243_v7 = vrot.slane %v439_v53, 9 }
 0x160   : > { %1659 = vadd.xlane.f32.xlu1 %v1658_v58  ;;  %v4251_v44 = vrot.slane %v439_v53, 10 }
 0x161   : > { %1662 = vadd.xlane.f32.xlu0 %v1661_v22  ;;  %v7627_v22 = vld [vmem:[#allocation33_spill] sm:$0xff]  ;;  %v474_v59 = vadd.f32 %v4238_v24, %v434_v57  ;;  %v479_v16 = vadd.f32 %v4243_v7, %v439_v53  ;;  %v4252_v57 = vrot.slane %v440_v5, 10 }
 0x162   : > { %v436_v36 = vmul.f32 %v7627_v22, %v7627_v22 }
 0x164   : > { %1665 = vadd.xlane.f32.xlu1 %v1664_v37  ;;  %v437_v37 = vmul.f32 %v7628_v20, %v7628_v20  ;;  %v4240_v55 = vrot.slane %v436_v36, 9  ;;  %v4248_v21 = vrot.slane %v436_v36, 10 }
 0x165   : > { %1574 = vadd.xlane.f32.xlu0 %v1573_v61  ;;  %v7629_v61 = vld [vmem:[#allocation35_spill] sm:$0xff] }
 0x166   : > { %v4241_v41 = vrot.slane %v437_v37, 9  ;;  %v476_v13 = vadd.f32 %v4240_v55, %v436_v36  ;;  %v4249_v10 = vrot.slane %v437_v37, 10 }
 0x168   : > { %1571 = vadd.xlane.f32.xlu1 %v1570_v35  ;;  %v438_v35 = vmul.f32 %v7629_v61, %v7629_v61  ;;  %v4244_v61 = vrot.slane %v440_v5, 9  ;;  %v477_v6 = vadd.f32 %v4241_v41, %v437_v37  ;;  %v5972_v55 = vadd.f32 %v4248_v21, %v476_v13 }
 0x16a   : > { %v4242_v22 = vrot.slane %v438_v35, 9  ;;  %v4250_v56 = vrot.slane %v438_v35, 10  ;;  %7631 = vst [vmem:[#allocation22_spill] sm:$0xff] %v5972_v55  ;;  %v5974_v37 = vadd.f32 %v4249_v10, %v477_v6 }
 0x16c   : > { %1668 = vadd.xlane.f32.xlu1 %v1667_v23  ;;  %v4237_v23 = vrot.slane %v433_v8, 9  ;;  %v478_v62 = vadd.f32 %v4242_v22, %v438_v35  ;;  %v5980_v35 = vadd.f32 %v4251_v44, %v479_v16  ;;  %vm543_vm6 = vcmp.eq.f32.partialorder %v5974_v37, inf }
 0x16d   : > { %vm545_vm7 = vcmp.eq.f32.partialorder %v5974_v37, 0.0 }
 0x16e   : > { %v473_v20 = vadd.f32 %v4237_v23, %v433_v8  ;;  %v480_v8 = vadd.f32 %v4244_v61, %v440_v5  ;;  %v5968_v23 = vadd.f32 %v4246_v51, %v474_v59  ;;  %7633 = vst [vmem:[#allocation26_spill] sm:$0xff] %v5980_v35 }
 0x170   : > { %1671 = vadd.xlane.f32.xlu1 %v1670_v25  ;;  %v5966_v45 = vadd.f32 %v4245_v42, %v473_v20  ;;  %vm522_vm2 = vcmp.eq.f32.partialorder %v5968_v23, inf  ;;  %vm524_vm3 = vcmp.eq.f32.partialorder %v5968_v23, 0.0 }
 0x172   : > { %vm515_vm0 = vcmp.eq.f32.partialorder %v5966_v45, inf  ;;  %vm517_vm1 = vcmp.eq.f32.partialorder %v5966_v45, 0.0 }
 0x17b   : > { %1878 = vperm.xlu0 %4686, %v7622_v26  }
 0x181   : > { %1874 = vperm.xlu1 %4685, %v7623_v12   ;;  %v4239_v12 = vrot.slane %v435_v50, 9 }
 0x183   : > { %v475_v31 = vadd.f32 %v4239_v12, %v435_v50 }
 0x185   : > { %v5970_v24 = vadd.f32 %v4247_v40, %v475_v31  ;;  %v5984_v40 = vadd.f32 %v4252_v57, %v480_v8 }
 0x187   : > { %7634 = vst [vmem:[#allocation31_spill] sm:$0xff] %v5984_v40  ;;  %vm529_vm4 = vcmp.eq.f32.partialorder %v5970_v24, inf  ;;  %vm531_vm5 = vcmp.eq.f32.partialorder %v5970_v24, 0.0 }
 0x1b7   : > { %v1533_v38 = vpop.xlane.xlu0 %1532  ;;  %v1530_v0 = vpop.xlane.xlu1 %1529 }
 0x1b8   : > { %v1578_v4 = vmul.f32 0.00390625, %v1533_v38  ;;  %v1577_v18 = vmul.f32 0.00390625, %v1530_v0  ;;  %v5978_v0 = vadd.f32 %v4250_v56, %v478_v62 }
 0x1ba   : > { %v1739_v38 = vsub.f32 %v5648_v46, %v1578_v4  ;;  %v1740_v7 = vsub.f32 %v5650_v47, %v1578_v4  ;;  %7632 = vst [vmem:[#allocation21_spill] sm:$0xff] %v5978_v0  ;;  %v1737_v51 = vsub.f32 %v5652_v32, %v1577_v18  ;;  %v1738_v59 = vsub.f32 %v5654_v43, %v1577_v18 }
 0x1bb   : > { %v1536_v29 = vpop.xlane.xlu0 %1535  ;;  %v1539_v54 = vpop.xlane.xlu1 %1538  ;;  %v1689_v62 = vmul.f32 %v1577_v18, %v1577_v18 }
 0x1bc   : > { %v1579_v50 = vmul.f32 0.00390625, %v1536_v29  ;;  %v1580_v12 = vmul.f32 0.00390625, %v1539_v54  ;;  %v5986_v29 = vmul.f32 %v1578_v4, %v1578_v4  ;;  %v5992_v44 = vmul.f32 %v5944_v17, %v1739_v38 }
 0x1bd   : > { %v5998_v4 = vmul.f32 %v5944_v17, %v1740_v7 }
 0x1be   : > { %v1741_v54 = vsub.f32 %v5656_v33, %v1579_v50  ;;  %v1742_v46 = vsub.f32 %v5658_v48, %v1579_v50  ;;  %v1743_v47 = vsub.f32 %v5660_v49, %v1580_v12  ;;  %v1744_v32 = vsub.f32 %v5662_v27, %v1580_v12 }
 0x1bf   : > { %v1542_v58 = vpop.xlane.xlu0 %1541  ;;  %v1545_v19 = vpop.xlane.xlu1 %1544  ;;  %v6003_v33 = vmul.f32 %v5946_v3, %v1738_v59  ;;  %v6006_v48 = vmul.f32 %v5946_v3, %v1737_v51 }
 0x1c0   : > { %v1581_v21 = vmul.f32 0.00390625, %v1542_v58  ;;  %v1582_v13 = vmul.f32 0.00390625, %v1545_v19  ;;  %v6000_v58 = vmul.f32 %v1579_v50, %v1579_v50  ;;  %v6011_v19 = vmul.f32 %v1580_v12, %v1580_v12 }
 0x1c1   : > { %v6014_v53 = vmul.f32 %v5946_v3, %v1741_v54  ;;  %v6017_v5 = vmul.f32 %v5946_v3, %v1742_v46 }
 0x1c2   : > { %v1745_v49 = vsub.f32 %v5676_v28, %v1581_v21  ;;  %v1746_v18 = vsub.f32 %v5678_v30, %v1581_v21  ;;  %v1747_v27 = vsub.f32 %v5692_v9, %v1582_v13  ;;  %v6026_v28 = vmul.f32 %v5944_v17, %v1744_v32 }
 0x1c3   : > { %v1548_v25 = vpop.xlane.xlu0 %1547  ;;  %v1551_v26 = vpop.xlane.xlu1 %1550  ;;  %v1693_v42 = vmul.f32 %v1581_v21, %v1581_v21  ;;  %v6029_v22 = vmul.f32 %v1582_v13, %v1582_v13 }
 0x1c4   : > { %v1583_v43 = vmul.f32 0.00390625, %v1548_v25  ;;  %v1584_v56 = vmul.f32 0.00390625, %v1551_v26  ;;  %v6020_v25 = vmul.f32 %v5944_v17, %v1743_v47  ;;  %v1748_v26 = vsub.f32 %v5698_v34, %v1582_v13 }
 0x1c5   : > { %v6035_v34 = vmul.f32 %v5946_v3, %v1745_v49  ;;  %v6038_v8 = vmul.f32 %v5946_v3, %v1746_v18  ;;  %v6041_v57 = vmul.f32 %v5944_v17, %v1747_v27 }
 0x1c6   : > { %v1749_v30 = vsub.f32 %v5710_v52, %v1583_v43  ;;  %v1750_v20 = vsub.f32 %v5712_v11, %v1583_v43  ;;  %v1751_v61 = vsub.f32 %v5728_v14, %v1584_v56  ;;  %v6044_v50 = vmul.f32 %v5944_v17, %v1748_v26  ;;  %v7636_v26 = vld [vmem:[#allocation40_spill] sm:$0xff] }
 0x1c7   : > { %v5964_v60 = vpop.xlane.xlu0 %1553  ;;  %v1752_v11 = vsub.f32 %v5730_v15, %v1584_v56  ;;  %v6047_v38 = vmul.f32 %v1583_v43, %v1583_v43  ;;  %v6052_v21 = vmul.f32 %v1584_v56, %v1584_v56 }
 0x1c8   : > { %v1585_v31 = vmul.f32 0.00390625, %v5964_v60  ;;  %v6050_v60 = vmul.f32 %v5946_v3, %v1749_v30  ;;  %v6055_v13 = vmul.f32 %v5946_v3, %v1750_v20 }
 0x1c9   : > { %v1557_v2 = vpop.xlane.xlu1 %1556  ;;  %v6066_v43 = vmul.f32 %v5944_v17, %v1752_v11 }
 0x1ca   : > { %v1586_v52 = vmul.f32 0.00390625, %v1557_v2  ;;  %v6058_v2 = vmul.f32 %v5944_v17, %v1751_v61  ;;  %v1753_v15 = vsub.f32 %v5746_v63, %v1585_v31  ;;  %v1754_v46 = vsub.f32 %v5748_v39, %v1585_v31 }
 0x1cb   : > { %v6070_v20 = vmul.f32 %v1585_v31, %v1585_v31 }
 0x1cc   : > { %v1560_v36 = vpop.xlane.xlu0 %1559  ;;  %v1755_v47 = vsub.f32 %v5764_v1, %v1586_v52  ;;  %v6072_v39 = vmul.f32 %v1586_v52, %v1586_v52  ;;  %v6075_v1 = vmul.f32 %v5946_v3, %v1753_v15 }
 0x1cd   : > { %v1587_v7 = vmul.f32 0.00390625, %v1560_v36 }
 0x1cf   : > { %v1563_v6 = vpop.xlane.xlu1 %1562  ;;  %v1757_v30 = vsub.f32 %v7636_v26, %v1587_v7 }
 0x1d0   : > { %v1588_v56 = vmul.f32 0.00390625, %v1563_v6  ;;  %v6079_v6 = vmul.f32 %v5946_v3, %v1754_v46 }
 0x1d2   : > { %v5995_v16 = vpop.xlane.xlu0 %1565 }
 0x1d3   : > { %v1589_v46 = vmul.f32 0.00390625, %v5995_v16 }
 0x1d5   : > { %v6023_v41 = vpop.xlane.xlu1 %1568 }
 0x1d6   : > { %v1627_v9 = vpop.xlane.xlu0 %1626 }
 0x1d7   : > { %v1673_v10 = vmul.f32 0.00390625, %v1627_v9 }
 0x1d9   : > { %v1705_v12 = vsub.f32 %v1673_v10, %v1689_v62  ;;  %v1630_v14 = vpop.xlane.xlu1 %1629  ;;  %v7635_v62 = vld [vmem:[#allocation39_spill] sm:$0xff] }
 0x1da   : > { %v1674_v51 = vmul.f32 0.00390625, %v1630_v14  ;;  %v1633_v59 = vpop.xlane.xlu0 %1632  ;;  %v1756_v32 = vsub.f32 %v7635_v62, %v1586_v52  ;;  %v7638_v52 = vld [vmem:[#allocation42_spill] sm:$0xff]  ;;  %v6090_v62 = vmul.f32 %v5946_v3, %v1757_v30 }
 0x1db   : > { %v1675_v54 = vmul.f32 0.00390625, %v1633_v59  ;;  %v1721_v49 = vmax.f32 %v1705_v12, 0.0  ;;  %v1759_v14 = vsub.f32 %v7638_v52, %v1588_v56 }
 0x1dc   : > { %v1706_v36 = vsub.f32 %v1674_v51, %v5986_v29  ;;  %v7637_v29 = vld [vmem:[#allocation41_spill] sm:$0xff]  ;;  %v6085_v12 = vmul.f32 %v5944_v17, %v1756_v32 }
 0x1dd   : > { %v1707_v18 = vsub.f32 %v1675_v54, %v6000_v58  ;;  %v1636_v27 = vpop.xlane.xlu1 %1635  ;;  %v1758_v61 = vsub.f32 %v7637_v29, %v1587_v7  ;;  %v6082_v58 = vmul.f32 %v5944_v17, %v1755_v47  ;;  %v1809_v51 = vadd.f32 1e-05, %v1721_v49 }
 0x1de   : > { %v1676_v63 = vmul.f32 0.00390625, %v1636_v27  ;;  %v1639_v9 = vpop.xlane.xlu0 %1638  ;;  %v1722_v10 = vmax.f32 %v1706_v36, 0.0  ;;  %v6093_v47 = vmul.f32 %v1587_v7, %v1587_v7  ;;  %v6100_v29 = vmul.f32 %v1588_v56, %v1588_v56 }
 0x1df   : > { %v1677_v11 = vmul.f32 0.00390625, %v1639_v9  ;;  %v1723_v59 = vmax.f32 %v1707_v18, 0.0  ;;  %v6096_v32 = vmul.f32 %v5946_v3, %v1758_v61  ;;  %v7639_v9 = vld [vmem:[#allocation37_spill] sm:$0xff]  ;;  %v6103_v30 = vmul.f32 %v5944_v17, %v1759_v14  ;;  %v7640_v61 = vld [vmem:[#allocation38_spill] sm:$0xff] }
 0x1e0   : > { %v1708_v31 = vsub.f32 %v1676_v63, %v6011_v19  ;;  %v1810_v26 = vadd.f32 1e-05, %v1722_v10  ;;  %v1760_v49 = vsub.f32 %v7639_v9, %v1588_v56  ;;  %4693 = vrsqrt.f32 %v1809_v51 }
 0x1e1   : > { %v1709_v15 = vsub.f32 %v1677_v11, %v1693_v42  ;;  %v1642_v54 = vpop.xlane.xlu1 %1641  ;;  %v1811_v16 = vadd.f32 1e-05, %v1723_v59  ;;  %v1761_v52 = vsub.f32 %v7640_v61, %v1589_v46  ;;  %v1590_v10 = vmul.f32 0.00390625, %v6023_v41 }
 0x1e2   : > { %v1678_v36 = vmul.f32 0.00390625, %v1642_v54  ;;  %v1645_v27 = vpop.xlane.xlu0 %1644  ;;  %v1724_v19 = vmax.f32 %v1708_v31, 0.0  ;;  %4695 = vrsqrt.f32 %v1810_v26 }
 0x1e3   : > { %v1679_v63 = vmul.f32 0.00390625, %v1645_v27  ;;  %v1725_v18 = vmax.f32 %v1709_v15, 0.0  ;;  %v7641_v15 = vld [vmem:[#allocation43_spill] sm:$0xff]  ;;  %4697 = vrsqrt.f32 %v5966_v45 }
 0x1e4   : > { %v1710_v42 = vsub.f32 %v1678_v36, %v6029_v22  ;;  %v1762_v9 = vsub.f32 %v7641_v15, %v1589_v46  ;;  %v1812_v22 = vadd.f32 1e-05, %v1724_v19  ;;  %4699 = vrsqrt.f32 %v1811_v16 }
 0x1e5   : > { %v1711_v7 = vsub.f32 %v1679_v63, %v6047_v38  ;;  %v1648_v11 = vpop.xlane.xlu1 %1647  ;;  %v1813_v36 = vadd.f32 1e-05, %v1725_v18  ;;  %v6112_v38 = vmul.f32 %v5944_v17, %v1760_v49  ;;  %v1701_v63 = vmul.f32 %v1589_v46, %v1589_v46 }
 0x1e6   : > { %v1726_v31 = vmax.f32 %v1710_v42, 0.0  ;;  %v1680_v54 = vmul.f32 0.00390625, %v1648_v11  ;;  %v1651_v27 = vpop.xlane.xlu0 %1650  ;;  %v7642_v42 = vld [vmem:[#allocation44_spill] sm:$0xff]  ;;  %v6117_v18 = vmul.f32 %v5946_v3, %v1761_v52  ;;  %4701 = vrsqrt.f32 %v1812_v22 }
 0x1e7   : > { %v1681_v56 = vmul.f32 0.00390625, %v1651_v27  ;;  %v1727_v14 = vmax.f32 %v1711_v7, 0.0  ;;  %v1763_v11 = vsub.f32 %v7642_v42, %v1590_v10  ;;  %v6123_v49 = vmul.f32 %v5946_v3, %v1762_v9 }
 0x1e8   : > { %v1712_v51 = vsub.f32 %v1680_v54, %v6052_v21  ;;  %v1814_v61 = vadd.f32 1e-05, %v1726_v31  ;;  %v7643_v21 = vld [vmem:[#allocation45_spill] sm:$0xff]  ;;  %4703 = vrsqrt.f32 %v1813_v36 }
 0x1e9   : > { %v1713_v41 = vsub.f32 %v1681_v56, %v6070_v20  ;;  %v1654_v59 = vpop.xlane.xlu1 %1653  ;;  %v1764_v7 = vsub.f32 %v7643_v21, %v1590_v10  ;;  %v1815_v20 = vadd.f32 1e-05, %v1727_v14  ;;  %4705 = vrsqrt.f32 %v5968_v23 }
 0x1ea   : > { %v1728_v26 = vmax.f32 %v1712_v51, 0.0  ;;  %v1682_v19 = vmul.f32 0.00390625, %v1654_v59  ;;  %v1657_v27 = vpop.xlane.xlu0 %1656  ;;  %v6131_v22 = vmul.f32 %v5944_v17, %v1763_v11  ;;  %4707 = vrsqrt.f32 %v1814_v61  ;;  %v4694_v36 = vpop.eup %4693 }
 0x1eb   : > { %v1683_v54 = vmul.f32 0.00390625, %v1657_v27  ;;  %v1729_v31 = vmax.f32 %v1713_v41, 0.0  ;;  %v1702_v51 = vmul.f32 %v1590_v10, %v1590_v10  ;;  %v6134_v14 = vmul.f32 %v5944_v17, %v1764_v7 }
 0x1ec   : > { %v1714_v46 = vsub.f32 %v1682_v19, %v6072_v39  ;;  %v1816_v16 = vadd.f32 1e-05, %v1728_v26  ;;  %4709 = vrsqrt.f32 %v1815_v20  ;;  %v4696_v11 = vpop.eup %4695  ;;  %v6141_v20 = vmul.f32 %v4694_v36, %v6003_v33 }
 0x1ed   : > { %v1715_v52 = vsub.f32 %v1683_v54, %v6093_v47  ;;  %v1660_v15 = vpop.xlane.xlu1 %1659  ;;  %v1817_v61 = vadd.f32 1e-05, %v1729_v31  ;;  %v4698_v27 = vpop.eup %4697  ;;  %v6147_v31 = vstv %s6120_s14  ;;  %v1843_v19 = vmul.f32 %v4696_v11, %v5992_v44  ;;  %s4229_s14 = sshll.u32 %s390_s11, 3 }
 0x1ee   : > { %v1684_v56 = vmul.f32 0.00390625, %v1660_v15  ;;  %v1663_v9 = vpop.xlane.xlu0 %1662  ;;  %v1730_v39 = vmax.f32 %v1714_v46, 0.0  ;;  %4711 = vrsqrt.f32 %v1816_v16  ;;  %v4700_v46 = vpop.eup %4699 }
 0x1ef   : > { %v1685_v59 = vmul.f32 0.00390625, %v1663_v9  ;;  %v1731_v47 = vmax.f32 %v1715_v52, 0.0  ;;  %v1844_v9 = vmul.f32 %v4696_v11, %v5998_v4  ;;  %4713 = vrsqrt.f32 %v1817_v61  ;;  %v7644_v61 = vld [vmem:[#allocation27_spill] sm:$0xff] }
 0x1f0   : > { %v1716_v41 = vsub.f32 %v1684_v56, %v6100_v29  ;;  %v6144_v29 = vmul.f32 %v4694_v36, %v6006_v48  ;;  %v1818_v52 = vadd.f32 1e-05, %v1730_v39  ;;  %v514_v48 = vmul.f32 %v4698_v27, %v5966_v45 }
 0x1f1   : > { %v1717_v26 = vsub.f32 %v1685_v59, %v1701_v63  ;;  %v1666_v10 = vpop.xlane.xlu1 %1665  ;;  %v1819_v63 = vadd.f32 1e-05, %v1731_v47  ;;  %v6151_v59 = vstv %s6126_s24  ;;  %4715 = vrsqrt.f32 %v5970_v24  ;;  %s392_s24 = scalar_lea.vmem [#allocation12], %s4229_s14 }
 0x1f2   : > { %v1732_v21 = vmax.f32 %v1716_v41, 0.0  ;;  %v1686_v7 = vmul.f32 0.00390625, %v1666_v10  ;;  %v1575_v54 = vpop.xlane.xlu0 %1574  ;;  %v4702_v41 = vpop.eup %4701  ;;  %4717 = vrsqrt.f32 %v1818_v52  ;;  %v6175_v52 = vsel %vm515_vm0, %v5966_v45, %v514_v48  ;;  %v7646_v48 = vld [vmem:[#allocation29_spill] sm:$0xff]  ;;  %s4091_s19 = sshll.u32 %s392_s24, 4  ;;  %s7403_s19 = int_to_ptr.vmem [resolvable:$true] %s4091_s19 }
 0x1f3   : > { %v1733_v15 = vmax.f32 %v1717_v26, 0.0  ;;  %v1592_v16 = vmul.f32 0.00390625, %v1575_v54  ;;  %v4704_v36 = vpop.eup %4703  ;;  %v6158_v26 = vmul.f32 %v4700_v46, %v6017_v5  ;;  %4719 = vrsqrt.f32 %v1819_v63  ;;  %s4950_s25 = scalar_lea.vmem %s7403_s19, 128 }
 0x1f4   : > { %v1718_v56 = vsub.f32 %v1686_v7, %v1702_v51  ;;  %v1820_v10 = vadd.f32 1e-05, %v1732_v21  ;;  %v6161_v51 = vmul.f32 %v4700_v46, %v6014_v53  ;;  %v4706_v4 = vpop.eup %4705  ;;  %v7645_v7 = vld [vmem:[#allocation28_spill] sm:$0xff]  ;;  %v1848_v54 = vmul.f32 %v4702_v41, %v6026_v28  ;;  %p4951_p9 = scmp.ne.s32.totalorder %s7403_s19, %s4950_s25 }
 0x1f5   : > { %v1572_v33 = vpop.xlane.xlu1 %1571  ;;  %v1821_v47 = vadd.f32 1e-05, %v1733_v15  ;;  %v1767_v21 = vsub.f32 %v7644_v61, %v1592_v16  ;;  %v1768_v44 = vsub.f32 %v7645_v7, %v1592_v16  ;;  %v4708_v11 = vpop.eup %4707  ;;  %v1847_v5 = vmul.f32 %v4702_v41, %v6020_v25 }
 0x1f6   : > { %v6155_v39 = vmul.f32 0.00390625, %v1572_v33  ;;  %v1734_v27 = vmax.f32 %v1718_v56, 0.0  ;;  %4721 = vrsqrt.f32 %v1820_v10  ;;  %v1850_v53 = vmul.f32 %v4704_v36, %v6038_v8  ;;  %v4710_v15 = vpop.eup %4709  ;;  %p4952_p1 = pnand %p4951_p9, %p7732_p10 }
 0x1f7   : > { %v6170_v46 = vmul.f32 %v4704_v36, %v6035_v34  ;;  %v1704_v61 = vmul.f32 %v1592_v16, %v1592_v16  ;;  %v6182_v25 = vmul.f32 %v4706_v4, %v5968_v23  ;;  %4723 = vrsqrt.f32 %v1821_v47  ;;  %v7647_v4 = vld [vmem:[#allocation30_spill] sm:$0xff] }
 0x1f8   : > { %v1703_v63 = vmul.f32 %v6155_v39, %v6155_v39  ;;  %v4712_v8 = vpop.eup %4711  ;;  %v6185_v34 = vmul.f32 %v5944_v17, %v1767_v21  ;;  %v6188_v41 = vmul.f32 %v5944_v17, %v1768_v44  ;;  %v1852_v10 = vmul.f32 %v4708_v11, %v6044_v50  ;;  %p4953_p2 = pneg %p4952_p1 }
 0x1f9   : > { %v1669_v33 = vpop.xlane.xlu1 %1668  ;;  %v1822_v16 = vadd.f32 1e-05, %v1734_v27  ;;  %v1765_v36 = vsub.f32 %v7646_v48, %v6155_v39  ;;  %v1854_v50 = vmul.f32 %v4710_v15, %v6055_v13  ;;  %v1856_v27 = vmul.f32 %v4712_v8, %v6066_v43  ;;  %v4714_v48 = vpop.eup %4713 }
 0x1fa   : > { %v1687_v28 = vmul.f32 0.00390625, %v1669_v33  ;;  %v6179_v56 = vpop.permute.xlu0 %1878  ;;  %v1851_v33 = vmul.f32 %v4708_v11, %v6041_v57  ;;  %v1853_v11 = vmul.f32 %v4710_v15, %v6050_v60  ;;  %v1858_v55 = vmul.f32 %v4714_v48, %v6079_v6 }
 0x1fb   : > { %v1884_v47 = vadd.f32 %v6179_v56, %v1844_v9  ;;  %v1883_v21 = vadd.f32 %v6179_v56, %v1843_v19  ;;  %v1888_v17 = vadd.f32 %v6179_v56, %v1848_v54  ;;  %v6203_v57 = vadd.f32 %v6179_v56, %v1852_v10 }
 0x1fc   : > { %v1719_v7 = vsub.f32 %v1687_v28, %v1703_v63  ;;  %v1887_v63 = vadd.f32 %v6179_v56, %v1847_v5  ;;  %v1855_v9 = vmul.f32 %v4712_v8, %v6058_v2  ;;  %v6207_v28 = vpop.eup %4715  ;;  %4725 = vrsqrt.f32 %v1822_v16 }
 0x1fd   : > { %v1672_v40 = vpop.xlane.xlu1 %1671  ;;  %v6210_v19 = vmul.f32 %v5946_v3, %v1765_v36  ;;  %v6213_v13 = vadd.f32 %v6179_v56, %v1851_v33  ;;  %v4718_v43 = vpop.eup %4717  ;;  %v1916_v5 = vmax.f32 %v1884_v47, 0.0  ;;  %v1915_v10 = vmax.f32 %v1883_v21, 0.0 }
 0x1fe   : > { %v1735_v44 = vmax.f32 %v1719_v7, 0.0  ;;  %v1688_v0 = vmul.f32 0.00390625, %v1672_v40  ;;  %v1920_v7 = vmax.f32 %v1888_v17, 0.0  ;;  %v6218_v60 = vadd.f32 %v6179_v56, %v1856_v27  ;;  %v4720_v2 = vpop.eup %4719 }
 0x1ff   : > { %v1919_v47 = vmax.f32 %v1887_v63, 0.0  ;;  %v1924_v21 = vmax.f32 %v6203_v57, 0.0  ;;  %v1862_v35 = vmul.f32 %v4720_v2, %v6096_v32  ;;  %v1859_v32 = vmul.f32 %v4718_v43, %v6082_v58 }
 0x200   : > { %v1720_v40 = vsub.f32 %v1688_v0, %v1704_v61  ;;  %v1823_v15 = vadd.f32 1e-05, %v1735_v44  ;;  %v4722_v61 = vpop.eup %4721  ;;  %vm723_vm0 = vcmask 1040384  }
 0x201   : > { %v6215_v54 = vpop.permute.xlu1 %1874  ;;  %v4724_v42 = vpop.eup %4723  ;;  %v1864_v63 = vmul.f32 %v4722_v61, %v6112_v38  ;;  %v1863_v58 = vmul.f32 %v4722_v61, %v6103_v30 }
 0x202   : > { %v1736_v8 = vmax.f32 %v1720_v40, 0.0  ;;  %v1882_v16 = vadd.f32 %v6215_v54, %v6141_v20  ;;  %v1881_v0 = vadd.f32 %v6215_v54, %v6144_v29  ;;  %v1886_v36 = vadd.f32 %v6215_v54, %v6158_v26 }
 0x203   : > { %v1885_v33 = vadd.f32 %v6215_v54, %v6161_v51  ;;  %v1890_v40 = vadd.f32 %v6215_v54, %v1850_v53  ;;  %v1860_v29 = vmul.f32 %v4718_v43, %v6085_v12  ;;  %4727 = vrsqrt.f32 %v1823_v15 }
 0x204   : > { %v1824_v17 = vadd.f32 1e-05, %v1736_v8  ;;  %v1914_v27 = vmax.f32 %v1882_v16, 0.0  ;;  %v1913_v44 = vmax.f32 %v1881_v0, 0.0  ;;  %v1918_v20 = vmax.f32 %v1886_v36, 0.0 }
 0x205   : > { %v1917_v57 = vmax.f32 %v1885_v33, 0.0  ;;  %v1889_v53 = vadd.f32 %v6215_v54, %v6170_v46  ;;  %v1857_v8 = vmul.f32 %v4714_v48, %v6075_v1  ;;  %v1922_v16 = vmax.f32 %v1890_v40, 0.0 }
 0x206   : > { %v4415_v26 = vpack.c.bf16 %v1916_v5, %v1914_v27  ;;  %v4417_v51 = vpack.c.bf16 %v1915_v10, %v1913_v44  ;;  %4729 = vrsqrt.f32 %v1824_v17  ;;  %v4419_v6 = vpack.c.bf16 %v1920_v7, %v1918_v20  ;;  %v4726_v46 = vpop.eup %4725 }
 0x207   : > { %v1894_v12 = vadd.f32 %v6215_v54, %v1854_v50  ;;  %v1893_v5 = vadd.f32 %v6215_v54, %v1853_v11  ;;  %v1895_v10 = vadd.f32 %v6179_v56, %v1855_v9  ;;  %v1898_v38 = vadd.f32 %v6215_v54, %v1858_v55 }
 0x208   : > { %4416 = vmatprep.subr.bf16.mxu0 %v4415_v26  ;;  %v1897_v15 = vadd.f32 %v6215_v54, %v1857_v8  ;;  %v1902_v1 = vadd.f32 %v6215_v54, %v1862_v35  ;;  %v1904_v48 = vadd.f32 %v6179_v56, %v1864_v63  ;;  %v1861_v50 = vmul.f32 %v4720_v2, %v6090_v62 }
 0x209   : > { %4418 = vmatpush1.bf16.msra.mxu0 %v4417_v51  ;;  %v4421_v11 = vpack.c.bf16 %v1919_v47, %v1917_v57  ;;  %v1921_v9 = vmax.f32 %v1889_v53, 0.0  ;;  %v1923_v55 = vmax.f32 %v6213_v13, 0.0  ;;  %v1900_v43 = vadd.f32 %v6179_v56, %v1860_v29 }
 0x20a   : > { %4420 = vmatprep.subr.bf16.mxu0 %v4419_v6  ;;  %v4423_v7 = vpack.c.bf16 %v1924_v21, %v1922_v16  ;;  %v1926_v0 = vmax.f32 %v1894_v12, 0.0  ;;  %v1928_v36 = vmax.f32 %v6218_v60, 0.0  ;;  %v1899_v35 = vadd.f32 %v6179_v56, %v1859_v32 }
 0x20b   : > { %v1925_v33 = vmax.f32 %v1893_v5, 0.0  ;;  %v1927_v17 = vmax.f32 %v1895_v10, 0.0  ;;  %v1930_v62 = vmax.f32 %v1898_v38, 0.0  ;;  %v1929_v2 = vmax.f32 %v1897_v15, 0.0 }
 0x20c   : > { %v1934_v30 = vmax.f32 %v1902_v1, 0.0  ;;  %v1936_v61 = vmax.f32 %v1904_v48, 0.0  ;;  %v1901_v47 = vadd.f32 %v6215_v54, %v1861_v50  ;;  %v1903_v13 = vadd.f32 %v6179_v56, %v1863_v58 }
 0x20d   : > { %4422 = vmatpush1.bf16.msra.mxu0 %v4421_v11  ;;  %v4425_v27 = vpack.c.bf16 %v1923_v55, %v1921_v9  ;;  %v1932_v44 = vmax.f32 %v1900_v43, 0.0  ;;  %v1866_v21 = vmul.f32 %v4724_v42, %v6123_v49  ;;  %v1868_v60 = vmul.f32 %v4726_v46, %v6134_v14  ;;  %v4728_v40 = vpop.eup %4727 }
 0x20e   : > { %4424 = vmatprep.subr.bf16.mxu0 %v4423_v7  ;;  %v4427_v20 = vpack.c.bf16 %v1928_v36, %v1926_v0  ;;  %v1931_v29 = vmax.f32 %v1899_v35, 0.0  ;;  %v1865_v26 = vmul.f32 %v4724_v42, %v6117_v18  ;;  %v7648_v51 = vand.u32 2147483648, %v5966_v45 }
 0x20f   : > { %v7649_v53 = vsub.f32 %v7647_v4, %v6155_v39  ;;  %v4429_v49 = vpack.c.bf16 %v1927_v17, %v1925_v33  ;;  %v4431_v14 = vpack.c.bf16 %v1932_v44, %v1930_v62  ;;  %v1867_v6 = vmul.f32 %v4726_v46, %v6131_v22  ;;  %v7652_v17 = vld [vmem:[#allocation22_spill] sm:$0xff] }
 0x210   : > { %v519_v63 = vsel %vm517_vm1, %v7648_v51, %v6175_v52  ;;  %v4730_v57 = vpop.eup %4729  ;;  %v4433_v16 = vpack.c.bf16 %v1931_v29, %v1929_v2  ;;  %v4435_v18 = vpack.c.bf16 %v1936_v61, %v1934_v30  ;;  %v1933_v42 = vmax.f32 %v1901_v47, 0.0  ;;  %v7653_v47 = vld [vmem:[#allocation21_spill] sm:$0xff] }
 0x211   : > { %v1806_v8 = vmul.f32 %v5946_v3, %v7649_v53  ;;  %4426 = vmatpush1.bf16.msra.mxu0 %v4425_v27  ;;  %v1935_v12 = vmax.f32 %v1903_v13, 0.0  ;;  %v1906_v32 = vadd.f32 %v6215_v54, %v1866_v21  ;;  %v1908_v45 = vadd.f32 %v6179_v56, %v1868_v60  ;;  %v7654_v27 = vld [vmem:[#allocation31_spill] sm:$0xff] }
 0x212   : > { %4428 = vmatprep.subr.bf16.mxu0 %v4427_v20  ;;  %v570_v5 = vmul.f32 %v6147_v31, %v519_v63  ;;  %v1905_v39 = vadd.f32 %v6215_v54, %v1865_v26  ;;  %v1872_v3 = vmul.f32 %v4730_v57, %v6188_v41  ;;  %v1869_v4 = vmul.f32 %v4728_v40, %v6210_v19 }
 0x213   : > { %v1870_v52 = vmul.f32 %v4728_v40, %v1806_v8  ;;  %v523_v22 = vsel %vm522_vm2, %v5968_v23, %v6182_v25  ;;  %v1907_v10 = vadd.f32 %v6179_v56, %v1867_v6  ;;  %v7650_v15 = vand.u32 2147483648, %v5968_v23 }
 0x214   : > { %v579_v38 = vsub.f32 %v6151_v59, %v570_v5  ;;  %v528_v41 = vmul.f32 %v6207_v28, %v5970_v24  ;;  %v1871_v19 = vmul.f32 %v4730_v57, %v6185_v34  ;;  %v1938_v25 = vmax.f32 %v1906_v32, 0.0 }
 0x215   : > { %4430 = vmatpush1.bf16.msra.mxu0 %v4429_v49  ;;  %v526_v46 = vsel %vm524_vm3, %v7650_v15, %v523_v22  ;;  %v532_v58 = vand.u32 2147483648, %v5970_v24  ;;  %v1940_v23 = vmax.f32 %v1908_v45, 0.0  ;;  %v1912_v11 = vadd.f32 %v6179_v56, %v1872_v3  ;;  %v1946_v15 = vld [vmem:[#allocation6 + $0x8] sm:$0xff] }
 0x216   : > { %4432 = vmatprep.subr.bf16.mxu0 %v4431_v14  ;;  %v571_v1 = vmul.f32 %v6147_v31, %v526_v46  ;;  %v4253_v48 = vmul.f32 -1.442695, %v579_v38  ;;  %v530_v50 = vsel %vm529_vm4, %v5970_v24, %v528_v41  ;;  %4731 = vrsqrt.f32 %v5974_v37  ;;  %v7651_v24 = vld [vmem:[#allocation26_spill] sm:$0xff]  ;;  %v1945_v14 = vld [vmem:[#allocation6] sm:$0xff] }
 0x217   : > { %v4437_v34 = vpack.c.bf16 %v1935_v12, %v1933_v42  ;;  %v1910_v9 = vadd.f32 %v6215_v54, %v1870_v52  ;;  %v533_v55 = vsel %vm531_vm5, %v532_v58, %v530_v50  ;;  %v1911_v43 = vadd.f32 %v6179_v56, %v1871_v19 }
 0x218   : > { %v580_v28 = vsub.f32 %v6151_v59, %v571_v1  ;;  %4733 = vpow2.f32 %v4253_v48  ;;  %v572_v0 = vmul.f32 %v6147_v31, %v533_v55  ;;  %v1937_v36 = vmax.f32 %v1905_v39, 0.0 }
 0x219   : > { %4434 = vmatpush1.bf16.msra.mxu0 %v4433_v16  ;;  %4735 = vrsqrt.f32 %v7651_v24  ;;  %v1939_v35 = vmax.f32 %v1907_v10, 0.0  ;;  %v1909_v33 = vadd.f32 %v6215_v54, %v1869_v4  ;;  %v4439_v62 = vpack.c.bf16 %v1940_v23, %v1938_v25 }
 0x21a   : > { %4436 = vmatprep.subr.bf16.mxu0 %v4435_v18  ;;  %v4254_v7 = vmul.f32 -1.442695, %v580_v28  ;;  %4737 = vrsqrt.f32 %v7652_v17  ;;  %v1944_v2 = vmax.f32 %v1912_v11, 0.0  ;;  %v581_v30 = vsub.f32 %v6151_v59, %v572_v0 }
 0x21b   : > { %v1942_v61 = vmax.f32 %v1910_v9, 0.0  ;;  %v1943_v56 = vmax.f32 %v1911_v43, 0.0  ;;  %v4441_v44 = vpack.c.bf16 %v1939_v35, %v1937_v36  ;;  %v5043_v21 = vmov 5   ;;  %v1947_v43 = vld [vmem:[#allocation6 + $0x10] sm:$0xff] }
 0x21c   : > { %4739 = vpow2.f32 %v4254_v7  ;;  %v4255_v13 = vmul.f32 -1.442695, %v581_v30  ;;  %4688 = vset.pattern.permute.xlu1 %v5043_v21  ;;  %4687 = vset.pattern.permute.xlu0 %v5043_v21  ;;  %v1941_v60 = vmax.f32 %v1909_v33, 0.0  ;;  %v546_v29 = vand.u32 2147483648, %v5974_v37  ;;  %v7656_v30 = vld [vmem:[#allocation24_spill] sm:$0xff] }
 0x21d   : > { %4438 = vmatpush1.bf16.msra.mxu0 %v4437_v34  ;;  %4741 = vrsqrt.f32 %v7653_v47  ;;  %v4443_v54 = vpack.c.bf16 %v1944_v2, %v1942_v61  ;;  %vm557_vm8 = vcmp.eq.f32.partialorder %v7651_v24, inf  ;;  %vm559_vm9 = vcmp.eq.f32.partialorder %v7651_v24, 0.0  ;;  %v1948_v2 = vld [vmem:[#allocation6 + $0x18] sm:$0xff] }
 0x21e   : > { %4440 = vmatprep.subr.bf16.mxu0 %v4439_v62  ;;  %4743 = vrsqrt.f32 %v7654_v27  ;;  %v4445_v20 = vpack.c.bf16 %v1943_v56, %v1941_v60  ;;  %v560_v63 = vand.u32 2147483648, %v7651_v24  ;;  %vm536_vm10 = vcmp.eq.f32.partialorder %v7652_v17, inf  ;;  %v1949_v60 = vld [vmem:[#allocation6 + $0x20] sm:$0xff] }
 0x21f   : > { %4745 = vpow2.f32 %v4255_v13  ;;  %vm538_vm11 = vcmp.eq.f32.partialorder %v7652_v17, 0.0  ;;  %v539_v8 = vand.u32 2147483648, %v7652_v17  ;;  %vm550_vm12 = vcmp.eq.f32.partialorder %v7653_v47, inf }
 0x220   : > { %v4732_v40 = vpop.eup %4731  ;;  %vm552_vm13 = vcmp.eq.f32.partialorder %v7653_v47, 0.0  ;;  %v553_v32 = vand.u32 2147483648, %v7653_v47  ;;  %vm564_vm14 = vcmp.eq.f32.partialorder %v7654_v27, inf  ;;  %v567_v10 = vand.u32 2147483648, %v7654_v27 }
 0x221   : > { %4442 = vmatpush1.bf16.msra.mxu0 %v4441_v44  ;;  %v542_v51 = vmul.f32 %v4732_v40, %v5974_v37  ;;  %v7655_v38 = vmov 0.0   ;;  %vm566_vm15 = vcmp.eq.f32.partialorder %v7654_v27, 0.0 }
 0x222   : > { %4444 = vmatprep.subr.bf16.mxu0 %v4443_v54  ;;  %v4734_v26 = vpop.eup %4733 }
 0x223   : > { %v4736_v57 = vpop.eup %4735  ;;  %v611_v53 = vadd.f32 1.0, %v4734_v26  ;;  %v544_v6 = vsel %vm543_vm6, %v5974_v37, %v542_v51 }
 0x224   : > { %v4738_v49 = vpop.eup %4737  ;;  %v556_v16 = vmul.f32 %v4736_v57, %v7651_v24  ;;  %v547_v42 = vsel %vm545_vm7, %v546_v29, %v544_v6 }
 0x225   : > { %4446 = vmatpush1.bf16.msra.mxu0 %v4445_v20  ;;  %4747 = vrcp.f32 %v611_v53  ;;  %v535_v12 = vmul.f32 %v4738_v49, %v7652_v17  ;;  %v574_v5 = vmul.f32 %v6147_v31, %v547_v42 }
 0x226   : > { %v4740_v18 = vpop.eup %4739  ;;  %v558_v39 = vsel %vm557_vm8, %v7651_v24, %v556_v16 }
 0x227   : > { %v4742_v45 = vpop.eup %4741  ;;  %v612_v52 = vadd.f32 1.0, %v4740_v18  ;;  %v561_v37 = vsel %vm559_vm9, %v560_v63, %v558_v39  ;;  %v537_v4 = vsel %vm536_vm10, %v7652_v17, %v535_v12  ;;  %v583_v46 = vsub.f32 %v6151_v59, %v574_v5  ;;  %v1952_v5 = vld [vmem:[#allocation6 + $0x38] sm:$0xff] }
 0x228   : > { %v4744_v3 = vpop.eup %4743  ;;  %2026 = vmatmul.mubr.f32.vlgmr.msra.gmra.mrb[0].mxu0 %v1945_v14  ;;  %v549_v22 = vmul.f32 %v4742_v45, %v7653_v47  ;;  %v576_v41 = vmul.f32 %v6147_v31, %v561_v37  ;;  %v540_v19 = vsel %vm538_vm11, %v539_v8, %v537_v4  ;;  %v1950_v8 = vld [vmem:[#allocation6 + $0x28] sm:$0xff]  ;;  %v1951_v45 = vld [vmem:[#allocation6 + $0x30] sm:$0xff]  ;;  %vm5051_vm9 = vmmov 0  }
 0x229   : > { %2031 = vmatprep.mubr.f32.mxu0 %v7655_v38  ;;  %4749 = vrcp.f32 %v612_v52  ;;  %v4746_v1 = vpop.eup %4745  ;;  %v573_v25 = vmul.f32 %v6147_v31, %v540_v19  ;;  %v563_v50 = vmul.f32 %v4744_v3, %v7654_v27  ;;  %v4257_v23 = vmul.f32 -1.442695, %v583_v46  ;;  %v1953_v3 = vld [vmem:[#allocation6 + $0x40] sm:$0xff] }
 0x22a   : > { %v551_v48 = vsel %vm550_vm12, %v7653_v47, %v549_v22  ;;  %v613_v58 = vadd.f32 1.0, %v4746_v1  ;;  %v585_v11 = vsub.f32 %v6151_v59, %v576_v41  ;;  %v7657_v47 = vld [vmem:[#allocation25_spill] sm:$0xff]  ;;  %vm3976_vm10 = vcmask 130048  }
 0x22b   : > { %v554_v28 = vsel %vm552_vm13, %v553_v32, %v551_v48  ;;  %v582_v34 = vsub.f32 %v6151_v59, %v573_v25  ;;  %v565_v55 = vsel %vm564_vm14, %v7654_v27, %v563_v50  ;;  %v1954_v50 = vld [vmem:[#allocation6 + $0x48] sm:$0xff]  ;;  %vm3978_vm11 = vcmask 261120  }
 0x22c   : > { %2032 = vmatmul.mubr.f32.gmra.mrb[2].mxu0 %v1946_v15  ;;  %v575_v9 = vmul.f32 %v6147_v31, %v554_v28  ;;  %4751 = vrcp.f32 %v613_v58  ;;  %v4259_v7 = vmul.f32 -1.442695, %v585_v11  ;;  %v568_v0 = vsel %vm566_vm15, %v567_v10, %v565_v55 }
 0x22d   : > { %2037 = vmatprep.mubr.f32.mxu0 %v7655_v38  ;;  %4753 = vpow2.f32 %v4257_v23  ;;  %v4256_v24 = vmul.f32 -1.442695, %v582_v34  ;;  %v6359_v35 = vmul.f32 %v6147_v31, %v568_v0  ;;  %vm3980_vm12 = vcmask 392192  }
 0x22e   : > { %v584_v36 = vsub.f32 %v6151_v59, %v575_v9  ;;  %4755 = vpow2.f32 %v4259_v7  ;;  %vm3982_vm13 = vcmask 523264   ;;  %vm3984_vm14 = vcmask 654336  }
 0x22f   : > { %v6361_v33 = vpop.eup %4747  ;;  %4757 = vpow2.f32 %v4256_v24  ;;  %v586_v62 = vsub.f32 %v6151_v59, %v6359_v35  ;;  %v1955_v24 = vld [vmem:[#allocation6 + $0x50] sm:$0xff]  ;;  %v1960_v59 = vld [vmem:[#allocation6 + $0x78] sm:$0xff]  ;;  %vm3986_vm15 = vcmask 785408  }
 0x230   : > { %2038 = vmatmul.mubr.f32.gmra.mrb[4].mxu0 %v1947_v43  ;;  %v4258_v17 = vmul.f32 -1.442695, %v584_v36  ;;  %v646_v61 = vrot.slane %v6361_v33, %v7656_v30  ;;  %v650_v31 = vrot.slane %v6361_v33, %v7657_v47 }
 0x231   : > { %2043 = vmatprep.mubr.f32.mxu0 %v7655_v38 }
 0x232   : > { %4759 = vpow2.f32 %v4258_v17  ;;  %v724_v13 = vsel %vm723_vm0, %v646_v61, 0.0  ;;  %v725_v27 = vsel %vm723_vm0, %v650_v31, 0.0  ;;  %v1957_v61 = vld [vmem:[#allocation6 + $0x60] sm:$0xff]  ;;  %v4260_v31 = vmul.f32 -1.442695, %v586_v62 }
 0x233   : > { %v6370_v56 = vpop.eup %4749  ;;  %v726_v44 = vadd.f32 %v725_v27, %v724_v13  ;;  %v1958_v13 = vld [vmem:[#allocation6 + $0x68] sm:$0xff]  ;;  %v1959_v27 = vld [vmem:[#allocation6 + $0x70] sm:$0xff]  ;;  %v6444_v62 = vld [vmem:[%s7449_s1] sm:$0xff] }
 0x234   : > { %2044 = vmatmul.mubr.f32.gmra.mrb[6].mxu0 %v1948_v2  ;;  %v654_v21 = vrot.slane %v6370_v56, %v7656_v30  ;;  %v658_v54 = vrot.slane %v6370_v56, %v7657_v47  ;;  %v1956_v2 = vld [vmem:[#allocation6 + $0x58] sm:$0xff] }
 0x235   : > { %2049 = vmatprep.mubr.f32.mxu0 %v7655_v38  ;;  %727 = vadd.xlane.f32.xlu1 %v726_v44  ;;  %v6437_v44 = vld [vmem:[%s7449_s1 + $0x8] sm:$0xff] }
 0x236   : > { %v729_v40 = vsel %vm723_vm0, %v654_v21, 0.0  ;;  %v730_v20 = vsel %vm723_vm0, %v658_v54, 0.0  ;;  %v6381_v29 = vpop.eup %4751 }
 0x237   : > { %v731_v26 = vadd.f32 %v730_v20, %v729_v40  ;;  %v4754_v51 = vpop.eup %4753  ;;  %v662_v63 = vrot.slane %v6381_v29, %v7656_v30  ;;  %v666_v57 = vrot.slane %v6381_v29, %v7657_v47 }
 0x238   : > { %2050 = vmatmul.mubr.f32.gmra.mrb[8].mxu0 %v1949_v60  ;;  %v4756_v53 = vpop.eup %4755  ;;  %v615_v49 = vadd.f32 1.0, %v4754_v51 }
 0x239   : > { %2055 = vmatprep.mubr.f32.mxu0 %v7655_v38  ;;  %v4758_v14 = vpop.eup %4757  ;;  %732 = vadd.xlane.f32.xlu1 %v731_v26  ;;  %v734_v6 = vsel %vm723_vm0, %v662_v63, 0.0  ;;  %v735_v16 = vsel %vm723_vm0, %v666_v57, 0.0  ;;  %v617_v18 = vadd.f32 1.0, %v4756_v53  ;;  %v5044_v63 = vmov 6  }
 0x23a   : > { %v736_v42 = vadd.f32 %v735_v16, %v734_v6  ;;  %4761 = vrcp.f32 %v615_v49  ;;  %v614_v12 = vadd.f32 1.0, %v4758_v14 }
 0x23b   : > { %4763 = vrcp.f32 %v617_v18 }
 0x23c   : > { %v4760_v32 = vpop.eup %4759  ;;  %2056 = vmatmul.mubr.f32.gmra.mrb[10].mxu0 %v1950_v8  ;;  %4765 = vrcp.f32 %v614_v12 }
 0x23d   : > { %2061 = vmatprep.mubr.f32.mxu0 %v7655_v38  ;;  %v616_v52 = vadd.f32 1.0, %v4760_v32  ;;  %737 = vadd.xlane.f32.xlu1 %v736_v42 }
 0x23f   : > { %4767 = vrcp.f32 %v616_v52 }
 0x240   : > { %2062 = vmatmul.mubr.f32.gmra.mrb[12].mxu0 %v1951_v45  ;;  %4769 = vpow2.f32 %v4260_v31 }
 0x241   : > { %2067 = vmatprep.mubr.f32.mxu0 %v7655_v38 }
 0x244   : > { %2068 = vmatmul.mubr.f32.gmra.mrb[14].mxu0 %v1952_v5  ;;  %v6392_v39 = vpop.eup %4761 }
 0x245   : > { %2073 = vmatprep.mubr.f32.mxu0 %v7655_v38  ;;  %v6395_v37 = vpop.eup %4763  ;;  %v678_v4 = vrot.slane %v6392_v39, %v7656_v30  ;;  %v682_v22 = vrot.slane %v6392_v39, %v7657_v47 }
 0x246   : > { %v6401_v10 = vpop.eup %4765  ;;  %v694_v15 = vrot.slane %v6395_v37, %v7656_v30  ;;  %v698_v46 = vrot.slane %v6395_v37, %v7657_v47 }
 0x247   : > { %v744_v41 = vsel %vm723_vm0, %v678_v4, 0.0  ;;  %v745_v19 = vsel %vm723_vm0, %v682_v22, 0.0  ;;  %v670_v1 = vrot.slane %v6401_v10, %v7656_v30  ;;  %v674_v25 = vrot.slane %v6401_v10, %v7657_v47 }
 0x248   : > { %2074 = vmatmul.mubr.f32.gmra.mrb[16].mxu0 %v1953_v3  ;;  %v746_v58 = vadd.f32 %v745_v19, %v744_v41  ;;  %v754_v23 = vsel %vm723_vm0, %v694_v15, 0.0  ;;  %v755_v11 = vsel %vm723_vm0, %v698_v46, 0.0 }
 0x249   : > { %v6413_v48 = vpop.eup %4767  ;;  %2079 = vmatprep.mubr.f32.mxu0 %v7655_v38  ;;  %v739_v28 = vsel %vm723_vm0, %v670_v1, 0.0  ;;  %v740_v34 = vsel %vm723_vm0, %v674_v25, 0.0  ;;  %v756_v55 = vadd.f32 %v755_v11, %v754_v23 }
 0x24a   : > { %v686_v9 = vrot.slane %v6413_v48, %v7656_v30  ;;  %747 = vadd.xlane.f32.xlu1 %v746_v58  ;;  %v741_v43 = vadd.f32 %v740_v34, %v739_v28  ;;  %v690_v7 = vrot.slane %v6413_v48, %v7657_v47  ;;  %v4770_v35 = vpop.eup %4769 }
 0x24b   : > { %v618_v21 = vadd.f32 1.0, %v4770_v35 }
 0x24c   : > { %2080 = vmatmul.mubr.f32.gmra.mrb[18].mxu0 %v1954_v50  ;;  %v749_v0 = vsel %vm723_vm0, %v686_v9, 0.0  ;;  %742 = vadd.xlane.f32.xlu0 %v741_v43  ;;  %v750_v36 = vsel %vm723_vm0, %v690_v7, 0.0 }
 0x24d   : > { %2085 = vmatprep.mubr.f32.mxu0 %v7655_v38  ;;  %v751_v17 = vadd.f32 %v750_v36, %v749_v0  ;;  %4771 = vrcp.f32 %v618_v21 }
 0x24e   : > { %757 = vadd.xlane.f32.xlu1 %v756_v55 }
 0x250   : > { %2086 = vmatmul.mubr.f32.gmra.mrb[20].mxu0 %v1955_v24  ;;  %752 = vadd.xlane.f32.xlu0 %v751_v17 }
 0x251   : > { %2091 = vmatprep.mubr.f32.mxu0 %v7655_v38 }
 0x254   : > { %2092 = vmatmul.mubr.f32.gmra.mrb[22].mxu0 %v1956_v2 }
 0x255   : > { %2097 = vmatprep.mubr.f32.mxu0 %v7655_v38 }
 0x257   : > { %v6447_v54 = vpop.eup %4771 }
 0x258   : > { %2098 = vmatmul.mubr.f32.gmra.mrb[24].mxu0 %v1957_v61  ;;  %v702_v60 = vrot.slane %v6447_v54, %v7656_v30  ;;  %v706_v40 = vrot.slane %v6447_v54, %v7657_v47 }
 0x259   : > { %2103 = vmatprep.mubr.f32.mxu0 %v7655_v38 }
 0x25a   : > { %v759_v20 = vsel %vm723_vm0, %v702_v60, 0.0  ;;  %v760_v26 = vsel %vm723_vm0, %v706_v40, 0.0  ;;  %vm3988_vm0 = vcmask 916480  }
 0x25b   : > { %v761_v51 = vadd.f32 %v760_v26, %v759_v20 }
 0x25c   : > { %2104 = vmatmul.mubr.f32.gmra.mrb[26].mxu0 %v1958_v13 }
 0x25d   : > { %2109 = vmatprep.mubr.f32.mxu0 %v7655_v38 }
 0x25f   : > { %2367 = vperm.xlu1 %4688, %v6437_v44  }
 0x260   : > { %2110 = vmatmul.mubr.f32.gmra.mrb[28].mxu0 %v1959_v27 }
 0x261   : > { %2115 = vmatprep.mubr.f32.mxu0 %v7655_v38 }
 0x263   : > { %4689 = vset.pattern.permute.xlu1 %v5044_v63 }
 0x264   : > { %2116 = vmatmul.mubr.f32.gmra.mrb[30].mxu0 %v1960_v59 }
 0x266   : > { %2363 = vperm.xlu0 %4687, %v6444_v62  }
 0x26a   : > { %4690 = vset.pattern.permute.xlu0 %v5044_v63 }
 0x283   : > { %762 = vadd.xlane.f32.xlu1 %v761_v51 }
 0x2fb   : > { %v6455_v57 = vpop.f32.mrb[0].mxu0 }
 0x2fc   : > { %v6457_v53 = vpop.f32.mrb[1].mxu0  ;;  %v2186_v8 = vmul.f32 %v6455_v57, %v6455_v57 }
 0x2fd   : > { %v2122_v49 = vadd.f32 %v6457_v53, %v6455_v57  ;;  %v2187_v14 = vmul.f32 %v6457_v53, %v6457_v53 }
 0x2ff   : > { %v6465_v6 = vpop.f32.mrb[2].mxu0  ;;  %2123 = vadd.xlane.f32.xlu1 %v2122_v49  ;;  %v2218_v16 = vadd.f32 %v2187_v14, %v2186_v8 }
 0x300   : > { %v6467_v18 = vpop.f32.mrb[3].mxu0  ;;  %v2188_v42 = vmul.f32 %v6465_v6, %v6465_v6 }
 0x301   : > { %v2125_v12 = vadd.f32 %v6467_v18, %v6465_v6  ;;  %v2189_v32 = vmul.f32 %v6467_v18, %v6467_v18 }
 0x303   : > { %2126 = vadd.xlane.f32.xlu0 %v2125_v12  ;;  %2219 = vadd.xlane.f32.xlu1 %v2218_v16  ;;  %v6475_v45 = vpop.f32.mrb[4].mxu0  ;;  %v2221_v52 = vadd.f32 %v2189_v32, %v2188_v42 }
 0x304   : > { %v6477_v5 = vpop.f32.mrb[5].mxu0  ;;  %v2190_v3 = vmul.f32 %v6475_v45, %v6475_v45 }
 0x305   : > { %v2128_v4 = vadd.f32 %v6477_v5, %v6475_v45  ;;  %v2191_v22 = vmul.f32 %v6477_v5, %v6477_v5 }
 0x307   : > { %2222 = vadd.xlane.f32.xlu1 %v2221_v52  ;;  %v6485_v15 = vpop.f32.mrb[6].mxu0  ;;  %v2224_v46 = vadd.f32 %v2191_v22, %v2190_v3 }
 0x308   : > { %v6487_v41 = vpop.f32.mrb[7].mxu0  ;;  %v2192_v19 = vmul.f32 %v6485_v15, %v6485_v15 }
 0x309   : > { %v2131_v1 = vadd.f32 %v6487_v41, %v6485_v15  ;;  %v2193_v25 = vmul.f32 %v6487_v41, %v6487_v41 }
 0x30b   : > { %v6495_v50 = vpop.f32.mrb[8].mxu0  ;;  %2129 = vadd.xlane.f32.xlu1 %v2128_v4  ;;  %v2227_v58 = vadd.f32 %v2193_v25, %v2192_v19 }
 0x30c   : > { %v6497_v23 = vpop.f32.mrb[9].mxu0  ;;  %v2194_v11 = vmul.f32 %v6495_v50, %v6495_v50 }
 0x30d   : > { %v2134_v28 = vadd.f32 %v6497_v23, %v6495_v50  ;;  %v2195_v34 = vmul.f32 %v6497_v23, %v6497_v23 }
 0x30f   : > { %2135 = vadd.xlane.f32.xlu0 %v2134_v28  ;;  %2225 = vadd.xlane.f32.xlu1 %v2224_v46  ;;  %v2230_v9 = vadd.f32 %v2195_v34, %v2194_v11  ;;  %v6505_v55 = vpop.f32.mrb[10].mxu0 }
 0x310   : > { %v6507_v43 = vpop.f32.mrb[11].mxu0  ;;  %v2196_v7 = vmul.f32 %v6505_v55, %v6505_v55 }
 0x311   : > { %v2137_v0 = vadd.f32 %v6507_v43, %v6505_v55  ;;  %v2197_v24 = vmul.f32 %v6507_v43, %v6507_v43 }
 0x313   : > { %2231 = vadd.xlane.f32.xlu0 %v2230_v9  ;;  %2132 = vadd.xlane.f32.xlu1 %v2131_v1  ;;  %v6515_v36 = vpop.f32.mrb[12].mxu0  ;;  %v2233_v17 = vadd.f32 %v2197_v24, %v2196_v7 }
 0x314   : > { %v6517_v2 = vpop.f32.mrb[13].mxu0  ;;  %v2198_v61 = vmul.f32 %v6515_v36, %v6515_v36 }
 0x315   : > { %v2140_v31 = vadd.f32 %v6517_v2, %v6515_v36  ;;  %v2199_v13 = vmul.f32 %v6517_v2, %v6517_v2 }
 0x317   : > { %v6525_v27 = vpop.f32.mrb[14].mxu0  ;;  %2228 = vadd.xlane.f32.xlu1 %v2227_v58  ;;  %v2236_v59 = vadd.f32 %v2199_v13, %v2198_v61 }
 0x318   : > { %v6527_v35 = vpop.f32.mrb[15].mxu0  ;;  %v2200_v21 = vmul.f32 %v6525_v27, %v6525_v27 }
 0x319   : > { %v2143_v60 = vadd.f32 %v6527_v35, %v6525_v27  ;;  %v2201_v40 = vmul.f32 %v6527_v35, %v6527_v35 }
 0x31b   : > { %2144 = vadd.xlane.f32.xlu0 %v2143_v60  ;;  %2138 = vadd.xlane.f32.xlu1 %v2137_v0  ;;  %v2239_v20 = vadd.f32 %v2201_v40, %v2200_v21  ;;  %v6535_v26 = vpop.f32.mrb[16].mxu0 }
 0x31c   : > { %v6537_v51 = vpop.f32.mrb[17].mxu0  ;;  %v2202_v63 = vmul.f32 %v6535_v26, %v6535_v26 }
 0x31d   : > { %v2146_v8 = vadd.f32 %v6537_v51, %v6535_v26  ;;  %v2203_v49 = vmul.f32 %v6537_v51, %v6537_v51 }
 0x31f   : > { %2240 = vadd.xlane.f32.xlu0 %v2239_v20  ;;  %2234 = vadd.xlane.f32.xlu1 %v2233_v17  ;;  %v6545_v14 = vpop.f32.mrb[18].mxu0  ;;  %v2242_v16 = vadd.f32 %v2203_v49, %v2202_v63 }
 0x320   : > { %v6547_v42 = vpop.f32.mrb[19].mxu0  ;;  %v2204_v12 = vmul.f32 %v6545_v14, %v6545_v14 }
 0x321   : > { %v2149_v32 = vadd.f32 %v6547_v42, %v6545_v14  ;;  %v2205_v52 = vmul.f32 %v6547_v42, %v6547_v42 }
 0x323   : > { %2147 = vadd.xlane.f32.xlu0 %v2146_v8  ;;  %2141 = vadd.xlane.f32.xlu1 %v2140_v31  ;;  %v6555_v3 = vpop.f32.mrb[20].mxu0  ;;  %v2245_v4 = vadd.f32 %v2205_v52, %v2204_v12 }
 0x324   : > { %7658 = vst [vmem:[#allocation32_spill] sm:$0xff] %v6555_v3  ;;  %v6557_v22 = vpop.f32.mrb[21].mxu0  ;;  %v2206_v46 = vmul.f32 %v6555_v3, %v6555_v3 }
 0x325   : > { %7659 = vst [vmem:[#allocation33_spill] sm:$0xff] %v6557_v22  ;;  %v2152_v19 = vadd.f32 %v6557_v22, %v6555_v3  ;;  %v2207_v1 = vmul.f32 %v6557_v22, %v6557_v22 }
 0x327   : > { %2243 = vadd.xlane.f32.xlu0 %v2242_v16  ;;  %v6565_v25 = vpop.f32.mrb[22].mxu0  ;;  %2237 = vadd.xlane.f32.xlu1 %v2236_v59  ;;  %v2248_v58 = vadd.f32 %v2207_v1, %v2206_v46 }
 0x328   : > { %v6567_v11 = vpop.f32.mrb[23].mxu0  ;;  %v2208_v28 = vmul.f32 %v6565_v25, %v6565_v25 }
 0x329   : > { %v2155_v34 = vadd.f32 %v6567_v11, %v6565_v25  ;;  %v2209_v9 = vmul.f32 %v6567_v11, %v6567_v11 }
 0x32b   : > { %2156 = vadd.xlane.f32.xlu0 %v2155_v34  ;;  %2150 = vadd.xlane.f32.xlu1 %v2149_v32  ;;  %v2251_v7 = vadd.f32 %v2209_v9, %v2208_v28  ;;  %v6575_v0 = vpop.f32.mrb[24].mxu0  ;;  %v728_v9 = vpop.xlane.xlu1 %727 }
 0x32c   : > { %v6577_v24 = vpop.f32.mrb[25].mxu0  ;;  %v2210_v17 = vmul.f32 %v6575_v0, %v6575_v0  ;;  %vm764_vm1 = vcmp.eq.f32.partialorder %v728_v9, 0.0 }
 0x32d   : > { %7660 = vst [vmem:[#allocation34_spill] sm:$0xff] %v6577_v24  ;;  %v2158_v61 = vadd.f32 %v6577_v24, %v6575_v0  ;;  %v2211_v31 = vmul.f32 %v6577_v24, %v6577_v24 }
 0x32f   : > { %2252 = vadd.xlane.f32.xlu0 %v2251_v7  ;;  %2246 = vadd.xlane.f32.xlu1 %v2245_v4  ;;  %v6585_v13 = vpop.f32.mrb[26].mxu0  ;;  %v2254_v59 = vadd.f32 %v2211_v31, %v2210_v17  ;;  %v733_v7 = vpop.xlane.xlu1 %732 }
 0x330   : > { %7661 = vst [vmem:[#allocation35_spill] sm:$0xff] %v6585_v13  ;;  %v6587_v21 = vpop.f32.mrb[27].mxu0  ;;  %v2212_v60 = vmul.f32 %v6585_v13, %v6585_v13  ;;  %vm765_vm2 = vcmp.eq.f32.partialorder %v733_v7, 0.0  ;;  %v743_v31 = vpop.xlane.xlu0 %742 }
 0x331   : > { %7662 = vst [vmem:[#allocation36_spill] sm:$0xff] %v6587_v21  ;;  %v2161_v40 = vadd.f32 %v6587_v21, %v6585_v13  ;;  %v2213_v20 = vmul.f32 %v6587_v21, %v6587_v21  ;;  %vm767_vm3 = vcmp.eq.f32.partialorder %v743_v31, 0.0  ;;  %v5045_v21 = vmov 839922192  }
 0x332   : > { %v829_v13 = vunpack.c.l.s4 %v5045_v21 }
 0x333   : > { %2159 = vadd.xlane.f32.xlu0 %v2158_v61  ;;  %2153 = vadd.xlane.f32.xlu1 %v2152_v19  ;;  %v6595_v63 = vpop.f32.mrb[28].mxu0  ;;  %v2257_v8 = vadd.f32 %v2213_v20, %v2212_v60  ;;  %v738_v17 = vpop.xlane.xlu1 %737 }
 0x334   : > { %7663 = vst [vmem:[#allocation39_spill] sm:$0xff] %v6595_v63  ;;  %v6597_v49 = vpop.f32.mrb[29].mxu0  ;;  %v2214_v16 = vmul.f32 %v6595_v63, %v6595_v63  ;;  %vm766_vm4 = vcmp.eq.f32.partialorder %v738_v17, 0.0 }
 0x335   : > { %7664 = vst [vmem:[#allocation40_spill] sm:$0xff] %v6597_v49  ;;  %v2164_v12 = vadd.f32 %v6597_v49, %v6595_v63  ;;  %v2215_v32 = vmul.f32 %v6597_v49, %v6597_v49 }
 0x337   : > { %2255 = vadd.xlane.f32.xlu0 %v2254_v59  ;;  %2249 = vadd.xlane.f32.xlu1 %v2248_v58  ;;  %v6605_v52 = vpop.f32.mrb[30].mxu0  ;;  %v2260_v4 = vadd.f32 %v2215_v32, %v2214_v16  ;;  %v7667_v58 = vmov 0   ;;  %v748_v61 = vpop.xlane.xlu1 %747  ;;  %v4261_v59 = vsel %vm764_vm1, 1.0, %v7655_v38  ;;  %v4263_v16 = vsel %vm766_vm4, 1.0, %v7655_v38 }
 0x338   : > { %7665 = vst [vmem:[#allocation41_spill] sm:$0xff] %v6605_v52  ;;  %v6607_v46 = vpop.f32.mrb[31].mxu0  ;;  %v2216_v19 = vmul.f32 %v6605_v52, %v6605_v52  ;;  %vm768_vm5 = vcmp.eq.f32.partialorder %v748_v61, 0.0 }
 0x339   : > { %7666 = vst [vmem:[#allocation42_spill] sm:$0xff] %v6607_v46  ;;  %v2167_v1 = vadd.f32 %v6607_v46, %v6605_v52  ;;  %v2217_v28 = vmul.f32 %v6607_v46, %v6607_v46 }
 0x33b   : > { %2165 = vadd.xlane.f32.xlu0 %v2164_v12  ;;  %2162 = vadd.xlane.f32.xlu1 %v2161_v40  ;;  %v2263_v34 = vadd.f32 %v2217_v28, %v2216_v19  ;;  %v758_v60 = vpop.xlane.xlu1 %757  ;;  %v4262_v40 = vsel %vm765_vm2, 1.0, %v7655_v38  ;;  %v790_v28 = vadd.f32 %v4263_v16, %v738_v17 }
 0x33c   : > { %v789_v20 = vadd.f32 %v4262_v40, %v733_v7  ;;  %vm770_vm6 = vcmp.eq.f32.partialorder %v758_v60, 0.0 }
 0x33d   : > { %v798_v46 = vadd.f32 1e-06, %v790_v28 }
 0x33e   : > { %v797_v19 = vadd.f32 1e-06, %v789_v20 }
 0x33f   : > { %2258 = vadd.xlane.f32.xlu1 %v2257_v8  ;;  %v753_v8 = vpop.xlane.xlu0 %752  ;;  %v6623_v12 = vpop.permute.xlu1 %2367 }
 0x340   : > { %vm769_vm7 = vcmp.eq.f32.partialorder %v753_v8, 0.0 }
 0x341   : > { %v4266_v7 = vsel %vm769_vm7, 1.0, %v7655_v38 }
 0x343   : > { %2261 = vadd.xlane.f32.xlu1 %v2260_v4  ;;  %v4265_v4 = vsel %vm768_vm5, 1.0, %v7655_v38 }
 0x347   : > { %2168 = vadd.xlane.f32.xlu1 %v2167_v1 }
 0x34b   : > { %2264 = vadd.xlane.f32.xlu1 %v2263_v34  ;;  %v4267_v34 = vsel %vm770_vm6, 1.0, %v7655_v38 }
 0x351   : > { %2471 = vperm.xlu0 %4690, %v6437_v44   ;;  %v788_v44 = vadd.f32 %v4261_v59, %v728_v9  ;;  %v763_v9 = vpop.xlane.xlu1 %762  ;;  %v794_v59 = vadd.f32 %v4267_v34, %v758_v60 }
 0x352   : > { %vm771_vm8 = vcmp.eq.f32.partialorder %v763_v9, 0.0 }
 0x353   : > { %v796_v32 = vadd.f32 1e-06, %v788_v44  ;;  %v793_v44 = vadd.f32 %v4266_v7, %v753_v8  ;;  %v802_v20 = vadd.f32 1e-06, %v794_v59  ;;  %v4268_v17 = vsel %vm771_vm8, 1.0, %v7655_v38  ;;  %v6634_v7 = vpop.permute.xlu0 %2363 }
 0x355   : > { %4691 = vset.pattern.permute.xlu0 %v7667_v58  ;;  %4773 = vrcp.f32 %v796_v32 }
 0x356   : > { %4775 = vrcp.f32 %v797_v19  ;;  %v7668_v19 = vld [vmem:[#allocation23_spill] sm:$0xff] }
 0x35c   : > { %2467 = vperm.xlu1 %4689, %v6444_v62   ;;  %v4264_v62 = vsel %vm767_vm3, 1.0, %v7655_v38 }
 0x35d   : > { %v791_v1 = vadd.f32 %v4264_v62, %v743_v31  ;;  %v795_v31 = vadd.f32 %v4268_v17, %v763_v9  ;;  %v830_v62 = vunpack.c.0.s8 %v829_v13 }
 0x35f   : > { %v799_v40 = vadd.f32 1e-06, %v791_v1  ;;  %v4774_v16 = vpop.eup %4773  ;;  %v6630_v1 = vsub.s32 %v830_v62, %v7668_v19 }
 0x360   : > { %4692 = vset.pattern.permute.xlu1 %v7667_v58  ;;  %v792_v58 = vadd.f32 %v4265_v4, %v748_v61  ;;  %v801_v61 = vadd.f32 1e-06, %v793_v44  ;;  %v4776_v60 = vpop.eup %4775  ;;  %v803_v4 = vadd.f32 1e-06, %v795_v31  ;;  %v805_v8 = vmul.f32 256.0, %v4774_v16 }
 0x361   : > { %4777 = vrcp.f32 %v799_v40  ;;  %v807_v21 = vmul.f32 256.0, %v4776_v60 }
 0x362   : > { %v800_v52 = vadd.f32 1e-06, %v792_v58  ;;  %4779 = vrcp.f32 %v798_v46 }
 0x363   : > { %v841_v13 = vrot.slane %v807_v21, %v6630_v1 }
 0x364   : > { %4781 = vrcp.f32 %v800_v52  ;;  %v834_v52 = vrot.slane %v805_v8, %v6630_v1 }
 0x365   : > { %4783 = vrcp.f32 %v802_v20  ;;  %v6640_v31 = vmul.f32 %v6370_v56, %v841_v13 }
 0x366   : > { %4785 = vrcp.f32 %v801_v61  ;;  %v6637_v61 = vmul.f32 %v6361_v33, %v834_v52 }
 0x367   : > { %4787 = vrcp.f32 %v803_v4  ;;  %v2557_v13 = vrot.slane %v6640_v31, %v7656_v30 }
 0x36b   : > { %v4778_v34 = vpop.eup %4777 }
 0x36c   : > { %v4780_v58 = vpop.eup %4779  ;;  %v811_v9 = vmul.f32 256.0, %v4778_v34 }
 0x36d   : > { %v809_v44 = vmul.f32 256.0, %v4780_v58  ;;  %v2561_v58 = vrot.slane %v6640_v31, %v7657_v47 }
 0x36e   : > { %v4782_v46 = vpop.eup %4781  ;;  %v855_v16 = vrot.slane %v811_v9, %v6630_v1 }
 0x36f   : > { %v4784_v40 = vpop.eup %4783  ;;  %v813_v20 = vmul.f32 256.0, %v4782_v46  ;;  %v848_v21 = vrot.slane %v809_v44, %v6630_v1 }
 0x370   : > { %v4786_v17 = vpop.eup %4785  ;;  %v817_v62 = vmul.f32 256.0, %v4784_v40  ;;  %v895_v40 = vmul.f32 %v6401_v10, %v855_v16 }
 0x371   : > { %v862_v34 = vrot.slane %v813_v20, %v6630_v1  ;;  %v815_v19 = vmul.f32 256.0, %v4786_v17  ;;  %v4788_v52 = vpop.eup %4787 }
 0x372   : > { %v876_v9 = vrot.slane %v817_v62, %v6630_v1  ;;  %v894_v62 = vmul.f32 %v6381_v29, %v848_v21 }
 0x373   : > { %v6669_v10 = vmul.f32 %v6392_v39, %v862_v34  ;;  %v869_v16 = vrot.slane %v815_v19, %v6630_v1 }
 0x374   : > { %v2565_v3 = vrot.slane %v894_v62, %v7656_v30 }
 0x38c   : > { %v2124_v32 = vpop.xlane.xlu1 %2123 }
 0x390   : > { %v2220_v28 = vpop.xlane.xlu1 %2219  ;;  %v2127_v60 = vpop.xlane.xlu0 %2126 }
 0x391   : > { %v6655_v44 = vmul.f32 0.00390625, %v2127_v60  ;;  %v819_v60 = vmul.f32 256.0, %v4788_v52 }
 0x393   : > { %v2283_v31 = vmul.f32 %v6655_v44, %v6655_v44  ;;  %v883_v49 = vrot.slane %v819_v60, %v6630_v1 }
 0x394   : > { %v2223_v59 = vpop.xlane.xlu1 %2222 }
 0x395   : > { %v2267_v29 = vmul.f32 0.00390625, %v2223_v59  ;;  %v897_v59 = vmul.f32 %v6413_v48, %v869_v16 }
 0x398   : > { %v2130_v4 = vpop.xlane.xlu1 %2129 }
 0x399   : > { %v2172_v8 = vmul.f32 0.00390625, %v2130_v4  ;;  %v6657_v4 = vmul.f32 0.00390625, %v2124_v32  ;;  %v2266_v32 = vmul.f32 0.00390625, %v2220_v28 }
 0x39b   : > { %v2334_v56 = vsub.f32 %v6475_v45, %v2172_v8  ;;  %v2335_v46 = vsub.f32 %v6477_v5, %v2172_v8  ;;  %v2282_v19 = vmul.f32 %v6657_v4, %v6657_v4  ;;  %v2284_v22 = vmul.f32 %v2172_v8, %v2172_v8 }
 0x39c   : > { %v2136_v20 = vpop.xlane.xlu0 %2135  ;;  %v2226_v17 = vpop.xlane.xlu1 %2225 }
 0x39d   : > { %v6660_v33 = vmul.f32 %v6634_v7, %v2334_v56  ;;  %v6663_v45 = vmul.f32 %v6634_v7, %v2335_v46  ;;  %v2174_v5 = vmul.f32 0.00390625, %v2136_v20  ;;  %v6675_v46 = vmul.f32 %v6395_v37, %v876_v9 }
 0x39e   : > { %v2573_v20 = vrot.slane %v895_v40, %v7656_v30  ;;  %v2577_v37 = vrot.slane %v895_v40, %v7657_v47  ;;  %v2298_v63 = vsub.f32 %v2266_v32, %v2282_v19  ;;  %v2585_v40 = vrot.slane %v6669_v10, %v7657_v47 }
 0x39f   : > { %v2338_v38 = vsub.f32 %v6495_v50, %v2174_v5  ;;  %v2339_v56 = vsub.f32 %v6497_v23, %v2174_v5  ;;  %v2268_v23 = vmul.f32 0.00390625, %v2226_v17  ;;  %v2286_v34 = vmul.f32 %v2174_v5, %v2174_v5 }
 0x3a0   : > { %v2232_v21 = vpop.xlane.xlu0 %2231  ;;  %v2133_v39 = vpop.xlane.xlu1 %2132  ;;  %v2299_v17 = vsub.f32 %v2267_v29, %v2283_v31  ;;  %v2597_v5 = vrot.slane %v6675_v46, %v7656_v30  ;;  %v2601_v1 = vrot.slane %v6675_v46, %v7657_v47  ;;  %v6704_v8 = vrot.slane %v2573_v20, %v7656_v30 }
 0x3a1   : > { %v6683_v28 = vmul.f32 %v6634_v7, %v2338_v38  ;;  %v6686_v50 = vmul.f32 %v6634_v7, %v2339_v56  ;;  %v2270_v52 = vmul.f32 0.00390625, %v2232_v21  ;;  %v6689_v9 = vmul.f32 0.00390625, %v2133_v39 }
 0x3a2   : > { %v2569_v38 = vrot.slane %v894_v62, %v7657_v47  ;;  %v2581_v56 = vrot.slane %v6669_v10, %v7656_v30  ;;  %v2300_v48 = vsub.f32 %v2268_v23, %v2284_v22  ;;  %7669 = vst [vmem:[#allocation37_spill] sm:$0xff] %v6704_v8  ;;  %v6709_v32 = vrot.slane %v2577_v37, %v7656_v30 }
 0x3a3   : > { %v2302_v62 = vsub.f32 %v2270_v52, %v2286_v34  ;;  %v2285_v60 = vmul.f32 %v6689_v9, %v6689_v9  ;;  %v2589_v10 = vrot.slane %v897_v59, %v7656_v30  ;;  %v6713_v31 = vmul.f32 %v6447_v54, %v883_v49 }
 0x3a4   : > { %v2229_v24 = vpop.xlane.xlu1 %2228  ;;  %7670 = vst [vmem:[#allocation38_spill] sm:$0xff] %v6709_v32  ;;  %v2314_v22 = vmax.f32 %v2298_v63, 0.0  ;;  %v2315_v29 = vmax.f32 %v2299_v17, 0.0  ;;  %v7671_v39 = vrot.slane %v6637_v61, %v7656_v30  ;;  %v2316_v23 = vmax.f32 %v2300_v48, 0.0 }
 0x3a5   : > { %v2269_v16 = vmul.f32 0.00390625, %v2229_v24  ;;  %v2593_v24 = vrot.slane %v897_v59, %v7657_v47  ;;  %v7672_v37 = vrot.slane %v6637_v61, %v7657_v47  ;;  %v6729_v63 = vrot.slane %v2557_v13, %v7656_v30 }
 0x3a6   : > { %v6720_v19 = vrot.slane %v7671_v39, %v7656_v30  ;;  %v6732_v49 = vrot.slane %v2561_v58, %v7656_v30  ;;  %v2318_v34 = vmax.f32 %v2302_v62, 0.0  ;;  %v6739_v17 = vrot.slane %v2565_v3, %v7656_v30 }
 0x3a7   : > { %v2301_v46 = vsub.f32 %v2269_v16, %v2285_v60  ;;  %v6726_v54 = vrot.slane %v7672_v37, %v7656_v30  ;;  %v2605_v48 = vrot.slane %v6713_v31, %v7656_v30  ;;  %v2402_v61 = vadd.f32 1e-05, %v2314_v22 }
 0x3a8   : > { %v2145_v21 = vpop.xlane.xlu0 %2144  ;;  %v2139_v20 = vpop.xlane.xlu1 %2138  ;;  %7673 = vst [vmem:[#allocation43_spill] sm:$0xff] %v6732_v49  ;;  %7674 = vst [vmem:[#allocation44_spill] sm:$0xff] %v6739_v17  ;;  %v6744_v16 = vrot.slane %v2569_v38, %v7656_v30  ;;  %v6747_v13 = vrot.slane %v2581_v56, %v7656_v30  ;;  %v2403_v58 = vadd.f32 1e-05, %v2315_v29  ;;  %v6752_v3 = vrot.slane %v2585_v40, %v7656_v30 }
 0x3a9   : > { %v6734_v52 = vmul.f32 0.00390625, %v2145_v21  ;;  %v6736_v59 = vmul.f32 0.00390625, %v2139_v20  ;;  %v2317_v60 = vmax.f32 %v2301_v46, 0.0  ;;  %v2609_v39 = vrot.slane %v6713_v31, %v7657_v47 }
 0x3aa   : > { %7675 = vst [vmem:[#allocation45_spill] sm:$0xff] %v6744_v16  ;;  %7676 = vst [vmem:[#allocation27_spill] sm:$0xff] %v6747_v13  ;;  %v2404_v22 = vadd.f32 1e-05, %v2316_v23  ;;  %v6757_v38 = vrot.slane %v2597_v5, %v7656_v30  ;;  %v6760_v56 = vrot.slane %v2601_v1, %v7656_v30  ;;  %v2406_v29 = vadd.f32 1e-05, %v2318_v34 }
 0x3ab   : > { %v2289_v62 = vmul.f32 %v6734_v52, %v6734_v52  ;;  %7677 = vst [vmem:[#allocation28_spill] sm:$0xff] %v6752_v3  ;;  %v2287_v37 = vmul.f32 %v6736_v59, %v6736_v59  ;;  %4789 = vrsqrt.f32 %v2402_v61  ;;  %v6765_v40 = vrot.slane %v2589_v10, %v7656_v30 }
 0x3ac   : > { %v2241_v21 = vpop.xlane.xlu0 %2240  ;;  %v2235_v20 = vpop.xlane.xlu1 %2234  ;;  %v6768_v3 = vrot.slane %v2593_v24, %v7656_v30  ;;  %v6771_v47 = vrot.slane %v2605_v48, %v7656_v30  ;;  %4791 = vrsqrt.f32 %v2403_v58  ;;  %v2405_v5 = vadd.f32 1e-05, %v2317_v60 }
 0x3ad   : > { %v2273_v46 = vmul.f32 0.00390625, %v2241_v21  ;;  %v2271_v13 = vmul.f32 0.00390625, %v2235_v20  ;;  %v2330_v21 = vsub.f32 %v6455_v57, %v6657_v4  ;;  %4793 = vrsqrt.f32 %v2404_v22 }
 0x3ae   : > { %7678 = vst [vmem:[#allocation29_spill] sm:$0xff] %v6768_v3  ;;  %7679 = vst [vmem:[#allocation30_spill] sm:$0xff] %v6771_v47  ;;  %v2331_v10 = vsub.f32 %v6457_v53, %v6657_v4  ;;  %4795 = vrsqrt.f32 %v2406_v29  ;;  %v2332_v57 = vsub.f32 %v6465_v6, %v6655_v44 }
 0x3af   : > { %v2305_v1 = vsub.f32 %v2273_v46, %v2289_v62  ;;  %v2303_v31 = vsub.f32 %v2271_v13, %v2287_v37  ;;  %v2333_v62 = vsub.f32 %v6467_v18, %v6655_v44  ;;  %4797 = vrsqrt.f32 %v2405_v5 }
 0x3b0   : > { %v2148_v23 = vpop.xlane.xlu0 %2147  ;;  %v2142_v34 = vpop.xlane.xlu1 %2141  ;;  %v2370_v44 = vmul.f32 %v6634_v7, %v2330_v21  ;;  %v2371_v37 = vmul.f32 %v6634_v7, %v2331_v10  ;;  %v2337_v21 = vsub.f32 %v6487_v41, %v6689_v9 }
 0x3b1   : > { %v2178_v61 = vmul.f32 0.00390625, %v2148_v23  ;;  %v2176_v20 = vmul.f32 0.00390625, %v2142_v34  ;;  %v2321_v24 = vmax.f32 %v2305_v1, 0.0  ;;  %v2319_v32 = vmax.f32 %v2303_v31, 0.0 }
 0x3b2   : > { %v6800_v1 = vrot.slane %v2609_v39, %v7656_v30  ;;  %v2372_v31 = vmul.f32 %v6623_v12, %v2332_v57  ;;  %v2336_v23 = vsub.f32 %v6485_v15, %v6689_v9  ;;  %v2345_v30 = vsub.f32 %v6527_v35, %v6734_v52 }
 0x3b3   : > { %v2346_v48 = vsub.f32 %v6535_v26, %v2178_v61  ;;  %v2347_v58 = vsub.f32 %v6537_v51, %v2178_v61  ;;  %v2342_v13 = vsub.f32 %v6515_v36, %v2176_v20  ;;  %v2343_v60 = vsub.f32 %v6517_v2, %v2176_v20 }
 0x3b4   : > { %v2290_v22 = vmul.f32 %v2178_v61, %v2178_v61  ;;  %v2244_v53 = vpop.xlane.xlu0 %2243  ;;  %v2238_v4 = vpop.xlane.xlu1 %2237  ;;  %v2409_v6 = vadd.f32 1e-05, %v2321_v24  ;;  %v2288_v46 = vmul.f32 %v2176_v20, %v2176_v20  ;;  %v2407_v5 = vadd.f32 1e-05, %v2319_v32  ;;  %7680 = vst [vmem:[#allocation26_spill] sm:$0xff] %v6800_v1 }
 0x3b5   : > { %v6786_v29 = vmul.f32 %v6634_v7, %v2346_v48  ;;  %v6789_v26 = vmul.f32 %v6634_v7, %v2347_v58  ;;  %v6792_v36 = vmul.f32 %v6634_v7, %v2342_v13  ;;  %v6795_v2 = vmul.f32 %v6634_v7, %v2343_v60  ;;  %v4790_v58 = vpop.eup %4789 }
 0x3b6   : > { %v2274_v51 = vmul.f32 0.00390625, %v2244_v53  ;;  %v2272_v18 = vmul.f32 0.00390625, %v2238_v4  ;;  %v2373_v20 = vmul.f32 %v6623_v12, %v2333_v62  ;;  %v2344_v32 = vsub.f32 %v6525_v27, %v6734_v52  ;;  %v4792_v39 = vpop.eup %4791 }
 0x3b7   : > { %4799 = vrsqrt.f32 %v2409_v6  ;;  %v4794_v60 = vpop.eup %4793  ;;  %v2340_v57 = vsub.f32 %v6505_v55, %v6736_v59  ;;  %v2341_v62 = vsub.f32 %v6507_v43, %v6736_v59  ;;  %v2376_v27 = vmul.f32 %v6623_v12, %v2336_v23 }
 0x3b8   : > { %v2306_v34 = vsub.f32 %v2274_v51, %v2290_v22  ;;  %v2304_v61 = vsub.f32 %v2272_v18, %v2288_v46  ;;  %v2157_v48 = vpop.xlane.xlu0 %2156  ;;  %v2151_v24 = vpop.xlane.xlu1 %2150  ;;  %4801 = vrsqrt.f32 %v2407_v5  ;;  %v6817_v52 = vmul.f32 %v4790_v58, %v2370_v44 }
 0x3b9   : > { %v2181_v13 = vmul.f32 0.00390625, %v2157_v48  ;;  %v2179_v41 = vmul.f32 0.00390625, %v2151_v24  ;;  %v4796_v9 = vpop.eup %4795  ;;  %v6819_v4 = vmul.f32 %v4790_v58, %v2371_v37  ;;  %v2377_v6 = vmul.f32 %v6623_v12, %v2337_v21 }
 0x3ba   : > { %v2322_v10 = vmax.f32 %v2306_v34, 0.0  ;;  %v2320_v15 = vmax.f32 %v2304_v61, 0.0  ;;  %v6822_v46 = vmul.f32 %v4792_v39, %v2372_v31  ;;  %v6824_v55 = vmul.f32 %v4792_v39, %v2373_v20  ;;  %v4798_v43 = vpop.eup %4797 }
 0x3bb   : > { %v2293_v22 = vmul.f32 %v2181_v13, %v2181_v13  ;;  %v2384_v59 = vmul.f32 %v6623_v12, %v2344_v32  ;;  %v2385_v34 = vmul.f32 %v6623_v12, %v2345_v30  ;;  %v2380_v44 = vmul.f32 %v6623_v12, %v2340_v57 }
 0x3bc   : > { %v2253_v53 = vpop.xlane.xlu0 %2252  ;;  %v2247_v35 = vpop.xlane.xlu1 %2246  ;;  %v2410_v51 = vadd.f32 1e-05, %v2322_v10  ;;  %v2408_v18 = vadd.f32 1e-05, %v2320_v15  ;;  %v2381_v37 = vmul.f32 %v6623_v12, %v2341_v62  ;;  %v2291_v61 = vmul.f32 %v2179_v41, %v2179_v41 }
 0x3bd   : > { %v2277_v5 = vmul.f32 0.00390625, %v2253_v53  ;;  %v2275_v23 = vmul.f32 0.00390625, %v2247_v35  ;;  %v2352_v48 = vsub.f32 %v6565_v25, %v2181_v13  ;;  %v2353_v31 = vsub.f32 %v6567_v11, %v2181_v13  ;;  %v7681_v35 = vld [vmem:[#allocation34_spill] sm:$0xff] }
 0x3be   : > { %v2348_v24 = vsub.f32 %v6545_v14, %v2179_v41  ;;  %4803 = vrsqrt.f32 %v2410_v51  ;;  %v2349_v32 = vsub.f32 %v6547_v42, %v2179_v41  ;;  %v6835_v15 = vmul.f32 %v4794_v60, %v6660_v33 }
 0x3bf   : > { %v2309_v58 = vsub.f32 %v2277_v5, %v2293_v22  ;;  %v2307_v39 = vsub.f32 %v2275_v23, %v2291_v61  ;;  %4805 = vrsqrt.f32 %v2408_v18  ;;  %v6838_v57 = vmul.f32 %v4794_v60, %v6663_v45 }
 0x3c0   : > { %v2160_v20 = vpop.xlane.xlu0 %2159  ;;  %v2154_v21 = vpop.xlane.xlu1 %2153  ;;  %v6840_v11 = vmul.f32 %v4798_v43, %v2376_v27  ;;  %v6843_v14 = vmul.f32 %v4796_v9, %v6683_v28  ;;  %v6846_v13 = vmul.f32 %v4796_v9, %v6686_v50  ;;  %v6849_v62 = vmul.f32 %v6623_v12, %v2352_v48  ;;  %v7682_v48 = vld [vmem:[#allocation32_spill] sm:$0xff] }
 0x3c1   : > { %v2182_v10 = vmul.f32 0.00390625, %v2160_v20  ;;  %v2180_v30 = vmul.f32 0.00390625, %v2154_v21  ;;  %v2325_v25 = vmax.f32 %v2309_v58, 0.0  ;;  %v4800_v42 = vpop.eup %4799  ;;  %v6852_v41 = vmul.f32 %v6623_v12, %v2353_v31 }
 0x3c2   : > { %v2441_v60 = vmul.f32 %v4798_v43, %v2377_v6  ;;  %v4802_v53 = vpop.eup %4801  ;;  %v6855_v27 = vmul.f32 %v6623_v12, %v2348_v24  ;;  %v6858_v28 = vmul.f32 %v6623_v12, %v2349_v32  ;;  %v2323_v50 = vmax.f32 %v2307_v39, 0.0 }
 0x3c3   : > { %v2294_v33 = vmul.f32 %v2182_v10, %v2182_v10  ;;  %v2354_v9 = vsub.f32 %v6575_v0, %v2182_v10  ;;  %v2355_v51 = vsub.f32 %v7681_v35, %v2182_v10  ;;  %v2292_v5 = vmul.f32 %v2180_v30, %v2180_v30  ;;  %v7683_v0 = vld [vmem:[#allocation33_spill] sm:$0xff] }
 0x3c4   : > { %v2256_v22 = vpop.xlane.xlu0 %2255  ;;  %v2250_v45 = vpop.xlane.xlu1 %2249  ;;  %v2413_v61 = vadd.f32 1e-05, %v2325_v25  ;;  %v2350_v31 = vsub.f32 %v7682_v48, %v2180_v30  ;;  %v6863_v58 = vmul.f32 %v4800_v42, %v2384_v59  ;;  %v6865_v6 = vmul.f32 %v4800_v42, %v2385_v34 }
 0x3c5   : > { %v2278_v18 = vmul.f32 0.00390625, %v2256_v22  ;;  %v2276_v23 = vmul.f32 0.00390625, %v2250_v45  ;;  %v2444_v32 = vmul.f32 %v4802_v53, %v2380_v44  ;;  %v2445_v39 = vmul.f32 %v4802_v53, %v2381_v37  ;;  %v7684_v44 = vld [vmem:[#allocation39_spill] sm:$0xff]  ;;  %v7685_v53 = vld [vmem:[#allocation40_spill] sm:$0xff] }
 0x3c6   : > { %v2411_v1 = vadd.f32 1e-05, %v2323_v50  ;;  %v2351_v47 = vsub.f32 %v7683_v0, %v2180_v30  ;;  %v6869_v45 = vmul.f32 %v6634_v7, %v2354_v9  ;;  %v6872_v25 = vmul.f32 %v6634_v7, %v2355_v51 }
 0x3c7   : > { %v2310_v43 = vsub.f32 %v2278_v18, %v2294_v33  ;;  %v2308_v24 = vsub.f32 %v2276_v23, %v2292_v5  ;;  %4807 = vrsqrt.f32 %v2413_v61  ;;  %v6875_v33 = vmul.f32 %v6634_v7, %v2350_v31  ;;  %v7686_v5 = vld [vmem:[#allocation35_spill] sm:$0xff]  ;;  %v7687_v23 = vld [vmem:[#allocation36_spill] sm:$0xff] }
 0x3c8   : > { %v2166_v20 = vpop.xlane.xlu0 %2165  ;;  %v2163_v21 = vpop.xlane.xlu1 %2162  ;;  %4809 = vrsqrt.f32 %v2411_v1 }
 0x3c9   : > { %v2184_v10 = vmul.f32 0.00390625, %v2166_v20  ;;  %v2183_v22 = vmul.f32 0.00390625, %v2163_v21  ;;  %v2326_v59 = vmax.f32 %v2310_v43, 0.0  ;;  %v2324_v34 = vmax.f32 %v2308_v24, 0.0  ;;  %v4804_v42 = vpop.eup %4803 }
 0x3ca   : > { %v4806_v30 = vpop.eup %4805  ;;  %v2391_v43 = vmul.f32 %v6634_v7, %v2351_v47  ;;  %v6889_v21 = vmul.f32 %v4804_v42, %v6786_v29  ;;  %v6895_v1 = vmul.f32 %v4804_v42, %v6789_v26 }
 0x3cb   : > { %v2358_v37 = vsub.f32 %v7684_v44, %v2184_v10  ;;  %v2359_v50 = vsub.f32 %v7685_v53, %v2184_v10  ;;  %v2414_v35 = vadd.f32 1e-05, %v2326_v59  ;;  %v2412_v18 = vadd.f32 1e-05, %v2324_v34 }
 0x3cc   : > { %v2356_v9 = vsub.f32 %v7686_v5, %v2183_v22  ;;  %v2357_v48 = vsub.f32 %v7687_v23, %v2183_v22  ;;  %v2259_v51 = vpop.xlane.xlu1 %2258  ;;  %v2295_v24 = vmul.f32 %v2183_v22, %v2183_v22  ;;  %v2296_v0 = vmul.f32 %v2184_v10, %v2184_v10 }
 0x3cd   : > { %v6883_v61 = vmul.f32 %v6634_v7, %v2358_v37  ;;  %v6886_v31 = vmul.f32 %v6634_v7, %v2359_v50  ;;  %4811 = vrsqrt.f32 %v2414_v35  ;;  %v2279_v20 = vmul.f32 0.00390625, %v2259_v51 }
 0x3ce   : > { %4813 = vrsqrt.f32 %v2412_v18  ;;  %v6892_v59 = vmul.f32 %v4806_v30, %v6792_v36  ;;  %v6898_v47 = vmul.f32 %v6623_v12, %v2356_v9  ;;  %v6901_v7 = vmul.f32 %v6623_v12, %v2357_v48 }
 0x3cf   : > { %v2311_v34 = vsub.f32 %v2279_v20, %v2295_v24  ;;  %v6906_v29 = vmul.f32 %v4806_v30, %v6795_v2 }
 0x3d0   : > { %v6903_v22 = vpop.permute.xlu0 %2471  ;;  %v2262_v44 = vpop.xlane.xlu1 %2261 }
 0x3d1   : > { %v2280_v10 = vmul.f32 0.00390625, %v2262_v44  ;;  %v6910_v36 = vadd.f32 %v6903_v22, %v6822_v46  ;;  %v6914_v26 = vadd.f32 %v6903_v22, %v6824_v55  ;;  %v6918_v42 = vadd.f32 %v6903_v22, %v6840_v11 }
 0x3d2   : > { %v2327_v37 = vmax.f32 %v2311_v34, 0.0  ;;  %v6921_v53 = vadd.f32 %v6903_v22, %v2441_v60  ;;  %v6924_v2 = vadd.f32 %v6903_v22, %v2444_v32  ;;  %v6927_v50 = vadd.f32 %v6903_v22, %v2445_v39  ;;  %v4808_v32 = vpop.eup %4807 }
 0x3d3   : > { %v2312_v46 = vsub.f32 %v2280_v10, %v2296_v0  ;;  %v7528_v30 = vmax.f32 %v6910_v36, 0.0  ;;  %v7530_v55 = vmax.f32 %v6914_v26, 0.0  ;;  %v7529_v35 = vmax.f32 %v6918_v42, 0.0  ;;  %v4810_v34 = vpop.eup %4809  ;;  %v7690_v10 = vld [vmem:[#allocation41_spill] sm:$0xff] }
 0x3d4   : > { %7688 = vst [vmem:[#allocation22_spill] sm:$0xff] %v6924_v2  ;;  %7689 = vst [vmem:[#allocation21_spill] sm:$0xff] %v6927_v50  ;;  %v2415_v18 = vadd.f32 1e-05, %v2327_v37  ;;  %v2169_v11 = vpop.xlane.xlu1 %2168  ;;  %v7531_v5 = vmax.f32 %v6921_v53, 0.0  ;;  %v7533_v60 = vmax.f32 %v6924_v2, 0.0 }
 0x3d5   : > { %v2328_v23 = vmax.f32 %v2312_v46, 0.0  ;;  %v2185_v48 = vmul.f32 0.00390625, %v2169_v11  ;;  %v2692_v39 = vmul.f32 %v6720_v19, %v7528_v30  ;;  %v2693_v51 = vmul.f32 %v6726_v54, %v7530_v55  ;;  %v7691_v46 = vld [vmem:[#allocation42_spill] sm:$0xff] }
 0x3d6   : > { %4815 = vrsqrt.f32 %v2415_v18  ;;  %v6944_v24 = vmul.f32 %v6729_v63, %v7529_v35  ;;  %v6949_v20 = vmul.f32 %v6732_v49, %v7531_v5  ;;  %v6954_v0 = vmul.f32 %v6739_v17, %v7533_v60 }
 0x3d7   : > { %v2416_v44 = vadd.f32 1e-05, %v2328_v23  ;;  %v2360_v37 = vsub.f32 %v7690_v10, %v2185_v48  ;;  %v2361_v18 = vsub.f32 %v7691_v46, %v2185_v48  ;;  %v2297_v11 = vmul.f32 %v2185_v48, %v2185_v48  ;;  %v4812_v30 = vpop.eup %4811 }
 0x3d8   : > { %v2265_v35 = vpop.xlane.xlu1 %2264  ;;  %v2725_v55 = vmax.f32 %v2692_v39, %v2693_v51  ;;  %v7692_v5 = vmax.f32 %v6927_v50, 0.0  ;;  %v6967_v60 = vadd.f32 %v6903_v22, %v6863_v58  ;;  %v4814_v23 = vpop.eup %4813  ;;  %v2459_v9 = vmul.f32 %v4812_v30, %v6872_v25 }
 0x3d9   : > { %4817 = vrsqrt.f32 %v2416_v44  ;;  %v6970_v10 = vmul.f32 %v6623_v12, %v2360_v37  ;;  %v6973_v48 = vmul.f32 %v6623_v12, %v2361_v18  ;;  %v2281_v39 = vmul.f32 0.00390625, %v2265_v35 }
 0x3da   : > { %v6963_v2 = vmul.f32 %v6744_v16, %v7692_v5  ;;  %2726 = vmax.xlane.f32.xlu0 %v2725_v55  ;;  %v2454_v51 = vmul.f32 %v4814_v23, %v6875_v33  ;;  %v2455_v46 = vmul.f32 %v4814_v23, %v2391_v43  ;;  %v2458_v5 = vmul.f32 %v4812_v30, %v6869_v45 }
 0x3db   : > { %v2313_v50 = vsub.f32 %v2281_v39, %v2297_v11  ;;  %v6982_v44 = vadd.f32 %v6903_v22, %v6865_v6  ;;  %v6988_v55 = vmul.f32 %v4810_v34, %v6855_v27  ;;  %v6991_v33 = vmul.f32 %v4810_v34, %v6858_v28 }
 0x3dc   : > { %v6985_v37 = vpop.permute.xlu1 %2467  ;;  %v6994_v45 = vmul.f32 %v4808_v32, %v6849_v62  ;;  %v6997_v25 = vmul.f32 %v4808_v32, %v6852_v41 }
 0x3dd   : > { %v2329_v43 = vmax.f32 %v2313_v50, 0.0  ;;  %v7000_v6 = vadd.f32 %v6985_v37, %v2454_v51  ;;  %v7003_v30 = vadd.f32 %v6985_v37, %v2455_v46  ;;  %v7007_v27 = vadd.f32 %v6985_v37, %v6817_v52 }
 0x3de   : > { %v7011_v28 = vadd.f32 %v6985_v37, %v6819_v4  ;;  %v7014_v62 = vadd.f32 %v6985_v37, %v2458_v5  ;;  %v7017_v41 = vadd.f32 %v6985_v37, %v2459_v9  ;;  %v7021_v50 = vadd.f32 %v6985_v37, %v6835_v15 }
 0x3df   : > { %v2417_v35 = vadd.f32 1e-05, %v2329_v43  ;;  %v7535_v32 = vmax.f32 %v7000_v6, 0.0  ;;  %v7536_v52 = vmax.f32 %v7003_v30, 0.0  ;;  %v7537_v34 = vmax.f32 %v7007_v27, 0.0 }
 0x3e0   : > { %v7026_v18 = vpop.eup %4815  ;;  %v7538_v4 = vmax.f32 %v7011_v28, 0.0  ;;  %v7539_v11 = vmax.f32 %v7014_v62, 0.0  ;;  %v7540_v9 = vmax.f32 %v7017_v41, 0.0  ;;  %v7033_v23 = vadd.f32 %v6985_v37, %v6838_v57 }
 0x3e1   : > { %4819 = vrsqrt.f32 %v2417_v35  ;;  %v2710_v15 = vmul.f32 %v6765_v40, %v7535_v32  ;;  %v2711_v39 = vmul.f32 %v6768_v3, %v7536_v52  ;;  %v2690_v51 = vmul.f32 %v6720_v19, %v7537_v34 }
 0x3e2   : > { %v2691_v46 = vmul.f32 %v6726_v54, %v7538_v4  ;;  %v2714_v57 = vmul.f32 %v6757_v38, %v7539_v11  ;;  %v2715_v5 = vmul.f32 %v6760_v56, %v7540_v9  ;;  %v7542_v43 = vmax.f32 %v7021_v50, 0.0 }
 0x3e3   : > { %v4818_v35 = vpop.eup %4817  ;;  %v2752_v32 = vmax.f32 %v2710_v15, %v2711_v39  ;;  %v7544_v52 = vmax.f32 %v7033_v23, 0.0  ;;  %v7057_v58 = vadd.f32 %v6985_v37, %v6843_v14  ;;  %v7061_v34 = vadd.f32 %v6985_v37, %v6846_v13 }
 0x3e4   : > { %v2722_v4 = vmax.f32 %v2690_v51, %v2691_v46  ;;  %v2758_v11 = vmax.f32 %v2714_v57, %v2715_v5  ;;  %v2694_v9 = vmul.f32 %v6729_v63, %v7542_v43  ;;  %v2462_v12 = vmul.f32 %v4818_v35, %v6883_v61 }
 0x3e5   : > { %2753 = vmax.xlane.f32.xlu0 %v2752_v32  ;;  %v2695_v15 = vmul.f32 %v6732_v49, %v7544_v52  ;;  %v2463_v14 = vmul.f32 %v4818_v35, %v6886_v31  ;;  %v7541_v39 = vmax.f32 %v7057_v58, 0.0  ;;  %v7543_v13 = vmax.f32 %v7061_v34, 0.0 }
 0x3e6   : > { %2723 = vmax.xlane.f32.xlu1 %v2722_v4  ;;  %v7074_v51 = vadd.f32 %v6985_v37, %v2462_v12  ;;  %v7078_v46 = vadd.f32 %v6985_v37, %v6892_v59  ;;  %v7082_v61 = vadd.f32 %v6985_v37, %v6906_v29  ;;  %v7545_v32 = vmax.f32 %v6982_v44, 0.0 }
 0x3e7   : > { %v2728_v57 = vmax.f32 %v2694_v9, %v2695_v15  ;;  %v7086_v31 = vadd.f32 %v6985_v37, %v2463_v14  ;;  %v2698_v4 = vmul.f32 %v6739_v17, %v7541_v39  ;;  %v2699_v12 = vmul.f32 %v6744_v16, %v7543_v13  ;;  %v7694_v39 = vld [vmem:[#allocation38_spill] sm:$0xff]  ;;  %v7697_v17 = vld [vmem:[#allocation27_spill] sm:$0xff] }
 0x3e8   : > { %v7546_v59 = vmax.f32 %v7074_v51, 0.0  ;;  %v7549_v5 = vmax.f32 %v7078_v46, 0.0  ;;  %v2519_v29 = vmax.f32 %v7082_v61, 0.0  ;;  %v7693_v35 = vmax.f32 %v6967_v60, 0.0  ;;  %v7695_v61 = vld [vmem:[#allocation30_spill] sm:$0xff] }
 0x3e9   : > { %2759 = vmax.xlane.f32.xlu0 %v2758_v11  ;;  %v7555_v15 = vmax.f32 %v7086_v31, 0.0  ;;  %v2734_v14 = vmax.f32 %v2698_v4, %v2699_v12  ;;  %v7106_v43 = vmul.f32 %v7694_v39, %v7545_v32  ;;  %v2490_v13 = vadd.f32 %v6985_v37, %v6889_v21  ;;  %v7696_v21 = vld [vmem:[#allocation26_spill] sm:$0xff] }
 0x3ea   : > { %v7100_v9 = vmul.f32 %v6704_v8, %v7693_v35  ;;  %2729 = vmax.xlane.f32.xlu1 %v2728_v57  ;;  %v2718_v52 = vmul.f32 %v7695_v61, %v7546_v59  ;;  %v7116_v11 = vmul.f32 %v6704_v8, %v7549_v5  ;;  %v7119_v4 = vmul.f32 %v7694_v39, %v2519_v29 }
 0x3eb   : > { %v2491_v12 = vadd.f32 %v6985_v37, %v6895_v1  ;;  %v4820_v35 = vpop.eup %4819  ;;  %v2719_v57 = vmul.f32 %v7696_v21, %v7555_v15  ;;  %v2522_v59 = vmax.f32 %v2490_v13, 0.0  ;;  %v2492_v16 = vadd.f32 %v6903_v22, %v6988_v55  ;;  %v7699_v13 = vld [vmem:[#allocation28_spill] sm:$0xff] }
 0x3ec   : > { %v2743_v32 = vmax.f32 %v7100_v9, %v7106_v43  ;;  %v2740_v5 = vmax.f32 %v7116_v11, %v7119_v4  ;;  %v2493_v8 = vadd.f32 %v6903_v22, %v6991_v33  ;;  %v2496_v1 = vadd.f32 %v6903_v22, %v6994_v45 }
 0x3ed   : > { %v2523_v39 = vmax.f32 %v2491_v12, 0.0  ;;  %v2764_v37 = vmax.f32 %v2718_v52, %v2719_v57  ;;  %v2706_v15 = vmul.f32 %v7697_v17, %v2522_v59  ;;  %v2524_v49 = vmax.f32 %v2492_v16, 0.0 }
 0x3ee   : > { %v2497_v43 = vadd.f32 %v6903_v22, %v6997_v25  ;;  %v7698_v55 = vmax.f32 %v6944_v24, %v6949_v20  ;;  %v2525_v11 = vmax.f32 %v2493_v8, 0.0  ;;  %v2528_v4 = vmax.f32 %v2496_v1, 0.0 }
 0x3ef   : > { %v2707_v9 = vmul.f32 %v7699_v13, %v2523_v39  ;;  %v2460_v33 = vmul.f32 %v7026_v18, %v6898_v47  ;;  %2765 = vmax.xlane.f32.xlu0 %v2764_v37  ;;  %v2708_v45 = vmul.f32 %v7697_v17, %v2524_v49  ;;  %v2461_v16 = vmul.f32 %v7026_v18, %v6901_v7 }
 0x3f0   : > { %2732 = vmax.xlane.f32.xlu1 %v7698_v55  ;;  %v2529_v52 = vmax.f32 %v2497_v43, 0.0  ;;  %v2464_v25 = vmul.f32 %v4820_v35, %v6970_v10  ;;  %v2709_v24 = vmul.f32 %v7699_v13, %v2525_v11  ;;  %v2712_v20 = vmul.f32 %v6765_v40, %v2528_v4 }
 0x3f1   : > { %v2746_v12 = vmax.f32 %v2706_v15, %v2707_v9  ;;  %v2500_v8 = vadd.f32 %v6903_v22, %v2460_v33  ;;  %v2501_v47 = vadd.f32 %v6903_v22, %v2461_v16  ;;  %v2465_v1 = vmul.f32 %v4820_v35, %v6973_v48 }
 0x3f2   : > { %v2713_v57 = vmul.f32 %v6768_v3, %v2529_v52  ;;  %v2504_v37 = vadd.f32 %v6903_v22, %v2464_v25  ;;  %v2749_v43 = vmax.f32 %v2708_v45, %v2709_v24  ;;  %v7700_v10 = vmax.f32 %v7011_v28, 0.0 }
 0x3f3   : > { %v2532_v7 = vmax.f32 %v2500_v8, 0.0  ;;  %v7701_v18 = vmax.f32 %v6914_v26, 0.0  ;;  %v7702_v55 = vmax.f32 %v7007_v27, 0.0  ;;  %v7703_v9 = vmax.f32 %v6910_v36, 0.0 }
 0x3f4   : > { %2735 = vmax.xlane.f32.xlu1 %v2734_v14  ;;  %v2755_v16 = vmax.f32 %v2712_v20, %v2713_v57  ;;  %v2533_v3 = vmax.f32 %v2501_v47, 0.0  ;;  %v2505_v48 = vadd.f32 %v6903_v22, %v2465_v1  ;;  %v2536_v35 = vmax.f32 %v2504_v37, 0.0  ;;  %v7709_v20 = vld [vmem:[#allocation21_spill] sm:$0xff]  ;;  %v7712_v1 = vld [vmem:[#allocation22_spill] sm:$0xff] }
 0x3f5   : > { %v7160_v15 = vpack.c.bf16 %v7701_v18, %v7700_v10  ;;  %v7166_v33 = vpack.c.bf16 %v7703_v9, %v7702_v55  ;;  %v2716_v14 = vmul.f32 %v6757_v38, %v2532_v7  ;;  %v7704_v45 = vmax.f32 %v7033_v23, 0.0 }
 0x3f6   : > { %v7705_v28 = vmax.f32 %v6921_v53, 0.0  ;;  %v7706_v25 = vmax.f32 %v7021_v50, 0.0  ;;  %v7707_v27 = vmax.f32 %v6918_v42, 0.0  ;;  %v7708_v24 = vmax.f32 %v7061_v34, 0.0 }
 0x3f7   : > { %v7710_v8 = vmax.f32 %v7709_v20, 0.0  ;;  %v2717_v57 = vmul.f32 %v6760_v56, %v2533_v3  ;;  %v2537_v47 = vmax.f32 %v2505_v48, 0.0  ;;  %v2720_v23 = vmul.f32 %v7695_v61, %v2536_v35 }
 0x3f8   : > { %v7174_v26 = vpack.c.bf16 %v7705_v28, %v7704_v45  ;;  %v7180_v36 = vpack.c.bf16 %v7707_v27, %v7706_v25  ;;  %v7711_v53 = vmax.f32 %v7057_v58, 0.0  ;;  %v7713_v37 = vmax.f32 %v7712_v1, 0.0 }
 0x3f9   : > { %v7186_v22 = vpack.c.bf16 %v7710_v8, %v7708_v24  ;;  %v7714_v42 = vmax.f32 %v6954_v0, %v6963_v2  ;;  %v7715_v34 = vmax.f32 %v6982_v44, 0.0  ;;  %v7716_v18 = vmax.f32 %v7078_v46, 0.0 }
 0x3fa   : > { %v7194_v50 = vpack.c.bf16 %v7713_v37, %v7711_v53  ;;  %v7717_v55 = vmax.f32 %v6967_v60, 0.0  ;;  %v7209_v48 = vpack.c.bf16 %v2525_v11, %v2523_v39  ;;  %v7211_v58 = vpack.c.bf16 %v2524_v49, %v2522_v59 }
 0x3fb   : > { %2738 = vmax.xlane.f32.xlu1 %v7714_v42  ;;  %v7201_v10 = vpack.c.bf16 %v7715_v34, %v2519_v29  ;;  %v2761_v45 = vmax.f32 %v2716_v14, %v2717_v57  ;;  %v2721_v28 = vmul.f32 %v7696_v21, %v2537_v47  ;;  %v7718_v2 = vmax.f32 %v7003_v30, 0.0  ;;  %v2771_v42 = vld [vmem:[#allocation9 + $0x8] sm:$0xff]  ;;  %v2772_v34 = vld [vmem:[#allocation9 + $0x10] sm:$0xff] }
 0x3fc   : > { %v7207_v9 = vpack.c.bf16 %v7717_v55, %v7716_v18  ;;  %v7719_v44 = vmax.f32 %v7000_v6, 0.0  ;;  %v7720_v46 = vmax.f32 %v7017_v41, 0.0  ;;  %v7721_v39 = vmax.f32 %v7014_v62, 0.0  ;;  %v2773_v18 = vld [vmem:[#allocation9 + $0x18] sm:$0xff]  ;;  %v2774_v55 = vld [vmem:[#allocation9 + $0x20] sm:$0xff] }
 0x3fd   : > { %v7216_v0 = vpack.c.bf16 %v2529_v52, %v7718_v2  ;;  %v7722_v49 = vmax.f32 %v7086_v31, 0.0  ;;  %v7723_v30 = vmax.f32 %v7074_v51, 0.0  ;;  %v2767_v14 = vmax.f32 %v2720_v23, %v2721_v28  ;;  %v2776_v28 = vld [vmem:[#allocation9 + $0x30] sm:$0xff]  ;;  %v2931_v2 = vld [vmem:[#allocation7] sm:$0xff] }
 0x3fe   : > { %v7220_v29 = vpack.c.bf16 %v2528_v4, %v7719_v44  ;;  %v7224_v60 = vpack.c.bf16 %v2533_v3, %v7720_v46  ;;  %v7228_v11 = vpack.c.bf16 %v2532_v7, %v7721_v39  ;;  %v2770_v3 = vld [vmem:[#allocation9] sm:$0xff]  ;;  %v2933_v44 = vld [vmem:[#allocation7 + $0x10] sm:$0xff] }
 0x3ff   : > { %v7232_v59 = vpack.c.bf16 %v2537_v47, %v7722_v49  ;;  %v7236_v52 = vpack.c.bf16 %v2536_v35, %v7723_v30  ;;  %2741 = vmax.xlane.f32.xlu1 %v2740_v5  ;;  %4356 = vmatprep.mubr.f32.mxu1 %v2770_v3  ;;  %v2935_v46 = vld [vmem:[#allocation7 + $0x20] sm:$0xff]  ;;  %v2937_v39 = vld [vmem:[#allocation7 + $0x30] sm:$0xff]  ;;  %v2944_v3 = vld [vmem:[#allocation7 + $0x68] sm:$0xff] }
 0x400   : > { %v2939_v49 = vld [vmem:[#allocation7 + $0x40] sm:$0xff]  ;;  %v2941_v30 = vld [vmem:[#allocation7 + $0x50] sm:$0xff] }
 0x403   : > { %2744 = vmax.xlane.f32.xlu1 %v2743_v32 }
 0x407   : > { %2747 = vmax.xlane.f32.xlu1 %v2746_v12 }
 0x40b   : > { %2750 = vmax.xlane.f32.xlu1 %v2749_v43 }
 0x40f   : > { %2756 = vmax.xlane.f32.xlu1 %v2755_v16 }
 0x413   : > { %2762 = vmax.xlane.f32.xlu1 %v2761_v45  ;;  %v2775_v45 = vld [vmem:[#allocation9 + $0x28] sm:$0xff] }
 0x417   : > { %2768 = vmax.xlane.f32.xlu1 %v2767_v14  ;;  %v2943_v14 = vld [vmem:[#allocation7 + $0x60] sm:$0xff] }
 0x467   : > { %v2727_v6 = vpop.xlane.xlu0 %2726 }
 0x472   : > { %v2754_v25 = vpop.xlane.xlu0 %2753 }
 0x473   : > { %v2724_v62 = vpop.xlane.xlu1 %2723 }
 0x474   : > { %v4447_v41 = vpack.c.bf16 %v2727_v6, %v2724_v62  ;;  %v2945_v6 = vld [vmem:[#allocation7 + $0x70] sm:$0xff]  ;;  %v2946_v62 = vld [vmem:[#allocation7 + $0x78] sm:$0xff] }
 0x476   : > { %4448 = vmatprep.subr.bf16.mxu1 %v4447_v41  ;;  %v2760_v57 = vpop.xlane.xlu0 %2759 }
 0x477   : > { %4450 = vmatpush3.bf16.msra.mxu1 %v4447_v41  ;;  %v2730_v31 = vpop.xlane.xlu1 %2729 }
 0x47c   : > { %v2766_v53 = vpop.xlane.xlu0 %2765 }
 0x47d   : > { %v2733_v4 = vpop.xlane.xlu1 %2732 }
 0x47e   : > { %v4451_v51 = vpack.c.bf16 %v2733_v4, %v2730_v31 }
 0x480   : > { %4452 = vmatprep.subr.bf16.mxu1 %v4451_v51 }
 0x481   : > { %4454 = vmatpush3.bf16.msra.mxu1 %v4451_v51  ;;  %v2736_v7 = vpop.xlane.xlu1 %2735 }
 0x488   : > { %v2739_v5 = vpop.xlane.xlu1 %2738 }
 0x489   : > { %v4455_v32 = vpack.c.bf16 %v2739_v5, %v2736_v7 }
 0x48b   : > { %4456 = vmatprep.subr.bf16.mxu1 %v4455_v32 }
 0x48c   : > { %4458 = vmatpush3.bf16.msra.mxu1 %v4455_v32  ;;  %v2742_v12 = vpop.xlane.xlu1 %2741 }
 0x490   : > { %v2745_v43 = vpop.xlane.xlu1 %2744 }
 0x491   : > { %v4459_v16 = vpack.c.bf16 %v2745_v43, %v2742_v12 }
 0x493   : > { %4460 = vmatprep.subr.bf16.mxu1 %v4459_v16 }
 0x494   : > { %4462 = vmatpush3.bf16.msra.mxu1 %v4459_v16  ;;  %v2748_v35 = vpop.xlane.xlu1 %2747 }
 0x498   : > { %v2751_v27 = vpop.xlane.xlu1 %2750 }
 0x499   : > { %v4463_v24 = vpack.c.bf16 %v2751_v27, %v2748_v35  ;;  %v418_v27 = vld [vmem:[%s7274_s17 + $0x8] sm:$0xff] }
 0x49b   : > { %4464 = vmatprep.subr.bf16.mxu1 %v4463_v24 }
 0x49c   : > { %4466 = vmatpush3.bf16.msra.mxu1 %v4463_v24  ;;  %v2757_v20 = vpop.xlane.xlu1 %2756 }
 0x49d   : > { %v4467_v8 = vpack.c.bf16 %v2757_v20, %v2754_v25 }
 0x49f   : > { %4468 = vmatprep.subr.bf16.mxu1 %v4467_v8 }
 0x4a0   : > { %4470 = vmatpush3.bf16.msra.mxu1 %v4467_v8  ;;  %v2763_v47 = vpop.xlane.xlu1 %2762 }
 0x4a1   : > { %v4471_v23 = vpack.c.bf16 %v2763_v47, %v2760_v57 }
 0x4a3   : > { %4472 = vmatprep.subr.bf16.mxu1 %v4471_v23 }
 0x4a4   : > { %4474 = vmatpush3.bf16.msra.mxu1 %v4471_v23  ;;  %v2769_v1 = vpop.xlane.xlu1 %2768 }
 0x4a5   : > { %v4475_v37 = vpack.c.bf16 %v2769_v1, %v2766_v53 }
 0x4a7   : > { %4476 = vmatprep.subr.bf16.mxu1 %v4475_v37 }
 0x4a8   : > { %4478 = vmatpush3.bf16.msra.mxu1 %v4475_v37  ;;  %v422_v37 = vld [vmem:[%s7274_s17 + $0x28] sm:$0xff] }
 0x4a9   : > { %4480 = vmatprep.subr.bf16.mxu1 %v7160_v15  ;;  %v2777_v15 = vld [vmem:[#allocation9 + $0x38] sm:$0xff]  ;;  %3456 = vmatprep.mubr.f32.mxu0 %v422_v37 }
 0x4ab   : > { %4357 = vmatmul.mubr.f32.vlgmr.msra.gmra.mrb[0].mxu1 %v2771_v42 }
 0x4ac   : > { %4482 = vmatpush1.bf16.msra.mxu1 %v7166_v33  ;;  %4359 = vmatprep.mubr.f32.mxu1 %v2772_v34  ;;  %v2778_v33 = vld [vmem:[#allocation9 + $0x40] sm:$0xff] }
 0x4ad   : > { %4484 = vmatprep.subr.bf16.mxu1 %v7174_v26  ;;  %v2779_v26 = vld [vmem:[#allocation9 + $0x48] sm:$0xff] }
 0x4af   : > { %4360 = vmatmul.mubr.f32.gmra.mrb[2].mxu1 %v2773_v18 }
 0x4b0   : > { %4486 = vmatpush1.bf16.msra.mxu1 %v7180_v36  ;;  %4362 = vmatprep.mubr.f32.mxu1 %v2774_v55  ;;  %v2780_v36 = vld [vmem:[#allocation9 + $0x50] sm:$0xff] }
 0x4b1   : > { %4488 = vmatprep.subr.bf16.mxu1 %v7186_v22  ;;  %v2781_v22 = vld [vmem:[#allocation9 + $0x58] sm:$0xff] }
 0x4b3   : > { %4363 = vmatmul.mubr.f32.gmra.mrb[4].mxu1 %v2775_v45 }
 0x4b4   : > { %4490 = vmatpush1.bf16.msra.mxu1 %v7194_v50  ;;  %4365 = vmatprep.mubr.f32.mxu1 %v2776_v28  ;;  %v2782_v50 = vld [vmem:[#allocation9 + $0x60] sm:$0xff] }
 0x4b5   : > { %4492 = vmatprep.subr.bf16.mxu1 %v7201_v10  ;;  %v2783_v10 = vld [vmem:[#allocation9 + $0x68] sm:$0xff] }
 0x4b7   : > { %4366 = vmatmul.mubr.f32.gmra.mrb[6].mxu1 %v2777_v15 }
 0x4b8   : > { %4494 = vmatpush1.bf16.msra.mxu1 %v7207_v9  ;;  %4368 = vmatprep.mubr.f32.mxu1 %v2778_v33  ;;  %v2784_v9 = vld [vmem:[#allocation9 + $0x70] sm:$0xff] }
 0x4b9   : > { %4496 = vmatprep.subr.bf16.mxu1 %v7209_v48  ;;  %v2785_v48 = vld [vmem:[#allocation9 + $0x78] sm:$0xff] }
 0x4bb   : > { %4369 = vmatmul.mubr.f32.gmra.mrb[8].mxu1 %v2779_v26 }
 0x4bc   : > { %4498 = vmatpush1.bf16.msra.mxu1 %v7211_v58  ;;  %4371 = vmatprep.mubr.f32.mxu1 %v2780_v36  ;;  %v7724_v58 = vmov 0.0  }
 0x4bd   : > { %4500 = vmatprep.subr.bf16.mxu1 %v7216_v0  ;;  %v2932_v0 = vld [vmem:[#allocation7 + $0x8] sm:$0xff] }
 0x4bf   : > { %4372 = vmatmul.mubr.f32.gmra.mrb[10].mxu1 %v2781_v22 }
 0x4c0   : > { %4502 = vmatpush1.bf16.msra.mxu1 %v7220_v29  ;;  %4374 = vmatprep.mubr.f32.mxu1 %v2782_v50  ;;  %v2934_v29 = vld [vmem:[#allocation7 + $0x18] sm:$0xff] }
 0x4c1   : > { %4504 = vmatprep.subr.bf16.mxu1 %v7224_v60  ;;  %v2936_v60 = vld [vmem:[#allocation7 + $0x28] sm:$0xff] }
 0x4c3   : > { %4375 = vmatmul.mubr.f32.gmra.mrb[12].mxu1 %v2783_v10 }
 0x4c4   : > { %4506 = vmatpush1.bf16.msra.mxu1 %v7228_v11  ;;  %4377 = vmatprep.mubr.f32.mxu1 %v2784_v9  ;;  %v2938_v11 = vld [vmem:[#allocation7 + $0x38] sm:$0xff] }
 0x4c5   : > { %4508 = vmatprep.subr.bf16.mxu1 %v7232_v59  ;;  %v2940_v59 = vld [vmem:[#allocation7 + $0x48] sm:$0xff] }
 0x4c7   : > { %4378 = vmatmul.mubr.f32.gmra.mrb[14].mxu1 %v2785_v48 }
 0x4c8   : > { %4510 = vmatpush1.bf16.msra.mxu1 %v7236_v52  ;;  %3091 = vmatprep.mubr.f32.mxu1 %v7724_v58  ;;  %v2942_v52 = vld [vmem:[#allocation7 + $0x58] sm:$0xff] }
 0x4cb   : > { %3092 = vmatmul.mubr.f32.vlgmr.msra.gmra.mrb[16].mxu1 %v2931_v2 }
 0x4cc   : > { %3097 = vmatprep.mubr.f32.mxu1 %v7724_v58 }
 0x4cf   : > { %3098 = vmatmul.mubr.f32.gmra.mrb[18].mxu1 %v2932_v0 }
 0x4d0   : > { %3103 = vmatprep.mubr.f32.mxu1 %v7724_v58 }
 0x4d3   : > { %3104 = vmatmul.mubr.f32.gmra.mrb[20].mxu1 %v2933_v44 }
 0x4d4   : > { %3109 = vmatprep.mubr.f32.mxu1 %v7724_v58 }
 0x4d7   : > { %3110 = vmatmul.mubr.f32.gmra.mrb[22].mxu1 %v2934_v29 }
 0x4d8   : > { %3115 = vmatprep.mubr.f32.mxu1 %v7724_v58 }
 0x4db   : > { %3116 = vmatmul.mubr.f32.gmra.mrb[24].mxu1 %v2935_v46 }
 0x4dc   : > { %3121 = vmatprep.mubr.f32.mxu1 %v7724_v58 }
 0x4df   : > { %3122 = vmatmul.mubr.f32.gmra.mrb[26].mxu1 %v2936_v60 }
 0x4e0   : > { %3127 = vmatprep.mubr.f32.mxu1 %v7724_v58 }
 0x4e3   : > { %3128 = vmatmul.mubr.f32.gmra.mrb[28].mxu1 %v2937_v39 }
 0x4e4   : > { %3133 = vmatprep.mubr.f32.mxu1 %v7724_v58 }
 0x4e7   : > { %3134 = vmatmul.mubr.f32.gmra.mrb[30].mxu1 %v2938_v11 }
 0x4e8   : > { %3139 = vmatprep.mubr.f32.mxu1 %v7724_v58 }
 0x4eb   : > { %3140 = vmatmul.mubr.f32.gmra.mrb[32].mxu1 %v2939_v49 }
 0x4ec   : > { %3145 = vmatprep.mubr.f32.mxu1 %v7724_v58 }
 0x4ef   : > { %3146 = vmatmul.mubr.f32.gmra.mrb[34].mxu1 %v2940_v59 }
 0x4f0   : > { %3151 = vmatprep.mubr.f32.mxu1 %v7724_v58 }
 0x4f3   : > { %3152 = vmatmul.mubr.f32.gmra.mrb[36].mxu1 %v2941_v30 }
 0x4f4   : > { %3157 = vmatprep.mubr.f32.mxu1 %v7724_v58 }
 0x4f7   : > { %3158 = vmatmul.mubr.f32.gmra.mrb[38].mxu1 %v2942_v52 }
 0x4f8   : > { %3163 = vmatprep.mubr.f32.mxu1 %v7724_v58 }
 0x4fb   : > { %3164 = vmatmul.mubr.f32.gmra.mrb[40].mxu1 %v2943_v14 }
 0x4fc   : > { %3169 = vmatprep.mubr.f32.mxu1 %v7724_v58 }
 0x4ff   : > { %3170 = vmatmul.mubr.f32.gmra.mrb[42].mxu1 %v2944_v3 }
 0x500   : > { %3175 = vmatprep.mubr.f32.mxu1 %v7724_v58 }
 0x503   : > { %3176 = vmatmul.mubr.f32.gmra.mrb[44].mxu1 %v2945_v6 }
 0x504   : > { %3181 = vmatprep.mubr.f32.mxu1 %v7724_v58 }
 0x507   : > { %3182 = vmatmul.mubr.f32.gmra.mrb[46].mxu1 %v2946_v62 }
 0x508   : > { %3316 = vmatprep.mubr.f32.mxu1 %v418_v27 }
 0x57e   : > { %v4358_v41 = vpop.f32.mrb[0].mxu1 }
 0x57f   : > { %2954 = vperm.xlu1 %4692, %v4358_v41   ;;  %v2852_v31 = vpop.f32.mrb[1].mxu1 }
 0x580   : > { %2949 = vperm.xlu0 %4691, %v2852_v31  }
 0x582   : > { %v4361_v4 = vpop.f32.mrb[2].mxu1 }
 0x583   : > { %2964 = vperm.xlu1 %4692, %v4361_v4   ;;  %v2862_v51 = vpop.f32.mrb[3].mxu1 }
 0x586   : > { %v4364_v7 = vpop.f32.mrb[4].mxu1 }
 0x587   : > { %2959 = vperm.xlu1 %4692, %v2862_v51   ;;  %v2872_v5 = vpop.f32.mrb[5].mxu1 }
 0x58a   : > { %v4367_v32 = vpop.f32.mrb[6].mxu1 }
 0x58b   : > { %2974 = vperm.xlu1 %4692, %v4364_v7   ;;  %v2882_v12 = vpop.f32.mrb[7].mxu1 }
 0x58e   : > { %v4370_v43 = vpop.f32.mrb[8].mxu1 }
 0x58f   : > { %2969 = vperm.xlu1 %4692, %v2872_v5   ;;  %2994 = vperm.xlu0 %4691, %v4370_v43   ;;  %v2892_v16 = vpop.f32.mrb[9].mxu1 }
 0x592   : > { %v4373_v35 = vpop.f32.mrb[10].mxu1 }
 0x593   : > { %2984 = vperm.xlu1 %4692, %v4367_v32   ;;  %3004 = vperm.xlu0 %4691, %v4373_v35   ;;  %v2902_v25 = vpop.f32.mrb[11].mxu1 }
 0x596   : > { %v4376_v24 = vpop.f32.mrb[12].mxu1 }
 0x597   : > { %2979 = vperm.xlu1 %4692, %v2882_v12   ;;  %3014 = vperm.xlu0 %4691, %v4376_v24   ;;  %v2912_v20 = vpop.f32.mrb[13].mxu1 }
 0x59a   : > { %v4379_v8 = vpop.f32.mrb[14].mxu1 }
 0x59b   : > { %2989 = vperm.xlu1 %4692, %v2892_v16   ;;  %3024 = vperm.xlu0 %4691, %v4379_v8   ;;  %v2922_v57 = vpop.f32.mrb[15].mxu1 }
 0x59e   : > { %v3093_v47 = vpop.f32.mrb[16].mxu1 }
 0x59f   : > { %2999 = vperm.xlu1 %4692, %v2902_v25   ;;  %v3095_v23 = vpop.f32.mrb[17].mxu1 }
 0x5a2   : > { %v3099_v53 = vpop.f32.mrb[18].mxu1 }
 0x5a3   : > { %3009 = vperm.xlu1 %4692, %v2912_v20   ;;  %v3101_v1 = vpop.f32.mrb[19].mxu1 }
 0x5a6   : > { %v3105_v42 = vpop.f32.mrb[20].mxu1 }
 0x5a7   : > { %3019 = vperm.xlu1 %4692, %v2922_v57   ;;  %v3107_v34 = vpop.f32.mrb[21].mxu1 }
 0x5aa   : > { %v3111_v18 = vpop.f32.mrb[22].mxu1 }
 0x5ab   : > { %v3113_v55 = vpop.f32.mrb[23].mxu1 }
 0x5ae   : > { %v7278_v45 = vpop.f32.mrb[24].mxu1 }
 0x5af   : > { %v7280_v28 = vpop.f32.mrb[25].mxu1 }
 0x5b2   : > { %v3123_v15 = vpop.f32.mrb[26].mxu1 }
 0x5b3   : > { %v3125_v33 = vpop.f32.mrb[27].mxu1 }
 0x5b6   : > { %v7282_v26 = vpop.f32.mrb[28].mxu1 }
 0x5b7   : > { %v7284_v36 = vpop.f32.mrb[29].mxu1 }
 0x5ba   : > { %v7286_v22 = vpop.f32.mrb[30].mxu1 }
 0x5bb   : > { %v7288_v50 = vpop.f32.mrb[31].mxu1 }
 0x5be   : > { %v7290_v10 = vpop.f32.mrb[32].mxu1 }
 0x5bf   : > { %v7292_v9 = vpop.f32.mrb[33].mxu1 }
 0x5c2   : > { %v7294_v48 = vpop.f32.mrb[34].mxu1 }
 0x5c3   : > { %v7296_v2 = vpop.f32.mrb[35].mxu1 }
 0x5c6   : > { %v7298_v0 = vpop.f32.mrb[36].mxu1 }
 0x5c7   : > { %v7300_v44 = vpop.f32.mrb[37].mxu1 }
 0x5ca   : > { %v7302_v29 = vpop.f32.mrb[38].mxu1 }
 0x5cb   : > { %v7304_v46 = vpop.f32.mrb[39].mxu1 }
 0x5ce   : > { %v7306_v60 = vpop.f32.mrb[40].mxu1 }
 0x5cf   : > { %v7308_v39 = vpop.f32.mrb[41].mxu1 }
 0x5d2   : > { %v7310_v11 = vpop.f32.mrb[42].mxu1 }
 0x5d3   : > { %v7312_v49 = vpop.f32.mrb[43].mxu1 }
 0x5d6   : > { %v7314_v59 = vpop.f32.mrb[44].mxu1 }
 0x5d7   : > { %v7316_v30 = vpop.f32.mrb[45].mxu1 }
 0x5da   : > { %v7318_v52 = vpop.f32.mrb[46].mxu1 }
 0x5db   : > { %v7320_v14 = vpop.f32.mrb[47].mxu1 }
 0x5fe   : > { %v2955_v3 = vpop.permute.xlu1 %2954 }
 0x5ff   : > { %v3100_v6 = vadd.f32 %v3099_v53, %v2955_v3  ;;  %v3102_v62 = vadd.f32 %v3101_v1, %v2955_v3  ;;  %v2950_v41 = vpop.permute.xlu0 %2949 }
 0x600   : > { %v3094_v31 = vadd.f32 %v3093_v47, %v2950_v41  ;;  %v3096_v4 = vadd.f32 %v3095_v23, %v2950_v41 }
 0x601   : > { %v3190_v51 = vmax.f32 %v3100_v6, 0.0  ;;  %v3191_v7 = vmax.f32 %v3102_v62, 0.0 }
 0x602   : > { %v3188_v5 = vmax.f32 %v3094_v31, 0.0  ;;  %v3189_v32 = vmax.f32 %v3096_v4, 0.0  ;;  %v2965_v12 = vpop.permute.xlu1 %2964 }
 0x603   : > { %v3222_v43 = vmul.f32 %v3190_v51, %v6720_v19  ;;  %v3223_v16 = vmul.f32 %v3191_v7, %v6726_v54  ;;  %v3112_v35 = vadd.f32 %v3111_v18, %v2965_v12  ;;  %v3114_v25 = vadd.f32 %v3113_v55, %v2965_v12  ;;  %v7725_v55 = vld [vmem:[#allocation43_spill] sm:$0xff]  ;;  %v420_v12 = vld [vmem:[%s7274_s17 + $0x18] sm:$0xff] }
 0x604   : > { %v3220_v27 = vmul.f32 %v3188_v5, %v6720_v19  ;;  %v3221_v24 = vmul.f32 %v3189_v32, %v6726_v54 }
 0x605   : > { %v3194_v8 = vmax.f32 %v3112_v35, 0.0  ;;  %v3195_v57 = vmax.f32 %v3114_v25, 0.0  ;;  %v7727_v25 = vld [vmem:[#allocation45_spill] sm:$0xff] }
 0x606   : > { %v4513_v20 = vpack.c.bf16 %v3222_v43, %v3220_v27  ;;  %v2960_v47 = vpop.permute.xlu1 %2959  ;;  %v4511_v23 = vpack.c.bf16 %v3223_v16, %v3221_v24 }
 0x607   : > { %v3106_v53 = vadd.f32 %v3105_v42, %v2960_v47  ;;  %v3108_v1 = vadd.f32 %v3107_v34, %v2960_v47  ;;  %v3226_v18 = vmul.f32 %v3194_v8, %v6729_v63  ;;  %v3227_v6 = vmul.f32 %v3195_v57, %v7725_v55  ;;  %v417_v42 = vld [vmem:[%s7274_s17] sm:$0xff] }
 0x608   : > { %4512 = vmatprep.subr.bf16.mxu1 %v4511_v23 }
 0x609   : > { %v3192_v37 = vmax.f32 %v3106_v53, 0.0  ;;  %v3193_v3 = vmax.f32 %v3108_v1, 0.0  ;;  %4514 = vmatpush1.bf16.xpose.msra.mxu1 %v4513_v20 }
 0x60a   : > { %v2975_v19 = vpop.permute.xlu1 %2974 }
 0x60b   : > { %v3224_v54 = vmul.f32 %v3192_v37, %v6729_v63  ;;  %v3225_v62 = vmul.f32 %v3193_v3, %v7725_v55  ;;  %v3124_v41 = vadd.f32 %v3123_v15, %v2975_v19  ;;  %v3126_v31 = vadd.f32 %v3125_v33, %v2975_v19  ;;  %v7726_v15 = vld [vmem:[#allocation44_spill] sm:$0xff]  ;;  %v419_v55 = vld [vmem:[%s7274_s17 + $0x10] sm:$0xff] }
 0x60d   : > { %v4517_v4 = vpack.c.bf16 %v3226_v18, %v3224_v54  ;;  %v4515_v51 = vpack.c.bf16 %v3227_v6, %v3225_v62  ;;  %v3198_v34 = vmax.f32 %v3124_v41, 0.0  ;;  %v3199_v7 = vmax.f32 %v3126_v31, 0.0  ;;  %v428_v54 = vld [vmem:[%s7274_s17 + $0x58] sm:$0xff] }
 0x60e   : > { %v2970_v5 = vpop.permute.xlu1 %2969  ;;  %v2995_v32 = vpop.permute.xlu0 %2994 }
 0x60f   : > { %v3118_v43 = vadd.f32 %v7278_v45, %v2970_v5  ;;  %v3120_v16 = vadd.f32 %v7280_v28, %v2970_v5  ;;  %4516 = vmatprep.subr.bf16.mxu1 %v4515_v51  ;;  %v3230_v33 = vmul.f32 %v3198_v34, %v7726_v15  ;;  %v3231_v27 = vmul.f32 %v3199_v7, %v7727_v25 }
 0x610   : > { %3317 = vmatmul.mubr.f32.vlgmr.msra.gmra.mrb[48].mxu1 %v417_v42  ;;  %v3148_v53 = vadd.f32 %v7294_v48, %v2995_v32  ;;  %v3150_v1 = vadd.f32 %v7296_v2, %v2995_v32  ;;  %v7729_v42 = vld [vmem:[#allocation38_spill] sm:$0xff] }
 0x611   : > { %v3196_v35 = vmax.f32 %v3118_v43, 0.0  ;;  %v3197_v63 = vmax.f32 %v3120_v16, 0.0  ;;  %4518 = vmatpush1.bf16.xpose.msra.mxu1 %v4517_v4  ;;  %3386 = vmatprep.mubr.f32.mxu1 %v420_v12  ;;  %v7728_v4 = vld [vmem:[#allocation37_spill] sm:$0xff] }
 0x612   : > { %v2985_v24 = vpop.permute.xlu1 %2984  ;;  %v3005_v57 = vpop.permute.xlu0 %3004  ;;  %v3206_v2 = vmax.f32 %v3148_v53, 0.0  ;;  %v3207_v31 = vmax.f32 %v3150_v1, 0.0 }
 0x613   : > { %v3228_v20 = vmul.f32 %v3196_v35, %v7726_v15  ;;  %v3229_v8 = vmul.f32 %v3197_v63, %v7727_v25  ;;  %v3136_v45 = vadd.f32 %v7286_v22, %v2985_v24  ;;  %v3138_v28 = vadd.f32 %v7288_v50, %v2985_v24  ;;  %v421_v63 = vld [vmem:[%s7274_s17 + $0x20] sm:$0xff] }
 0x614   : > { %v3160_v22 = vadd.f32 %v7302_v29, %v3005_v57  ;;  %v3162_v50 = vadd.f32 %v7304_v46, %v3005_v57  ;;  %v3238_v15 = vmul.f32 %v3206_v2, %v7697_v17 }
 0x615   : > { %v4521_v47 = vpack.c.bf16 %v3230_v33, %v3228_v20  ;;  %v4519_v23 = vpack.c.bf16 %v3231_v27, %v3229_v8  ;;  %v3202_v37 = vmax.f32 %v3136_v45, 0.0  ;;  %v3203_v3 = vmax.f32 %v3138_v28, 0.0  ;;  %v424_v20 = vld [vmem:[%s7274_s17 + $0x38] sm:$0xff] }
 0x616   : > { %v2980_v18 = vpop.permute.xlu1 %2979  ;;  %v3015_v48 = vpop.permute.xlu0 %3014  ;;  %v3210_v5 = vmax.f32 %v3160_v22, 0.0  ;;  %v3211_v32 = vmax.f32 %v3162_v50, 0.0  ;;  %v3239_v33 = vmul.f32 %v3207_v31, %v7699_v13 }
 0x617   : > { %v3130_v6 = vadd.f32 %v7282_v26, %v2980_v18  ;;  %v3132_v19 = vadd.f32 %v7284_v36, %v2980_v18  ;;  %4520 = vmatprep.subr.bf16.mxu0 %v4519_v23  ;;  %v3234_v51 = vmul.f32 %v3202_v37, %v7728_v4  ;;  %v3235_v26 = vmul.f32 %v3203_v3, %v7729_v42 }
 0x618   : > { %4522 = vmatpush1.bf16.xpose.msra.mxu0 %v4521_v47  ;;  %3387 = vmatmul.mubr.f32.vlgmr.msra.gmra.mrb[50].mxu1 %v419_v55  ;;  %v3172_v25 = vadd.f32 %v7310_v11, %v3015_v48  ;;  %v3174_v27 = vadd.f32 %v7312_v49, %v3015_v48  ;;  %v3242_v57 = vmul.f32 %v3210_v5, %v6765_v40  ;;  %v7730_v47 = vld [vmem:[#allocation29_spill] sm:$0xff]  ;;  %v430_v5 = vld [vmem:[%s7274_s17 + $0x68] sm:$0xff] }
 0x619   : > { %v3200_v62 = vmax.f32 %v3130_v6, 0.0  ;;  %v3201_v41 = vmax.f32 %v3132_v19, 0.0  ;;  %3666 = vmatprep.mubr.f32.mxu1 %v428_v54  ;;  %v3243_v23 = vmul.f32 %v3211_v32, %v7730_v47  ;;  %v432_v32 = vld [vmem:[%s7274_s17 + $0x78] sm:$0xff] }
 0x61a   : > { %v2990_v34 = vpop.permute.xlu1 %2989  ;;  %v3025_v8 = vpop.permute.xlu0 %3024 }
 0x61b   : > { %v3232_v36 = vmul.f32 %v3200_v62, %v7728_v4  ;;  %v3233_v29 = vmul.f32 %v3201_v41, %v7729_v42  ;;  %v3142_v46 = vadd.f32 %v7290_v10, %v2990_v34  ;;  %v3144_v7 = vadd.f32 %v7292_v9, %v2990_v34  ;;  %v423_v62 = vld [vmem:[%s7274_s17 + $0x30] sm:$0xff] }
 0x61c   : > { %v3184_v37 = vadd.f32 %v7318_v52, %v3025_v8 }
 0x61d   : > { %v4525_v12 = vpack.c.bf16 %v3234_v51, %v3232_v36  ;;  %v3204_v43 = vmax.f32 %v3142_v46, 0.0  ;;  %v3205_v16 = vmax.f32 %v3144_v7, 0.0  ;;  %v4523_v35 = vpack.c.bf16 %v3235_v26, %v3233_v29  ;;  %v427_v36 = vld [vmem:[%s7274_s17 + $0x50] sm:$0xff]  ;;  %v425_v7 = vld [vmem:[%s7274_s17 + $0x40] sm:$0xff] }
 0x61e   : > { %v3000_v24 = vpop.permute.xlu1 %2999  ;;  %v3218_v41 = vmax.f32 %v3184_v37, 0.0 }
 0x61f   : > { %v3236_v10 = vmul.f32 %v3204_v43, %v7697_v17  ;;  %v3237_v9 = vmul.f32 %v3205_v16, %v7699_v13  ;;  %v3154_v45 = vadd.f32 %v7298_v0, %v3000_v24  ;;  %v3156_v28 = vadd.f32 %v7300_v44, %v3000_v24  ;;  %4524 = vmatprep.subr.bf16.mxu0 %v4523_v35  ;;  %v3991_v43 = vld [vmem:[#allocation10 + $0x8] sm:$0xff]  ;;  %v3992_v16 = vld [vmem:[#allocation10 + $0x10] sm:$0xff] }
 0x620   : > { %3457 = vmatmul.mubr.f32.vlgmr.msra.gmra.mrb[32].mxu0 %v421_v63  ;;  %v3214_v17 = vmax.f32 %v3172_v25, 0.0  ;;  %v3215_v13 = vmax.f32 %v3174_v27, 0.0  ;;  %v3186_v0 = vadd.f32 %v7320_v14, %v3025_v8  ;;  %v5046_v35 = vmov 0.0|0.0   ;;  %v3994_v25 = vld [vmem:[#allocation10 + $0x20] sm:$0xff]  ;;  %v3995_v27 = vld [vmem:[#allocation10 + $0x28] sm:$0xff] }
 0x621   : > { %v4529_v11 = vpack.c.bf16 %v3238_v15, %v3236_v10  ;;  %v3208_v53 = vmax.f32 %v3154_v45, 0.0  ;;  %v3209_v49 = vmax.f32 %v3156_v28, 0.0  ;;  %4526 = vmatpush1.bf16.xpose.msra.mxu0 %v4525_v12  ;;  %v4527_v1 = vpack.c.bf16 %v3239_v33, %v3237_v9  ;;  %3526 = vmatprep.mubr.f32.mxu0 %v424_v20  ;;  %v431_v12 = vld [vmem:[%s7274_s17 + $0x70] sm:$0xff]  ;;  %v3993_v15 = vld [vmem:[#allocation10 + $0x18] sm:$0xff]  ;;  %v3998_v8 = vld [vmem:[#allocation10 + $0x40] sm:$0xff] }
 0x622   : > { %v3010_v44 = vpop.permute.xlu1 %3009  ;;  %v3246_v52 = vmul.f32 %v3214_v17, %v6757_v38  ;;  %v3247_v14 = vmul.f32 %v3215_v13, %v6760_v56  ;;  %v3219_v48 = vmax.f32 %v3186_v0, 0.0  ;;  %v4547_v33 = vpack.c.bf16 %v3993_v15, %v3992_v16  ;;  %v3996_v20 = vld [vmem:[#allocation10 + $0x30] sm:$0xff]  ;;  %v3997_v10 = vld [vmem:[#allocation10 + $0x38] sm:$0xff]  ;;  %v3999_v45 = vld [vmem:[#allocation10 + $0x48] sm:$0xff] }
 0x623   : > { %v3240_v3 = vmul.f32 %v3208_v53, %v6765_v40  ;;  %v3241_v18 = vmul.f32 %v3209_v49, %v7730_v47  ;;  %v3166_v55 = vadd.f32 %v7306_v60, %v3010_v44  ;;  %v3168_v6 = vadd.f32 %v7308_v39, %v3010_v44  ;;  %4528 = vmatprep.subr.bf16.mxu0 %v4527_v1  ;;  %v426_v40 = vld [vmem:[%s7274_s17 + $0x48] sm:$0xff]  ;;  %v7731_v44 = vld [vmem:[#allocation23_spill] sm:$0xff] }
 0x624   : > { %v4550_v24 = vpack.c.bf16 %v3995_v27, %v3994_v25  ;;  %v4553_v9 = vpack.c.bf16 %v3997_v10, %v3996_v20  ;;  %v4556_v28 = vpack.c.bf16 %v3999_v45, %v3998_v8  ;;  %v5047_v53 = vmov 1983009808   ;;  %v4003_v16 = vld [vmem:[#allocation10 + $0x68] sm:$0xff] }
 0x625   : > { %v4533_v19 = vpack.c.bf16 %v3242_v57, %v3240_v3  ;;  %v3212_v54 = vmax.f32 %v3166_v55, 0.0  ;;  %v3213_v22 = vmax.f32 %v3168_v6, 0.0  ;;  %v4531_v50 = vpack.c.bf16 %v3243_v23, %v3241_v18 }
 0x626   : > { %v3020_v2 = vpop.permute.xlu1 %3019  ;;  %v3815_v49 = vunpack.c.l.s4 %v5047_v53 }
 0x627   : > { %v3244_v31 = vmul.f32 %v3212_v54, %v6757_v38  ;;  %v3245_v60 = vmul.f32 %v3213_v22, %v6760_v56  ;;  %v3178_v39 = vadd.f32 %v7314_v59, %v3020_v2  ;;  %v3180_v4 = vadd.f32 %v7316_v30, %v3020_v2  ;;  %4532 = vmatprep.subr.bf16.mxu1 %v4531_v50 }
 0x628   : > { %3527 = vmatmul.mubr.f32.vlgmr.msra.gmra.mrb[34].mxu0 %v423_v62  ;;  %4534 = vmatpush1.bf16.xpose.msra.mxu1 %v4533_v19  ;;  %v3250_v38 = vmul.f32 %v3218_v41, %v7695_v61  ;;  %v3251_v56 = vmul.f32 %v3219_v48, %v7696_v21  ;;  %v3816_v0 = vunpack.c.0.s8 %v3815_v49 }
 0x629   : > { %v4537_v51 = vpack.c.bf16 %v3246_v52, %v3244_v31  ;;  %v3216_v42 = vmax.f32 %v3178_v39, 0.0  ;;  %v3217_v26 = vmax.f32 %v3180_v4, 0.0  ;;  %4530 = vmatpush1.bf16.xpose.msra.mxu0 %v4529_v11  ;;  %v4535_v34 = vpack.c.bf16 %v3247_v14, %v3245_v60  ;;  %3596 = vmatprep.mubr.f32.mxu0 %v426_v40 }
 0x62a   : > { %v3819_v3 = vsub.s32 %v3816_v0, %v7731_v44  ;;  %v5048_v39 = vmov 1934713408  }
 0x62b   : > { %v3248_v59 = vmul.f32 %v3216_v42, %v7695_v61  ;;  %v3249_v30 = vmul.f32 %v3217_v26, %v7696_v21  ;;  %4536 = vmatprep.subr.bf16.mxu0 %v4535_v34  ;;  %v429_v61 = vld [vmem:[%s7274_s17 + $0x60] sm:$0xff]  ;;  %v3879_v4 = vunpack.c.l.s4 %v5048_v39  ;;  %v4000_v26 = vld [vmem:[#allocation10 + $0x50] sm:$0xff]  ;;  %v4001_v34 = vld [vmem:[#allocation10 + $0x58] sm:$0xff]  ;;  %s4954_s17 = sshll.u32 %s5057_s9, 4  ;;  %s4955_s17 = int_to_ptr.vmem [resolvable:$false] %s4954_s17 }
 0x62c   : > { %v3990_v21 = vld [vmem:[#allocation10] sm:$0xff]  ;;  %p4957_p3 = scmp.lt.s32.totalorder %s7403_s19, %s4955_s17 }
 0x62d   : > { %v4541_v29 = vpack.c.bf16 %v3250_v38, %v3248_v59  ;;  %v4539_v46 = vpack.c.bf16 %v3251_v56, %v3249_v30  ;;  %v4544_v63 = vpack.c.bf16 %v3991_v43, %v3990_v21  ;;  %v4002_v43 = vld [vmem:[#allocation10 + $0x60] sm:$0xff] }
 0x62f   : > { %4540 = vmatprep.subr.bf16.mxu1 %v4539_v46  ;;  %3667 = vmatmul.mubr.f32.vlgmr.msra.gmra.mrb[52].mxu1 %v427_v36  ;;  %v4559_v36 = vpack.c.bf16 %v4001_v34, %v4000_v26 }
 0x630   : > { %3597 = vmatmul.mubr.f32.vlgmr.msra.gmra.mrb[36].mxu0 %v425_v7  ;;  %4542 = vmatpush1.bf16.xpose.msra.mxu1 %v4541_v29 }
 0x631   : > { %4538 = vmatpush1.bf16.xpose.msra.mxu0 %v4537_v51  ;;  %3736 = vmatprep.mubr.f32.mxu0 %v430_v5  ;;  %v3880_v51 = vunpack.c.0.s8 %v3879_v4 }
 0x632   : > { %3806 = vmatprep.mubr.f32.mxu1 %v432_v32  ;;  %4543 = vmatprep.subr.bf16.mxu0 %v5046_v35 }
 0x633   : > { %v3883_v5 = vsub.s32 %v3880_v51, %v7731_v44 }
 0x637   : > { %3807 = vmatmul.mubr.f32.vlgmr.msra.gmra.mrb[54].mxu1 %v431_v12 }
 0x638   : > { %3737 = vmatmul.mubr.f32.vlgmr.msra.gmra.mrb[38].mxu0 %v429_v61 }
 0x639   : > { %4545 = vmatpush3.bf16.msra.mxu0 %v4544_v63  ;;  %v4562_v63 = vpack.c.bf16 %v4003_v16, %v4002_v43  ;;  %4412 = vmatprep.mubr.msk.f32.mxu0 %vm5051_vm9, %v7724_v58 }
 0x63a   : > { %4546 = vmatprep.subr.bf16.mxu0 %v5046_v35 }
 0x63d   : > { %4548 = vmatpush3.bf16.msra.mxu0 %v4547_v33 }
 0x63e   : > { %4549 = vmatprep.subr.bf16.mxu0 %v5046_v35 }
 0x641   : > { %4551 = vmatpush3.bf16.msra.mxu0 %v4550_v24 }
 0x642   : > { %4552 = vmatprep.subr.bf16.mxu0 %v5046_v35 }
 0x645   : > { %4554 = vmatpush3.bf16.msra.mxu0 %v4553_v9 }
 0x646   : > { %4555 = vmatprep.subr.bf16.mxu0 %v5046_v35 }
 0x649   : > { %4557 = vmatpush3.bf16.msra.mxu0 %v4556_v28 }
 0x64a   : > { %4558 = vmatprep.subr.bf16.mxu0 %v5046_v35 }
 0x64d   : > { %4560 = vmatpush3.bf16.msra.mxu0 %v4559_v36 }
 0x64e   : > { %4561 = vmatprep.subr.bf16.mxu0 %v5046_v35 }
 0x651   : > { %4563 = vmatpush3.bf16.msra.mxu0 %v4562_v63 }
 0x652   : > { %4564 = vmatprep.subr.bf16.mxu0 %v5046_v35 }
 0x6e3   : > { %v3318_v57 = vpop.f32.mrb[48].mxu1 }
 0x6e4   : > { %v3320_v47 = vpop.f32.mrb[49].mxu1 }
 0x6e5   : > { %v4005_v47 = vld [vmem:[#allocation10 + $0x78] sm:$0xff] }
 0x6eb   : > { %v3388_v23 = vpop.f32.mrb[50].mxu1 }
 0x6ec   : > { %v3390_v11 = vpop.f32.mrb[51].mxu1 }
 0x6f3   : > { %v3458_v1 = vpop.f32.mrb[32].mxu0 }
 0x6f4   : > { %v3812_v17 = vcombine.low %v3318_v57, %v3458_v1  ;;  %v3813_v13 = vcombine.high %v3318_v57, %v3458_v1  ;;  %v3460_v37 = vpop.f32.mrb[33].mxu0  ;;  %v4004_v57 = vld [vmem:[#allocation10 + $0x70] sm:$0xff] }
 0x6f5   : > { %v4565_v11 = vpack.c.bf16 %v4005_v47, %v4004_v57 }
 0x6f6   : > { %v3820_v54 = vrot.slane %v3812_v17, %v3819_v3  ;;  %v3827_v22 = vrot.slane %v3813_v13, %v3819_v3 }
 0x6f7   : > { %4566 = vmatpush3.bf16.msra.mxu0 %v4565_v11 }
 0x6fb   : > { %v3528_v18 = vpop.f32.mrb[34].mxu0 }
 0x6fc   : > { %v3828_v55 = vcombine.low %v3388_v23, %v3528_v18  ;;  %v3829_v6 = vcombine.high %v3388_v23, %v3528_v18  ;;  %v3530_v19 = vpop.f32.mrb[35].mxu0 }
 0x6fe   : > { %v3836_v50 = vrot.slane %v3828_v55, %v3819_v3  ;;  %v3843_v62 = vrot.slane %v3829_v6, %v3819_v3 }
 0x700   : > { %v3876_v52 = vcombine.low %v3820_v54, %v3836_v50  ;;  %v3877_v14 = vcombine.high %v3820_v54, %v3836_v50  ;;  %v3892_v41 = vcombine.low %v3827_v22, %v3843_v62  ;;  %v3893_v48 = vcombine.high %v3827_v22, %v3843_v62 }
 0x702   : > { %v3668_v2 = vpop.f32.mrb[52].mxu1  ;;  %v3884_v24 = vrot.slane %v3876_v52, %v3883_v5  ;;  %v3891_v20 = vrot.slane %v3877_v14, %v3883_v5  ;;  %v3900_v10 = vrot.slane %v3892_v41, %v3883_v5  ;;  %v3907_v23 = vrot.slane %v3893_v48, %v3883_v5 }
 0x703   : > { %v3598_v40 = vpop.f32.mrb[36].mxu0  ;;  %v3670_v31 = vpop.f32.mrb[53].mxu1 }
 0x704   : > { %v3600_v60 = vpop.f32.mrb[37].mxu0 }
 0x70a   : > { %v3808_v42 = vpop.f32.mrb[54].mxu1 }
 0x70b   : > { %v3738_v38 = vpop.f32.mrb[38].mxu0  ;;  %v3860_v56 = vcombine.low %v3668_v2, %v3808_v42  ;;  %v3861_v59 = vcombine.high %v3668_v2, %v3808_v42  ;;  %v3810_v30 = vpop.f32.mrb[55].mxu1 }
 0x70c   : > { %v3844_v29 = vcombine.low %v3598_v40, %v3738_v38  ;;  %v3845_v46 = vcombine.high %v3598_v40, %v3738_v38  ;;  %v3740_v7 = vpop.f32.mrb[39].mxu0 }
 0x70d   : > { %v3868_v32 = vrot.slane %v3860_v56, %v3819_v3  ;;  %v3875_v12 = vrot.slane %v3861_v59, %v3819_v3 }
 0x70e   : > { %v3852_v61 = vrot.slane %v3844_v29, %v3819_v3  ;;  %v3859_v21 = vrot.slane %v3845_v46, %v3819_v3 }
 0x710   : > { %v3908_v15 = vcombine.low %v3852_v61, %v3868_v32  ;;  %v3909_v33 = vcombine.high %v3852_v61, %v3868_v32  ;;  %v3924_v25 = vcombine.low %v3859_v21, %v3875_v12  ;;  %v3925_v27 = vcombine.high %v3859_v21, %v3875_v12 }
 0x712   : > { %v3916_v9 = vrot.slane %v3908_v15, %v3883_v5  ;;  %v3923_v8 = vrot.slane %v3909_v33, %v3883_v5  ;;  %v3932_v45 = vrot.slane %v3924_v25, %v3883_v5  ;;  %v3939_v28 = vrot.slane %v3925_v27, %v3883_v5 }
 0x714   : > { %v3941_v53 = vcombine.high %v3884_v24, %v3916_v9  ;;  %v3942_v49 = vcombine.low %v3891_v20, %v3923_v8  ;;  %v3943_v1 = vcombine.high %v3891_v20, %v3923_v8  ;;  %v3944_v17 = vcombine.low %v3900_v10, %v3932_v45 }
 0x715   : > { %v3945_v13 = vcombine.high %v3900_v10, %v3932_v45  ;;  %v3946_v37 = vcombine.low %v3907_v23, %v3939_v28  ;;  %v3947_v0 = vcombine.high %v3907_v23, %v3939_v28  ;;  %v3940_v44 = vcombine.low %v3884_v24, %v3916_v9 }
 0x716   : > { %3949 = vrot.lane.b32.xlu1 %v3941_v53, %s5049_s23  ;;  %3953 = vrot.lane.b32.xlu0 %v3942_v49, %s5050_s20  ;;  %s4956_s23 = scalar_lea.vmem %s4955_s17, 256 }
 0x717   : > { %p4958_p0 = scmp.lt.s32.totalorder %s4956_s23, %s4950_s25 }
 0x719   : > { %p4959_p4 = por %p4958_p0, %p4957_p3 }
 0x71a   : > { %3957 = vrot.lane.b32.xlu1 %v3943_v1, %s5052_s22  ;;  %3961 = vrot.lane.b32.xlu0 %v3944_v17, %s5053_s10 }
 0x71b   : > { %p4960_p7 = pnand %p4959_p4, %p4953_p2 }
 0x71e   : > { %3965 = vrot.lane.b32.xlu1 %v3945_v13, %s5054_s18  ;;  %3969 = vrot.lane.b32.xlu0 %v3946_v37, %s5055_s29 }
 0x722   : > { %3973 = vrot.lane.b32.xlu1 %v3947_v0, %s5056_s3 }
 0x788   : > { %v3950_v35 = vpop.permute.xlu1 %3949  ;;  %v3954_v3 = vpop.permute.xlu0 %3953 }
 0x789   : > { %v3977_v18 = vsel %vm3976_vm10, %v3940_v44, %v3950_v35 }
 0x78a   : > { %v3979_v55 = vsel %vm3978_vm11, %v3977_v18, %v3954_v3 }
 0x78c   : > { %v3958_v6 = vpop.permute.xlu1 %3957  ;;  %v3962_v58 = vpop.permute.xlu0 %3961 }
 0x78d   : > { %v3981_v19 = vsel %vm3980_vm12, %v3979_v55, %v3958_v6 }
 0x78e   : > { %v3983_v54 = vsel %vm3982_vm13, %v3981_v19, %v3962_v58 }
 0x790   : > { %v3966_v22 = vpop.permute.xlu1 %3965  ;;  %v3970_v62 = vpop.permute.xlu0 %3969 }
 0x791   : > { %v3985_v50 = vsel %vm3984_vm14, %v3983_v54, %v3966_v22 }
 0x792   : > { %v3987_v52 = vsel %vm3986_vm15, %v3985_v50, %v3970_v62 }
 0x794   : > { %v3974_v14 = vpop.permute.xlu1 %3973 }
 0x795   : > { %v3989_v41 = vsel %vm3988_vm0, %v3987_v52, %v3974_v14 }
 0x796   : > { %4413 = vmatmul.mubr.f32.vlgmr.msra.gmra.mrb[40].mxu0 %v3989_v41 }
 0x869   : > { %v4072_v48 = vpop.f32.mrb[40].mxu0 }
 0x86a   : > { %4076 = vst [vmem:[%s392_s24] sm:$0xff] %v4072_v48  ;;  %v4414_v2 = vpop.f32.mrb[41].mxu0 }
 0x86b   : > { %4963 = shalt.err (!%p4960_p7)
}
 0x86c   : > { %s4964_s20 = scalar_lea.hbm %s7408_s12, 128  ;;  %s4968_s18 = scalar_lea.hbm %s7456_s8, 256 }
 0x86d   : > { %p4965_p8 = scmp.ne.s32.totalorder %s7408_s12, %s4964_s20  ;;  %p4969_p13 = scmp.lt.u32.totalorder %s7408_s12, %s7456_s8 }
 0x86e   : > { %p4970_p5 = scmp.lt.u32.totalorder %s4968_s18, %s4964_s20  ;;  %p4972_p9 = scmp.lt.u32.totalorder %s4964_s20, %s7408_s12 }
 0x86f   : > { %p4966_p11 = pnand %p4965_p8, %p7732_p10 }
 0x870   : > { %p4971_p6 = por %p4970_p5, %p4969_p13 }
 0x871   : > { %p4967_p12 = pneg %p4966_p11 }
 0x872   : > { %p4973_p1 = por %p4972_p9, %p4971_p6 }
 0x874   : > { %p4974_p2 = pnand %p4973_p1, %p4967_p12 }
 0x876   : > { %4977 = shalt.err (!%p4974_p2)
}
 0x877   : > { %4587 = dma.vmem_to_hbm [thread:$0]  (%p7732_p10), %s7403_s19, 128, %s7408_s12, %s4078_s26  }
 0x878 PF: > { %p4619_p3 = scmp.ge.s32.totalorder %s5028_s30, 2  ;;  %s4103_s11 = sand.u32 1, %s5016_s27  }
 0x879   : > { %p7733_p0 = scmp.ne.s32.totalorder %s7566_s16, 0  ;;  %s4104_s14 = scalar_lea.sflag [#allocation4], %s4103_s11 }
 0x87b   : > { %p4606_p4 = pnand %p4619_p3, %p7733_p0 }
 0x87d   : > { %5011 = dma.done.wait (!%p4606_p4), %s4104_s14, 128  }
 0x87e   : > { %5013 = vsyncadd (!%p4606_p4), %s4104_s14, 4294967168  ;;  %s7734_s30 = sld [smem:[#allocation19_spill]]  ;;  %s7735_s24 = sld [smem:[#allocation18_spill]] }
 0x87f   : > { %s7736_s29 = sld [smem:[#allocation20_spill]]  ;;  %s7737_s27 = smov %s5020_s28 }
 0x884   : > { %p22_p7 = scmp.ge.s32.totalorder %s7734_s30, 4   ;;  %s7738_s28 = smov %s7735_s24 }
 0x886   :  { %24 = sbr.rel (!%p22_p7) target bundleno = 10 (0xa), region = 112 }
 0x88d   :  { %4109 = vsyncpa [#allocation3], 1 }
 0x88e   :  { %4111 = vsyncpa [#allocation3 + $0x1], 1 }
 0x88f   :  { %4112 = vsyncpa [#allocation8], 1 }
 0x890   :  { %4113 = vsyncpa [#allocation11], 1 }
 0x891   :  { %4114 = vsyncpa [#allocation4], 1 }
 0x892   :  { %4116 = vsyncpa [#allocation4 + $0x1], 1 }
 0x893   :  { %4117 = vsyncpa [#allocation5], 1 }
 0x894   :  { %4119 = vsyncpa [#allocation5 + $0x1], 1 }

</bundles_post_ra>
